<compile_context>
chip_gen: v7x
topology: tpu7x:2x2x1
jax: 0.10.0
libtpu: 0.0.40
codegen_flags: <defaults>
</compile_context>

<pallas_src>
import jax
import jax.numpy as jnp
import numpy as np
from jax import lax
from jax.experimental import pallas as pl
from jax.experimental.pallas import tpu as pltpu


def _round_up(x, m):
    return ((x + m - 1) // m) * m


def _pad2(a, rows, cols):
    a = a.astype(jnp.float32)
    return jnp.pad(a, ((0, rows - a.shape[0]), (0, cols - a.shape[1])))


def _generative_kernel(
    y_ref, z_ref,
    w1_ref, b1_ref,
    wmu2a_ref, bmu2a_ref, wvar2a_ref, bvar2a_ref,
    wg2t_ref, pxz_ref,
    ymean_ref, yvar_ref, xrec_ref,
):
    f32 = jnp.float32
    zd = wg2t_ref.shape[0]           # padded z_dim
    tb = ymean_ref.shape[0]          # batch-row tile size

    # ---- pzy: fused first layer (mu & logvar branches share one matmul). Recomputed
    # per grid step (cheap) so there is no cross-step carry -> both axes "parallel".
    h = jnp.dot(y_ref[...], w1_ref[...], preferred_element_type=f32) + b1_ref[...]
    h = jnp.maximum(h, 0.0)                                           # (tb, 2*zd)

    # ---- layer-2 weights already have adj folded in: output panel = h @ (W2 @ adj).
    h_mu = h[:, :zd].astype(wmu2a_ref.dtype)
    h_var = h[:, zd:].astype(wvar2a_ref.dtype)
    ymean_ref[...] = (jnp.dot(h_mu, wmu2a_ref[...], preferred_element_type=f32)
                      + bmu2a_ref[...])
    yvar_ref[...] = jnp.exp(jnp.dot(h_var, wvar2a_ref[...], preferred_element_type=f32)
                            + bvar2a_ref[...])

    # ---- pxz element-wise MLP: genes on the lane axis, hidden units (z_dim) on sublanes.
    wg1c = pxz_ref[:, 0:1]           # (zd, 1)
    bg1c = pxz_ref[:, 1:2]           # (zd, 1)
    bg2c = pxz_ref[:, 2:3]           # (zd, 1)
    wg3c = pxz_ref[:, 3:4]           # (zd, 1)
    bg3 = pxz_ref[0:1, 4:5]          # (1, 1)
    wg2t = wg2t_ref[...]             # (zd, zd), pre-transposed in the wrapper

    def pxz_row(b):
        z_row = z_ref[pl.ds(b, 1), :]                                 # (1, tg)
        h1 = jnp.maximum(wg1c * z_row + bg1c, 0.0)                    # (zd, tg) outer product
        h2 = jnp.dot(wg2t, h1, preferred_element_type=f32) + bg2c     # (zd, tg) MXU
        h2 = jnp.maximum(h2, 0.0)
        # Direct slice store (no rows list / concatenate).
        xrec_ref[pl.ds(b, 1), :] = jnp.sum(h2 * wg3c, axis=0, keepdims=True) + bg3

    if tb <= 16:
        for b in range(tb):          # small static unroll
            pxz_row(b)
    else:
        def body(b, carry):
            pxz_row(b)
            return carry
        lax.fori_loop(0, tb, body, 0)


def generative_net_forward(z, y, adj, params, *, tile_b=None, use_bf16=False):
    """z: (B, n_gene), y: (B, y_dim), adj: (n_gene, n_gene)."""
    B, n_gene = z.shape
    y_dim = y.shape[1]
    z_dim = params["wg2"].shape[0]
    x_dim = params["wg3"].shape[1]
    assert x_dim == 1, "PyTorch code's .squeeze(2) implies x_dim == 1"

    LANE = 128
    f32 = jnp.float32

    if tile_b is None:
        tile_b = min(128, _round_up(B, 8))   # large batches get MXU-sized row tiles
    tb = tile_b
    Bp = _round_up(B, tb)
    yd = _round_up(y_dim, LANE)
    zd = _round_up(z_dim, LANE)
    ng = _round_up(n_gene, LANE)
    # Post-fold the per-step footprint is only (zd, tg) panels, so big panels are safe
    # within VMEM on every generation (v7x included).
    tg = next(t for t in (1024, 512, 256, 128) if ng % t == 0)

    # ---- fold adj into the layer-2 weights / biases (one-time plain-XLA matmuls).
    adj_f = adj.astype(f32)
    wmu2_adj = params["wmu2"].astype(f32) @ adj_f
    bmu2_adj = params["bmu2"].astype(f32) @ adj_f
    wvar2_adj = params["wvar2"].astype(f32) @ adj_f
    bvar2_adj = params["bvar2"].astype(f32) @ adj_f

    # ---- pad activations (zeros keep the math exact; outputs sliced back below)
    yp = _pad2(y, Bp, yd)
    zp = _pad2(z, Bp, ng)

    # ---- fused first layer of the mu / var branches
    w1 = jnp.concatenate(
        [_pad2(params["wmu1"], yd, zd), _pad2(params["wvar1"], yd, zd)], axis=1)
    b1 = jnp.concatenate(
        [_pad2(params["bmu1"], 1, zd), _pad2(params["bvar1"], 1, zd)], axis=1)

    w_dtype = jnp.bfloat16 if use_bf16 else f32
    wmu2a = _pad2(wmu2_adj, zd, ng).astype(w_dtype)
    bmu2a = _pad2(bmu2_adj, 1, ng)
    wvar2a = _pad2(wvar2_adj, zd, ng).astype(w_dtype)
    bvar2a = _pad2(bvar2_adj, 1, ng)

    # ---- pxz weights: (Z,Z) matrix + the five tiny params packed into one (zd, 128)
    wg2t = _pad2(params["wg2"], zd, zd).T      # (Z, Z) transposed: h2 = wg2t @ h1
    pxz_pack = jnp.zeros((zd, LANE), f32)
    pxz_pack = pxz_pack.at[:, 0:1].set(_pad2(params["wg1"].T, zd, 1))
    pxz_pack = pxz_pack.at[:, 1:2].set(_pad2(params["bg1"].T, zd, 1))
    pxz_pack = pxz_pack.at[:, 2:3].set(_pad2(params["bg2"].T, zd, 1))
    pxz_pack = pxz_pack.at[:, 3:4].set(_pad2(params["wg3"], zd, 1))
    pxz_pack = pxz_pack.at[0, 4].set(params["bg3"].astype(f32).reshape(()))

    grid = (Bp // tb, ng // tg)
    const = lambda i, j: (0, 0)

    in_specs = [
        pl.BlockSpec((tb, yd), lambda i, j: (i, 0)),        # y
        pl.BlockSpec((tb, tg), lambda i, j: (i, j)),        # z (lane-dense)
        pl.BlockSpec((yd, 2 * zd), const),                  # fused W1 (small, resident)
        pl.BlockSpec((1, 2 * zd), const),                   # fused b1
        pl.BlockSpec((zd, tg), lambda i, j: (0, j)),        # (wmu2 @ adj) column panel
        pl.BlockSpec((1, tg), lambda i, j: (0, j)),         # (bmu2 @ adj) panel
        pl.BlockSpec((zd, tg), lambda i, j: (0, j)),        # (wvar2 @ adj) column panel
        pl.BlockSpec((1, tg), lambda i, j: (0, j)),         # (bvar2 @ adj) panel
        pl.BlockSpec((zd, zd), const),                      # wg2^T
        pl.BlockSpec((zd, LANE), const),                    # packed pxz small params
    ]
    out_specs = (
        pl.BlockSpec((tb, tg), lambda i, j: (i, j)),        # y_mean
        pl.BlockSpec((tb, tg), lambda i, j: (i, j)),        # y_var
        pl.BlockSpec((tb, tg), lambda i, j: (i, j)),        # x_rec
    )
    out_shape = (
        jax.ShapeDtypeStruct((Bp, ng), f32),
        jax.ShapeDtypeStruct((Bp, ng), f32),
        jax.ShapeDtypeStruct((Bp, ng), f32),
    )

    steps_i, steps_j = grid
    steps = steps_i * steps_j
    w_itemsize = 2 if use_bf16 else 4
    flops = steps * (
        2 * tb * yd * (2 * zd)                 # fused pzy layer 1 (recomputed per step)
        + 2 * 2 * tb * zd * tg                 # mu / logvar folded panel matmuls
        + tb * (2 * zd * zd * tg + 4 * zd * tg)  # pxz: MXU matmul + VPU outer / reduce
    )
    bytes_accessed = int(
        4 * Bp * yd * steps_j                  # y (upper bound; revisits are skipped)
        + 4 * Bp * ng                          # z
        + w_itemsize * (2 * zd * ng) * steps_i  # folded layer-2 panels per batch tile
        + 4 * 2 * ng * steps_i                 # folded biases
        + 4 * (int(w1.size) + int(b1.size) + int(wg2t.size) + int(pxz_pack.size))
        + 4 * 3 * Bp * ng                      # outputs
    )

    y_mean_p, y_var_p, x_rec_p = pl.pallas_call(
        _generative_kernel,
        out_shape=out_shape,
        grid_spec=pltpu.PrefetchScalarGridSpec(
            num_scalar_prefetch=0,
            grid=grid,
            in_specs=in_specs,
            out_specs=out_specs,
        ),
        compiler_params=pltpu.CompilerParams(
            # No cross-step carries -> both axes independent; v7x megacore gets work
            # on either axis.
            dimension_semantics=("parallel", "parallel"),
            # Post-fold per-step footprint is only a few MiB; 48 MiB is generous
            # headroom and is within physical VMEM on v5e/v6e (128 MiB) and v7x (64 MiB).
            vmem_limit_bytes=48 * 1024 * 1024,
        ),
        cost_estimate=pl.CostEstimate(
            flops=int(flops), transcendentals=int(Bp * ng),
            bytes_accessed=bytes_accessed),
    )(yp, zp, w1, b1, wmu2a, bmu2a, wvar2a, bvar2a, wg2t, pxz_pack)

    return {
        "y_mean": y_mean_p[:B, :n_gene],
        "y_var": y_var_p[:B, :n_gene],
        "x_rec": x_rec_p[:B, :n_gene],
    }


def init_params(key, x_dim, z_dim, y_dim, n_gene):
    """Deterministic PyTorch-style (kaiming-uniform-ish) init for all Linear layers."""
    keys = jax.random.split(key, 7)

    def lin(k, fan_in, fan_out):
        kw, kb = jax.random.split(k)
        bound = 1.0 / np.sqrt(fan_in)
        w = jax.random.uniform(kw, (fan_in, fan_out), jnp.float32, -bound, bound)
        b = jax.random.uniform(kb, (1, fan_out), jnp.float32, -bound, bound)
        return w, b

    p = {}
    p["wmu1"], p["bmu1"] = lin(keys[0], y_dim, z_dim)
    p["wmu2"], p["bmu2"] = lin(keys[1], z_dim, n_gene)
    p["wvar1"], p["bvar1"] = lin(keys[2], y_dim, z_dim)
    p["wvar2"], p["bvar2"] = lin(keys[3], z_dim, n_gene)
    p["wg1"], p["bg1"] = lin(keys[4], 1, z_dim)
    p["wg2"], p["bg2"] = lin(keys[5], z_dim, z_dim)
    p["wg3"], p["bg3"] = lin(keys[6], z_dim, x_dim)
    return p


def reference_forward(z, y, adj, p):
    """Pure-JAX reference mirroring the PyTorch forward."""
    relu = lambda v: jnp.maximum(v, 0.0)
    h = relu(y @ p["wmu1"] + p["bmu1"])
    mu = (h @ p["wmu2"] + p["bmu2"]) @ adj
    hv = relu(y @ p["wvar1"] + p["bvar1"])
    var = jnp.exp((hv @ p["wvar2"] + p["bvar2"]) @ adj)
    zf = z.reshape(-1, 1)
    g = relu(zf @ p["wg1"] + p["bg1"])
    g = relu(g @ p["wg2"] + p["bg2"])
    xr = (g @ p["wg3"] + p["bg3"]).reshape(z.shape)
    return {"y_mean": mu, "y_var": var, "x_rec": xr}


if __name__ == "__main__":
    # Small shapes consistent with the module's forward.
    B, y_dim, z_dim, n_gene, x_dim = 2, 8, 32, 16, 1

    key = jax.random.PRNGKey(0)
    kp, kz, ky, ka = jax.random.split(key, 4)

    params = init_params(kp, x_dim, z_dim, y_dim, n_gene)
    z = jax.random.normal(kz, (B, n_gene), jnp.float32)
    y = jax.random.normal(ky, (B, y_dim), jnp.float32)
    adj = jax.random.normal(ka, (n_gene, n_gene), jnp.float32)

    out = generative_net_forward(z, y, adj, params)
    jax.block_until_ready(out)

    ref = reference_forward(z, y, adj, params)
    # Tolerance slightly loosened: folding adj into the layer-2 weights changes the
    # f32 summation association ((h@W2)@adj vs h@(W2@adj)).
    for name in ("y_mean", "y_var", "x_rec"):
        np.testing.assert_allclose(np.asarray(out[name]), np.asarray(ref[name]),
                                   rtol=1e-4, atol=1e-4)

    print("KERNEL_OK")
</pallas_src>

<mosaic_0001>
module attributes {stable_mosaic.version = 11 : i64} {
  func.func @_generative_kernel(%arg0: i32, %arg1: i32, %arg2: memref<8x128xf32, #tpu.memory_space<vmem>>, %arg3: memref<8x128xf32, #tpu.memory_space<vmem>>, %arg4: memref<128x256xf32, #tpu.memory_space<vmem>>, %arg5: memref<1x256xf32, #tpu.memory_space<vmem>>, %arg6: memref<128x128xf32, #tpu.memory_space<vmem>>, %arg7: memref<1x128xf32, #tpu.memory_space<vmem>>, %arg8: memref<128x128xf32, #tpu.memory_space<vmem>>, %arg9: memref<1x128xf32, #tpu.memory_space<vmem>>, %arg10: memref<128x128xf32, #tpu.memory_space<vmem>>, %arg11: memref<128x128xf32, #tpu.memory_space<vmem>>, %arg12: memref<8x128xf32, #tpu.memory_space<vmem>>, %arg13: memref<8x128xf32, #tpu.memory_space<vmem>>, %arg14: memref<8x128xf32, #tpu.memory_space<vmem>>) attributes {dimension_semantics = [#tpu.dimension_semantics<parallel>, #tpu.dimension_semantics<parallel>], iteration_bounds = array<i64: 1, 1>, scalar_prefetch = 0 : i64, scratch_operands = 0 : i64, tpu.core_type = #tpu.core_type<tc>, window_params = [{transform_indices = @transform_0, window_bounds = array<i64: 8, 128>}, {transform_indices = @transform_1, window_bounds = array<i64: 8, 128>}, {pipeline_mode = #tpu.pipeline_mode<synchronous>, transform_indices = @transform_2, window_bounds = array<i64: 128, 256>}, {pipeline_mode = #tpu.pipeline_mode<synchronous>, transform_indices = @transform_3, window_bounds = array<i64: 1, 256>}, {transform_indices = @transform_4, window_bounds = array<i64: 128, 128>}, {transform_indices = @transform_5, window_bounds = array<i64: 1, 128>}, {transform_indices = @transform_6, window_bounds = array<i64: 128, 128>}, {transform_indices = @transform_7, window_bounds = array<i64: 1, 128>}, {pipeline_mode = #tpu.pipeline_mode<synchronous>, transform_indices = @transform_8, window_bounds = array<i64: 128, 128>}, {pipeline_mode = #tpu.pipeline_mode<synchronous>, transform_indices = @transform_9, window_bounds = array<i64: 128, 128>}, {transform_indices = @transform_10, window_bounds = array<i64: 8, 128>}, {transform_indices = @transform_11, window_bounds = array<i64: 8, 128>}, {transform_indices = @transform_12, window_bounds = array<i64: 8, 128>}]} {
    %c0 = arith.constant 0 : index
    %c0_0 = arith.constant 0 : index
    %0 = vector.load %arg2[%c0, %c0_0] : memref<8x128xf32, #tpu.memory_space<vmem>>, vector<8x128xf32>
    %c0_1 = arith.constant 0 : index
    %c0_2 = arith.constant 0 : index
    %1 = vector.load %arg4[%c0_1, %c0_2] : memref<128x256xf32, #tpu.memory_space<vmem>>, vector<128x256xf32>
    %cst = arith.constant dense<0.000000e+00> : vector<8x256xf32>
    %2 = tpu.matmul %0, %1, %cst {dimension_numbers = #tpu.dot_dimension_numbers<[1], [0], [0], [1], [0, 0, 1, 1], [], []>} : vector<8x128xf32>, vector<128x256xf32>, vector<8x256xf32> -> vector<8x256xf32>
    %c0_3 = arith.constant 0 : index
    %c0_4 = arith.constant 0 : index
    %3 = vector.load %arg5[%c0_3, %c0_4] : memref<1x256xf32, #tpu.memory_space<vmem>>, vector<1x256xf32>
    %4 = vector.broadcast %3 : vector<1x256xf32> to vector<8x256xf32>
    %5 = arith.addf %2, %4 : vector<8x256xf32>
    %cst_5 = arith.constant 0.000000e+00 : f32
    %6 = vector.broadcast %cst_5 : f32 to vector<8x256xf32>
    %7 = arith.maximumf %5, %6 : vector<8x256xf32>
    %8 = vector.extract_strided_slice %7 {offsets = [0, 0], sizes = [8, 128], strides = [1, 1]} : vector<8x256xf32> to vector<8x128xf32>
    %9 = vector.extract_strided_slice %7 {offsets = [0, 128], sizes = [8, 128], strides = [1, 1]} : vector<8x256xf32> to vector<8x128xf32>
    %c0_6 = arith.constant 0 : index
    %c0_7 = arith.constant 0 : index
    %10 = vector.load %arg6[%c0_6, %c0_7] : memref<128x128xf32, #tpu.memory_space<vmem>>, vector<128x128xf32>
    %cst_8 = arith.constant dense<0.000000e+00> : vector<8x128xf32>
    %11 = tpu.matmul %8, %10, %cst_8 {dimension_numbers = #tpu.dot_dimension_numbers<[1], [0], [0], [1], [0, 0, 1, 1], [], []>} : vector<8x128xf32>, vector<128x128xf32>, vector<8x128xf32> -> vector<8x128xf32>
    %c0_9 = arith.constant 0 : index
    %c0_10 = arith.constant 0 : index
    %12 = vector.load %arg7[%c0_9, %c0_10] : memref<1x128xf32, #tpu.memory_space<vmem>>, vector<1x128xf32>
    %13 = vector.broadcast %12 : vector<1x128xf32> to vector<8x128xf32>
    %14 = arith.addf %11, %13 : vector<8x128xf32>
    %c0_11 = arith.constant 0 : index
    %c0_12 = arith.constant 0 : index
    %15 = vector.load %arg12[%c0_11, %c0_12] : memref<8x128xf32, #tpu.memory_space<vmem>>, vector<8x128xf32>
    tpu.vector_store %arg12[%c0_11, %c0_12], %14 {strides = array<i32>} : memref<8x128xf32, #tpu.memory_space<vmem>>, vector<8x128xf32>,
    %c0_13 = arith.constant 0 : index
    %c0_14 = arith.constant 0 : index
    %16 = vector.load %arg8[%c0_13, %c0_14] : memref<128x128xf32, #tpu.memory_space<vmem>>, vector<128x128xf32>
    %cst_15 = arith.constant dense<0.000000e+00> : vector<8x128xf32>
    %17 = tpu.matmul %9, %16, %cst_15 {dimension_numbers = #tpu.dot_dimension_numbers<[1], [0], [0], [1], [0, 0, 1, 1], [], []>} : vector<8x128xf32>, vector<128x128xf32>, vector<8x128xf32> -> vector<8x128xf32>
    %c0_16 = arith.constant 0 : index
    %c0_17 = arith.constant 0 : index
    %18 = vector.load %arg9[%c0_16, %c0_17] : memref<1x128xf32, #tpu.memory_space<vmem>>, vector<1x128xf32>
    %19 = vector.broadcast %18 : vector<1x128xf32> to vector<8x128xf32>
    %20 = arith.addf %17, %19 : vector<8x128xf32>
    %21 = math.exp %20 : vector<8x128xf32>
    %c0_18 = arith.constant 0 : index
    %c0_19 = arith.constant 0 : index
    %22 = vector.load %arg13[%c0_18, %c0_19] : memref<8x128xf32, #tpu.memory_space<vmem>>, vector<8x128xf32>
    tpu.vector_store %arg13[%c0_18, %c0_19], %21 {strides = array<i32>} : memref<8x128xf32, #tpu.memory_space<vmem>>, vector<8x128xf32>,
    %c0_20 = arith.constant 0 : index
    %c0_21 = arith.constant 0 : index
    %23 = vector.load %arg11[%c0_20, %c0_21] : memref<128x128xf32, #tpu.memory_space<vmem>>, vector<128x1xf32>
    %c0_22 = arith.constant 0 : index
    %c1 = arith.constant 1 : index
    %24 = vector.load %arg11[%c0_22, %c1] : memref<128x128xf32, #tpu.memory_space<vmem>>, vector<128x1xf32>
    %c0_23 = arith.constant 0 : index
    %c2 = arith.constant 2 : index
    %25 = vector.load %arg11[%c0_23, %c2] : memref<128x128xf32, #tpu.memory_space<vmem>>, vector<128x1xf32>
    %c0_24 = arith.constant 0 : index
    %c3 = arith.constant 3 : index
    %26 = vector.load %arg11[%c0_24, %c3] : memref<128x128xf32, #tpu.memory_space<vmem>>, vector<128x1xf32>
    %c0_25 = arith.constant 0 : index
    %c4 = arith.constant 4 : index
    %27 = vector.load %arg11[%c0_25, %c4] : memref<128x128xf32, #tpu.memory_space<vmem>>, vector<1x1xf32>
    %c0_26 = arith.constant 0 : index
    %c0_27 = arith.constant 0 : index
    %28 = vector.load %arg10[%c0_26, %c0_27] : memref<128x128xf32, #tpu.memory_space<vmem>>, vector<128x128xf32>
    %c0_28 = arith.constant 0 : index
    %c0_29 = arith.constant 0 : index
    %29 = vector.load %arg3[%c0_28, %c0_29] : memref<8x128xf32, #tpu.memory_space<vmem>>, vector<1x128xf32>
    %30 = vector.broadcast %23 : vector<128x1xf32> to vector<128x128xf32>
    %31 = vector.broadcast %29 : vector<1x128xf32> to vector<128x128xf32>
    %32 = arith.mulf %30, %31 : vector<128x128xf32>
    %33 = vector.broadcast %24 : vector<128x1xf32> to vector<128x128xf32>
    %34 = arith.addf %32, %33 : vector<128x128xf32>
    %cst_30 = arith.constant 0.000000e+00 : f32
    %35 = vector.broadcast %cst_30 : f32 to vector<128x128xf32>
    %36 = arith.maximumf %34, %35 : vector<128x128xf32>
    %cst_31 = arith.constant dense<0.000000e+00> : vector<128x128xf32>
    %37 = tpu.matmul %28, %36, %cst_31 {dimension_numbers = #tpu.dot_dimension_numbers<[1], [0], [0], [1], [0, 0, 1, 1], [], []>} : vector<128x128xf32>, vector<128x128xf32>, vector<128x128xf32> -> vector<128x128xf32>
    %38 = vector.broadcast %25 : vector<128x1xf32> to vector<128x128xf32>
    %39 = arith.addf %37, %38 : vector<128x128xf32>
    %cst_32 = arith.constant 0.000000e+00 : f32
    %40 = vector.broadcast %cst_32 : f32 to vector<128x128xf32>
    %41 = arith.maximumf %39, %40 : vector<128x128xf32>
    %42 = vector.broadcast %26 : vector<128x1xf32> to vector<128x128xf32>
    %43 = arith.mulf %41, %42 : vector<128x128xf32>
    %cst_33 = arith.constant dense<0.000000e+00> : vector<128xf32>
    %44 = vector.multi_reduction <add>, %43, %cst_33 [0] : vector<128x128xf32> to vector<128xf32>
    %45 = vector.shape_cast %44 : vector<128xf32> to vector<1x128xf32>
    %46 = vector.broadcast %27 : vector<1x1xf32> to vector<1x128xf32>
    %47 = arith.addf %45, %46 : vector<1x128xf32>
    %c0_34 = arith.constant 0 : index
    %c0_35 = arith.constant 0 : index
    %48 = vector.load %arg14[%c0_34, %c0_35] : memref<8x128xf32, #tpu.memory_space<vmem>>, vector<1x128xf32>
    tpu.vector_store %arg14[%c0_34, %c0_35], %47 {strides = array<i32>} : memref<8x128xf32, #tpu.memory_space<vmem>>, vector<1x128xf32>,
    %c1_36 = arith.constant 1 : index
    %c0_37 = arith.constant 0 : index
    %49 = vector.load %arg3[%c1_36, %c0_37] : memref<8x128xf32, #tpu.memory_space<vmem>>, vector<1x128xf32>
    %50 = vector.broadcast %23 : vector<128x1xf32> to vector<128x128xf32>
    %51 = vector.broadcast %49 : vector<1x128xf32> to vector<128x128xf32>
    %52 = arith.mulf %50, %51 : vector<128x128xf32>
    %53 = vector.broadcast %24 : vector<128x1xf32> to vector<128x128xf32>
    %54 = arith.addf %52, %53 : vector<128x128xf32>
    %cst_38 = arith.constant 0.000000e+00 : f32
    %55 = vector.broadcast %cst_38 : f32 to vector<128x128xf32>
    %56 = arith.maximumf %54, %55 : vector<128x128xf32>
    %cst_39 = arith.constant dense<0.000000e+00> : vector<128x128xf32>
    %57 = tpu.matmul %28, %56, %cst_39 {dimension_numbers = #tpu.dot_dimension_numbers<[1], [0], [0], [1], [0, 0, 1, 1], [], []>} : vector<128x128xf32>, vector<128x128xf32>, vector<128x128xf32> -> vector<128x128xf32>
    %58 = vector.broadcast %25 : vector<128x1xf32> to vector<128x128xf32>
    %59 = arith.addf %57, %58 : vector<128x128xf32>
    %cst_40 = arith.constant 0.000000e+00 : f32
    %60 = vector.broadcast %cst_40 : f32 to vector<128x128xf32>
    %61 = arith.maximumf %59, %60 : vector<128x128xf32>
    %62 = vector.broadcast %26 : vector<128x1xf32> to vector<128x128xf32>
    %63 = arith.mulf %61, %62 : vector<128x128xf32>
    %cst_41 = arith.constant dense<0.000000e+00> : vector<128xf32>
    %64 = vector.multi_reduction <add>, %63, %cst_41 [0] : vector<128x128xf32> to vector<128xf32>
    %65 = vector.shape_cast %64 : vector<128xf32> to vector<1x128xf32>
    %66 = vector.broadcast %27 : vector<1x1xf32> to vector<1x128xf32>
    %67 = arith.addf %65, %66 : vector<1x128xf32>
    %c1_42 = arith.constant 1 : index
    %c0_43 = arith.constant 0 : index
    %68 = vector.load %arg14[%c1_42, %c0_43] : memref<8x128xf32, #tpu.memory_space<vmem>>, vector<1x128xf32>
    tpu.vector_store %arg14[%c1_42, %c0_43], %67 {strides = array<i32>} : memref<8x128xf32, #tpu.memory_space<vmem>>, vector<1x128xf32>,
    %c2_44 = arith.constant 2 : index
    %c0_45 = arith.constant 0 : index
    %69 = vector.load %arg3[%c2_44, %c0_45] : memref<8x128xf32, #tpu.memory_space<vmem>>, vector<1x128xf32>
    %70 = vector.broadcast %23 : vector<128x1xf32> to vector<128x128xf32>
    %71 = vector.broadcast %69 : vector<1x128xf32> to vector<128x128xf32>
    %72 = arith.mulf %70, %71 : vector<128x128xf32>
    %73 = vector.broadcast %24 : vector<128x1xf32> to vector<128x128xf32>
    %74 = arith.addf %72, %73 : vector<128x128xf32>
    %cst_46 = arith.constant 0.000000e+00 : f32
    %75 = vector.broadcast %cst_46 : f32 to vector<128x128xf32>
    %76 = arith.maximumf %74, %75 : vector<128x128xf32>
    %cst_47 = arith.constant dense<0.000000e+00> : vector<128x128xf32>
    %77 = tpu.matmul %28, %76, %cst_47 {dimension_numbers = #tpu.dot_dimension_numbers<[1], [0], [0], [1], [0, 0, 1, 1], [], []>} : vector<128x128xf32>, vector<128x128xf32>, vector<128x128xf32> -> vector<128x128xf32>
    %78 = vector.broadcast %25 : vector<128x1xf32> to vector<128x128xf32>
    %79 = arith.addf %77, %78 : vector<128x128xf32>
    %cst_48 = arith.constant 0.000000e+00 : f32
    %80 = vector.broadcast %cst_48 : f32 to vector<128x128xf32>
    %81 = arith.maximumf %79, %80 : vector<128x128xf32>
    %82 = vector.broadcast %26 : vector<128x1xf32> to vector<128x128xf32>
    %83 = arith.mulf %81, %82 : vector<128x128xf32>
    %cst_49 = arith.constant dense<0.000000e+00> : vector<128xf32>
    %84 = vector.multi_reduction <add>, %83, %cst_49 [0] : vector<128x128xf32> to vector<128xf32>
    %85 = vector.shape_cast %84 : vector<128xf32> to vector<1x128xf32>
    %86 = vector.broadcast %27 : vector<1x1xf32> to vector<1x128xf32>
    %87 = arith.addf %85, %86 : vector<1x128xf32>
    %c2_50 = arith.constant 2 : index
    %c0_51 = arith.constant 0 : index
    %88 = vector.load %arg14[%c2_50, %c0_51] : memref<8x128xf32, #tpu.memory_space<vmem>>, vector<1x128xf32>
    tpu.vector_store %arg14[%c2_50, %c0_51], %87 {strides = array<i32>} : memref<8x128xf32, #tpu.memory_space<vmem>>, vector<1x128xf32>,
    %c3_52 = arith.constant 3 : index
    %c0_53 = arith.constant 0 : index
    %89 = vector.load %arg3[%c3_52, %c0_53] : memref<8x128xf32, #tpu.memory_space<vmem>>, vector<1x128xf32>
    %90 = vector.broadcast %23 : vector<128x1xf32> to vector<128x128xf32>
    %91 = vector.broadcast %89 : vector<1x128xf32> to vector<128x128xf32>
    %92 = arith.mulf %90, %91 : vector<128x128xf32>
    %93 = vector.broadcast %24 : vector<128x1xf32> to vector<128x128xf32>
    %94 = arith.addf %92, %93 : vector<128x128xf32>
    %cst_54 = arith.constant 0.000000e+00 : f32
    %95 = vector.broadcast %cst_54 : f32 to vector<128x128xf32>
    %96 = arith.maximumf %94, %95 : vector<128x128xf32>
    %cst_55 = arith.constant dense<0.000000e+00> : vector<128x128xf32>
    %97 = tpu.matmul %28, %96, %cst_55 {dimension_numbers = #tpu.dot_dimension_numbers<[1], [0], [0], [1], [0, 0, 1, 1], [], []>} : vector<128x128xf32>, vector<128x128xf32>, vector<128x128xf32> -> vector<128x128xf32>
    %98 = vector.broadcast %25 : vector<128x1xf32> to vector<128x128xf32>
    %99 = arith.addf %97, %98 : vector<128x128xf32>
    %cst_56 = arith.constant 0.000000e+00 : f32
    %100 = vector.broadcast %cst_56 : f32 to vector<128x128xf32>
    %101 = arith.maximumf %99, %100 : vector<128x128xf32>
    %102 = vector.broadcast %26 : vector<128x1xf32> to vector<128x128xf32>
    %103 = arith.mulf %101, %102 : vector<128x128xf32>
    %cst_57 = arith.constant dense<0.000000e+00> : vector<128xf32>
    %104 = vector.multi_reduction <add>, %103, %cst_57 [0] : vector<128x128xf32> to vector<128xf32>
    %105 = vector.shape_cast %104 : vector<128xf32> to vector<1x128xf32>
    %106 = vector.broadcast %27 : vector<1x1xf32> to vector<1x128xf32>
    %107 = arith.addf %105, %106 : vector<1x128xf32>
    %c3_58 = arith.constant 3 : index
    %c0_59 = arith.constant 0 : index
    %108 = vector.load %arg14[%c3_58, %c0_59] : memref<8x128xf32, #tpu.memory_space<vmem>>, vector<1x128xf32>
    tpu.vector_store %arg14[%c3_58, %c0_59], %107 {strides = array<i32>} : memref<8x128xf32, #tpu.memory_space<vmem>>, vector<1x128xf32>,
    %c4_60 = arith.constant 4 : index
    %c0_61 = arith.constant 0 : index
    %109 = vector.load %arg3[%c4_60, %c0_61] : memref<8x128xf32, #tpu.memory_space<vmem>>, vector<1x128xf32>
    %110 = vector.broadcast %23 : vector<128x1xf32> to vector<128x128xf32>
    %111 = vector.broadcast %109 : vector<1x128xf32> to vector<128x128xf32>
    %112 = arith.mulf %110, %111 : vector<128x128xf32>
    %113 = vector.broadcast %24 : vector<128x1xf32> to vector<128x128xf32>
    %114 = arith.addf %112, %113 : vector<128x128xf32>
    %cst_62 = arith.constant 0.000000e+00 : f32
    %115 = vector.broadcast %cst_62 : f32 to vector<128x128xf32>
    %116 = arith.maximumf %114, %115 : vector<128x128xf32>
    %cst_63 = arith.constant dense<0.000000e+00> : vector<128x128xf32>
    %117 = tpu.matmul %28, %116, %cst_63 {dimension_numbers = #tpu.dot_dimension_numbers<[1], [0], [0], [1], [0, 0, 1, 1], [], []>} : vector<128x128xf32>, vector<128x128xf32>, vector<128x128xf32> -> vector<128x128xf32>
    %118 = vector.broadcast %25 : vector<128x1xf32> to vector<128x128xf32>
    %119 = arith.addf %117, %118 : vector<128x128xf32>
    %cst_64 = arith.constant 0.000000e+00 : f32
    %120 = vector.broadcast %cst_64 : f32 to vector<128x128xf32>
    %121 = arith.maximumf %119, %120 : vector<128x128xf32>
    %122 = vector.broadcast %26 : vector<128x1xf32> to vector<128x128xf32>
    %123 = arith.mulf %121, %122 : vector<128x128xf32>
    %cst_65 = arith.constant dense<0.000000e+00> : vector<128xf32>
    %124 = vector.multi_reduction <add>, %123, %cst_65 [0] : vector<128x128xf32> to vector<128xf32>
    %125 = vector.shape_cast %124 : vector<128xf32> to vector<1x128xf32>
    %126 = vector.broadcast %27 : vector<1x1xf32> to vector<1x128xf32>
    %127 = arith.addf %125, %126 : vector<1x128xf32>
    %c4_66 = arith.constant 4 : index
    %c0_67 = arith.constant 0 : index
    %128 = vector.load %arg14[%c4_66, %c0_67] : memref<8x128xf32, #tpu.memory_space<vmem>>, vector<1x128xf32>
    tpu.vector_store %arg14[%c4_66, %c0_67], %127 {strides = array<i32>} : memref<8x128xf32, #tpu.memory_space<vmem>>, vector<1x128xf32>,
    %c5 = arith.constant 5 : index
    %c0_68 = arith.constant 0 : index
    %129 = vector.load %arg3[%c5, %c0_68] : memref<8x128xf32, #tpu.memory_space<vmem>>, vector<1x128xf32>
    %130 = vector.broadcast %23 : vector<128x1xf32> to vector<128x128xf32>
    %131 = vector.broadcast %129 : vector<1x128xf32> to vector<128x128xf32>
    %132 = arith.mulf %130, %131 : vector<128x128xf32>
    %133 = vector.broadcast %24 : vector<128x1xf32> to vector<128x128xf32>
    %134 = arith.addf %132, %133 : vector<128x128xf32>
    %cst_69 = arith.constant 0.000000e+00 : f32
    %135 = vector.broadcast %cst_69 : f32 to vector<128x128xf32>
    %136 = arith.maximumf %134, %135 : vector<128x128xf32>
    %cst_70 = arith.constant dense<0.000000e+00> : vector<128x128xf32>
    %137 = tpu.matmul %28, %136, %cst_70 {dimension_numbers = #tpu.dot_dimension_numbers<[1], [0], [0], [1], [0, 0, 1, 1], [], []>} : vector<128x128xf32>, vector<128x128xf32>, vector<128x128xf32> -> vector<128x128xf32>
    %138 = vector.broadcast %25 : vector<128x1xf32> to vector<128x128xf32>
    %139 = arith.addf %137, %138 : vector<128x128xf32>
    %cst_71 = arith.constant 0.000000e+00 : f32
    %140 = vector.broadcast %cst_71 : f32 to vector<128x128xf32>
    %141 = arith.maximumf %139, %140 : vector<128x128xf32>
    %142 = vector.broadcast %26 : vector<128x1xf32> to vector<128x128xf32>
    %143 = arith.mulf %141, %142 : vector<128x128xf32>
    %cst_72 = arith.constant dense<0.000000e+00> : vector<128xf32>
    %144 = vector.multi_reduction <add>, %143, %cst_72 [0] : vector<128x128xf32> to vector<128xf32>
    %145 = vector.shape_cast %144 : vector<128xf32> to vector<1x128xf32>
    %146 = vector.broadcast %27 : vector<1x1xf32> to vector<1x128xf32>
    %147 = arith.addf %145, %146 : vector<1x128xf32>
    %c5_73 = arith.constant 5 : index
    %c0_74 = arith.constant 0 : index
    %148 = vector.load %arg14[%c5_73, %c0_74] : memref<8x128xf32, #tpu.memory_space<vmem>>, vector<1x128xf32>
    tpu.vector_store %arg14[%c5_73, %c0_74], %147 {strides = array<i32>} : memref<8x128xf32, #tpu.memory_space<vmem>>, vector<1x128xf32>,
    %c6 = arith.constant 6 : index
    %c0_75 = arith.constant 0 : index
    %149 = vector.load %arg3[%c6, %c0_75] : memref<8x128xf32, #tpu.memory_space<vmem>>, vector<1x128xf32>
    %150 = vector.broadcast %23 : vector<128x1xf32> to vector<128x128xf32>
    %151 = vector.broadcast %149 : vector<1x128xf32> to vector<128x128xf32>
    %152 = arith.mulf %150, %151 : vector<128x128xf32>
    %153 = vector.broadcast %24 : vector<128x1xf32> to vector<128x128xf32>
    %154 = arith.addf %152, %153 : vector<128x128xf32>
    %cst_76 = arith.constant 0.000000e+00 : f32
    %155 = vector.broadcast %cst_76 : f32 to vector<128x128xf32>
    %156 = arith.maximumf %154, %155 : vector<128x128xf32>
    %cst_77 = arith.constant dense<0.000000e+00> : vector<128x128xf32>
    %157 = tpu.matmul %28, %156, %cst_77 {dimension_numbers = #tpu.dot_dimension_numbers<[1], [0], [0], [1], [0, 0, 1, 1], [], []>} : vector<128x128xf32>, vector<128x128xf32>, vector<128x128xf32> -> vector<128x128xf32>
    %158 = vector.broadcast %25 : vector<128x1xf32> to vector<128x128xf32>
    %159 = arith.addf %157, %158 : vector<128x128xf32>
    %cst_78 = arith.constant 0.000000e+00 : f32
    %160 = vector.broadcast %cst_78 : f32 to vector<128x128xf32>
    %161 = arith.maximumf %159, %160 : vector<128x128xf32>
    %162 = vector.broadcast %26 : vector<128x1xf32> to vector<128x128xf32>
    %163 = arith.mulf %161, %162 : vector<128x128xf32>
    %cst_79 = arith.constant dense<0.000000e+00> : vector<128xf32>
    %164 = vector.multi_reduction <add>, %163, %cst_79 [0] : vector<128x128xf32> to vector<128xf32>
    %165 = vector.shape_cast %164 : vector<128xf32> to vector<1x128xf32>
    %166 = vector.broadcast %27 : vector<1x1xf32> to vector<1x128xf32>
    %167 = arith.addf %165, %166 : vector<1x128xf32>
    %c6_80 = arith.constant 6 : index
    %c0_81 = arith.constant 0 : index
    %168 = vector.load %arg14[%c6_80, %c0_81] : memref<8x128xf32, #tpu.memory_space<vmem>>, vector<1x128xf32>
    tpu.vector_store %arg14[%c6_80, %c0_81], %167 {strides = array<i32>} : memref<8x128xf32, #tpu.memory_space<vmem>>, vector<1x128xf32>,
    %c7 = arith.constant 7 : index
    %c0_82 = arith.constant 0 : index
    %169 = vector.load %arg3[%c7, %c0_82] : memref<8x128xf32, #tpu.memory_space<vmem>>, vector<1x128xf32>
    %170 = vector.broadcast %23 : vector<128x1xf32> to vector<128x128xf32>
    %171 = vector.broadcast %169 : vector<1x128xf32> to vector<128x128xf32>
    %172 = arith.mulf %170, %171 : vector<128x128xf32>
    %173 = vector.broadcast %24 : vector<128x1xf32> to vector<128x128xf32>
    %174 = arith.addf %172, %173 : vector<128x128xf32>
    %cst_83 = arith.constant 0.000000e+00 : f32
    %175 = vector.broadcast %cst_83 : f32 to vector<128x128xf32>
    %176 = arith.maximumf %174, %175 : vector<128x128xf32>
    %cst_84 = arith.constant dense<0.000000e+00> : vector<128x128xf32>
    %177 = tpu.matmul %28, %176, %cst_84 {dimension_numbers = #tpu.dot_dimension_numbers<[1], [0], [0], [1], [0, 0, 1, 1], [], []>} : vector<128x128xf32>, vector<128x128xf32>, vector<128x128xf32> -> vector<128x128xf32>
    %178 = vector.broadcast %25 : vector<128x1xf32> to vector<128x128xf32>
    %179 = arith.addf %177, %178 : vector<128x128xf32>
    %cst_85 = arith.constant 0.000000e+00 : f32
    %180 = vector.broadcast %cst_85 : f32 to vector<128x128xf32>
    %181 = arith.maximumf %179, %180 : vector<128x128xf32>
    %182 = vector.broadcast %26 : vector<128x1xf32> to vector<128x128xf32>
    %183 = arith.mulf %181, %182 : vector<128x128xf32>
    %cst_86 = arith.constant dense<0.000000e+00> : vector<128xf32>
    %184 = vector.multi_reduction <add>, %183, %cst_86 [0] : vector<128x128xf32> to vector<128xf32>
    %185 = vector.shape_cast %184 : vector<128xf32> to vector<1x128xf32>
    %186 = vector.broadcast %27 : vector<1x1xf32> to vector<1x128xf32>
    %187 = arith.addf %185, %186 : vector<1x128xf32>
    %c7_87 = arith.constant 7 : index
    %c0_88 = arith.constant 0 : index
    %188 = vector.load %arg14[%c7_87, %c0_88] : memref<8x128xf32, #tpu.memory_space<vmem>>, vector<1x128xf32>
    tpu.vector_store %arg14[%c7_87, %c0_88], %187 {strides = array<i32>} : memref<8x128xf32, #tpu.memory_space<vmem>>, vector<1x128xf32>,
    return
  }
  func.func @transform_0(%arg0: i32, %arg1: i32) -> (i32, i32) {
    %c0_i32 = arith.constant 0 : i32
    %c0_i32_0 = arith.constant 0 : i32
    return %arg0, %c0_i32 : i32, i32
  }
  func.func @transform_1(%arg0: i32, %arg1: i32) -> (i32, i32) {
    %c0_i32 = arith.constant 0 : i32
    return %arg0, %arg1 : i32, i32
  }
  func.func @transform_2(%arg0: i32, %arg1: i32) -> (i32, i32) {
    %c0_i32 = arith.constant 0 : i32
    %c0_i32_0 = arith.constant 0 : i32
    %c0_i32_1 = arith.constant 0 : i32
    return %c0_i32, %c0_i32_0 : i32, i32
  }
  func.func @transform_3(%arg0: i32, %arg1: i32) -> (i32, i32) {
    %c0_i32 = arith.constant 0 : i32
    %c0_i32_0 = arith.constant 0 : i32
    %c0_i32_1 = arith.constant 0 : i32
    return %c0_i32, %c0_i32_0 : i32, i32
  }
  func.func @transform_4(%arg0: i32, %arg1: i32) -> (i32, i32) {
    %c0_i32 = arith.constant 0 : i32
    %c0_i32_0 = arith.constant 0 : i32
    return %c0_i32, %arg1 : i32, i32
  }
  func.func @transform_5(%arg0: i32, %arg1: i32) -> (i32, i32) {
    %c0_i32 = arith.constant 0 : i32
    %c0_i32_0 = arith.constant 0 : i32
    return %c0_i32, %arg1 : i32, i32
  }
  func.func @transform_6(%arg0: i32, %arg1: i32) -> (i32, i32) {
    %c0_i32 = arith.constant 0 : i32
    %c0_i32_0 = arith.constant 0 : i32
    return %c0_i32, %arg1 : i32, i32
  }
  func.func @transform_7(%arg0: i32, %arg1: i32) -> (i32, i32) {
    %c0_i32 = arith.constant 0 : i32
    %c0_i32_0 = arith.constant 0 : i32
    return %c0_i32, %arg1 : i32, i32
  }
  func.func @transform_8(%arg0: i32, %arg1: i32) -> (i32, i32) {
    %c0_i32 = arith.constant 0 : i32
    %c0_i32_0 = arith.constant 0 : i32
    %c0_i32_1 = arith.constant 0 : i32
    return %c0_i32, %c0_i32_0 : i32, i32
  }
  func.func @transform_9(%arg0: i32, %arg1: i32) -> (i32, i32) {
    %c0_i32 = arith.constant 0 : i32
    %c0_i32_0 = arith.constant 0 : i32
    %c0_i32_1 = arith.constant 0 : i32
    return %c0_i32, %c0_i32_0 : i32, i32
  }
  func.func @transform_10(%arg0: i32, %arg1: i32) -> (i32, i32) {
    %c0_i32 = arith.constant 0 : i32
    return %arg0, %arg1 : i32, i32
  }
  func.func @transform_11(%arg0: i32, %arg1: i32) -> (i32, i32) {
    %c0_i32 = arith.constant 0 : i32
    return %arg0, %arg1 : i32, i32
  }
  func.func @transform_12(%arg0: i32, %arg1: i32) -> (i32, i32) {
    %c0_i32 = arith.constant 0 : i32
    return %arg0, %arg1 : i32, i32
  }
}

</mosaic_0001>

<bundles_post_ra>
// kernel: tpu_custom_call.1
= control target key start
LH: loop header
LB: loop body
LE: loop exit
PB: predicated region body
PF: predicated region fallthrough
CT: control target
= control target key end

     0   :  { %18 = vsyncpa [#allocation3], 0  ;;  %s5756_s0 = inlined_call_operand.hbm [shape: f32[8,128], index: 0, kind: input, shape index: {}]   ;;  %s5757_s1 = inlined_call_operand.hbm [shape: f32[8,128], index: 1, kind: input, shape index: {}]   ;;  %s5758_s2 = inlined_call_operand.hbm [shape: f32[128,256], index: 2, kind: input, shape index: {}]   ;;  %s5759_s3 = inlined_call_operand.vmem [shape: f32[1,256], index: 3, kind: input, shape index: {}]   ;;  %s5760_s4 = inlined_call_operand.hbm [shape: f32[128,128], index: 4, kind: input, shape index: {}]   ;;  %s5761_s5 = inlined_call_operand.vmem [shape: f32[1,128], index: 5, kind: input, shape index: {}]   ;;  %s5762_s6 = inlined_call_operand.hbm [shape: f32[128,128], index: 6, kind: input, shape index: {}]   ;;  %s5763_s7 = inlined_call_operand.vmem [shape: f32[1,128], index: 7, kind: input, shape index: {}]   ;;  %s5764_s8 = inlined_call_operand.hbm [shape: f32[128,128], index: 8, kind: input, shape index: {}]   ;;  %s5765_s9 = inlined_call_operand.hbm [shape: f32[128,128], index: 9, kind: input, shape index: {}]   ;;  %s5766_s10 = inlined_call_operand.hbm [shape: f32[8,128], index: 10, kind: output, shape index: {0}]   ;;  %s5767_s11 = inlined_call_operand.hbm [shape: f32[8,128], index: 11, kind: output, shape index: {1}]   ;;  %s5768_s12 = inlined_call_operand.hbm [shape: f32[8,128], index: 12, kind: output, shape index: {2}]  }
   0x1   :  { %19 = vsyncpa [#allocation6], 0 }
   0x2   :  { %20 = vsyncpa [#allocation9], 0 }
   0x3   :  { %21 = vsyncpa [#allocation12], 0 }
   0x4   :  { %22 = vsyncpa [#allocation4], 0 }
   0x5   :  { %23 = vsyncpa [#allocation16], 0  ;;  %s4278_s21 = smov [#allocation5]   ;;  %s4279_s23 = smov [#allocation8]  }
   0x6   :  { %s40_s22 = sshll.u32 %s4278_s21, 4  ;;  %s63_s24 = sshll.u32 %s4279_s23, 4  ;;  %s41_s22 = int_to_ptr.vmem [resolvable:$true] %s40_s22  ;;  %s4365_s24 = int_to_ptr.vmem [resolvable:$true] %s63_s24 }
   0x7   :  { %s4046_s27 = scalar_lea.hbm %s5757_s1, 128 }
   0x8   :  { %p4047_p0 = scmp.ne.s32.totalorder %s5757_s1, %s4046_s27  ;;  %p4050_p1 = scmp.lt.u32.totalorder %s4046_s27, %s5757_s1 }
   0xa   :  { %p4052_p2 = pnand %p4050_p1, %p4047_p0 }
   0xc   :  { %4055 = shalt.err (!%p4052_p2)
}
   0xd   :  { %s4056_s14 = scalar_lea.vmem %s41_s22, 128  ;;  %p4061_p4 = scmp.lt.s32.totalorder %s41_s22, %s41_s22 }
   0xe   :  { %p4057_p3 = scmp.ne.s32.totalorder %s41_s22, %s4056_s14  ;;  %p4062_p5 = scmp.lt.s32.totalorder %s4056_s14, %s4056_s14 }
  0x10   :  { %p4063_p6 = por %p4062_p5, %p4061_p4 }
  0x12   :  { %p4064_p7 = pnand %p4063_p6, %p4057_p3 }
  0x14   :  { %4067 = shalt.err (!%p4064_p7)
}
  0x15   :  { %43 = dma.hbm_to_vmem [thread:$0]  %s5757_s1, 128, %s41_s22, [#allocation6]  }
  0x16   :  { %s4068_s19 = scalar_lea.hbm %s5760_s4, 2048 }
  0x17   :  { %p4069_p8 = scmp.ne.s32.totalorder %s5760_s4, %s4068_s19  ;;  %p4072_p9 = scmp.lt.u32.totalorder %s4068_s19, %s5760_s4 }
  0x19   :  { %p4074_p10 = pnand %p4072_p9, %p4069_p8 }
  0x1b   :  { %4077 = shalt.err (!%p4074_p10)
}
  0x1c   :  { %s4078_s26 = scalar_lea.vmem %s4365_s24, 2048  ;;  %p4083_p12 = scmp.lt.s32.totalorder %s4365_s24, %s4365_s24 }
  0x1d   :  { %p4079_p11 = scmp.ne.s32.totalorder %s4365_s24, %s4078_s26  ;;  %p4084_p13 = scmp.lt.s32.totalorder %s4078_s26, %s4078_s26 }
  0x1f   :  { %p4085_p0 = por %p4084_p13, %p4083_p12 }
  0x21   :  { %p4086_p1 = pnand %p4085_p0, %p4079_p11 }
  0x23   :  { %4089 = shalt.err (!%p4086_p1)
}
  0x24   :  { %s4280_s1 = smov 128   ;;  %s4281_s22 = smov 8  }
  0x25   :  { %69 = dma.hbm_to_vmem [thread:$0]  %s5760_s4, 2048, %s4365_s24, [#allocation9], %s4280_s1, %s4280_s1, %s4281_s22  }
  0x26   :  { %s4282_s29 = smov [#allocation11]   ;;  %s4283_s13 = smov [#allocation2]  }
  0x27   :  { %s91_s30 = sshll.u32 %s4282_s29, 4  ;;  %s30_s14 = sshll.u32 %s4283_s13, 4  ;;  %s92_s30 = int_to_ptr.vmem [resolvable:$true] %s91_s30  ;;  %s31_s14 = int_to_ptr.vmem [resolvable:$true] %s30_s14 }
  0x28   :  { %s4090_s17 = scalar_lea.hbm %s5764_s8, 2048 }
  0x29   :  { %p4091_p2 = scmp.ne.s32.totalorder %s5764_s8, %s4090_s17  ;;  %p4094_p3 = scmp.lt.u32.totalorder %s4090_s17, %s5764_s8 }
  0x2b   :  { %p4096_p4 = pnand %p4094_p3, %p4091_p2 }
  0x2d   :  { %4099 = shalt.err (!%p4096_p4)
}
  0x2e   :  { %s4100_s4 = scalar_lea.vmem %s92_s30, 2048  ;;  %p4105_p6 = scmp.lt.s32.totalorder %s92_s30, %s92_s30 }
  0x2f   :  { %p4101_p5 = scmp.ne.s32.totalorder %s92_s30, %s4100_s4  ;;  %p4106_p7 = scmp.lt.s32.totalorder %s4100_s4, %s4100_s4 }
  0x31   :  { %p4107_p8 = por %p4106_p7, %p4105_p6 }
  0x33   :  { %p4108_p9 = pnand %p4107_p8, %p4101_p5 }
  0x35   :  { %4111 = shalt.err (!%p4108_p9)
}
  0x36   :  { %97 = dma.hbm_to_vmem [thread:$0]  %s5764_s8, 2048, %s92_s30, [#allocation12], %s4280_s1, %s4280_s1, %s4281_s22  }
  0x37   :  { %s4112_s27 = scalar_lea.hbm %s5756_s0, 128 }
  0x38   :  { %p4113_p10 = scmp.ne.s32.totalorder %s5756_s0, %s4112_s27  ;;  %p4116_p11 = scmp.lt.u32.totalorder %s4112_s27, %s5756_s0 }
  0x3a   :  { %p4118_p12 = pnand %p4116_p11, %p4113_p10 }
  0x3c   :  { %4121 = shalt.err (!%p4118_p12)
}
  0x3d   :  { %s4122_s16 = scalar_lea.vmem %s31_s14, 128  ;;  %p4127_p0 = scmp.lt.s32.totalorder %s31_s14, %s31_s14 }
  0x3e   :  { %p4123_p13 = scmp.ne.s32.totalorder %s31_s14, %s4122_s16  ;;  %p4128_p1 = scmp.lt.s32.totalorder %s4122_s16, %s4122_s16 }
  0x40   :  { %p4129_p2 = por %p4128_p1, %p4127_p0 }
  0x42   :  { %p4130_p3 = pnand %p4129_p2, %p4123_p13 }
  0x44   :  { %4133 = shalt.err (!%p4130_p3)
}
  0x45   :  { %33 = dma.hbm_to_vmem [thread:$0]  %s5756_s0, 128, %s31_s14, [#allocation3]  }
  0x46   :  { %s4284_s17 = smov [#allocation7]   ;;  %s4134_s21 = scalar_lea.hbm %s5758_s2, 4096 }
  0x47   :  { %s49_s18 = sshll.u32 %s4284_s17, 4  ;;  %p4135_p4 = scmp.ne.s32.totalorder %s5758_s2, %s4134_s21  ;;  %s50_s18 = int_to_ptr.vmem [resolvable:$true] %s49_s18 }
  0x48   :  { %p4138_p5 = scmp.lt.u32.totalorder %s4134_s21, %s5758_s2 }
  0x4a   :  { %p4140_p6 = pnand %p4138_p5, %p4135_p4 }
  0x4c   :  { %4143 = shalt.err (!%p4140_p6)
}
  0x4d   :  { %s4144_s26 = scalar_lea.vmem %s50_s18, 4096  ;;  %p4149_p8 = scmp.lt.s32.totalorder %s50_s18, %s50_s18 }
  0x4e   :  { %p4145_p7 = scmp.ne.s32.totalorder %s50_s18, %s4144_s26  ;;  %p4150_p9 = scmp.lt.s32.totalorder %s4144_s26, %s4144_s26 }
  0x50   :  { %p4151_p10 = por %p4150_p9, %p4149_p8 }
  0x52   :  { %p4152_p11 = pnand %p4151_p10, %p4145_p7 }
  0x54   :  { %4155 = shalt.err (!%p4152_p11)
}
  0x55   :  { %s4285_s0 = smov 256   ;;  %s4286_s14 = smov 16  }
  0x56   :  { %55 = dma.hbm_to_vmem [thread:$0]  %s5758_s2, 4096, %s50_s18, [#allocation6], %s4285_s0, %s4285_s0, %s4286_s14  }
  0x57   :  { %s4287_s29 = smov [#allocation10]   ;;  %s4288_s15 = smov [#allocation13]  }
  0x58   :  { %s77_s13 = sshll.u32 %s4287_s29, 4  ;;  %s103_s16 = sshll.u32 %s4288_s15, 4  ;;  %s78_s13 = int_to_ptr.vmem [resolvable:$true] %s77_s13  ;;  %s104_s16 = int_to_ptr.vmem [resolvable:$true] %s103_s16 }
  0x59   :  { %s4156_s17 = scalar_lea.hbm %s5762_s6, 2048 }
  0x5a   :  { %p4157_p12 = scmp.ne.s32.totalorder %s5762_s6, %s4156_s17  ;;  %p4160_p13 = scmp.lt.u32.totalorder %s4156_s17, %s5762_s6 }
  0x5c   :  { %p4162_p0 = pnand %p4160_p13, %p4157_p12 }
  0x5e   :  { %4165 = shalt.err (!%p4162_p0)
}
  0x5f   :  { %s4166_s2 = scalar_lea.vmem %s78_s13, 2048  ;;  %p4171_p2 = scmp.lt.s32.totalorder %s78_s13, %s78_s13 }
  0x60   :  { %p4167_p1 = scmp.ne.s32.totalorder %s78_s13, %s4166_s2  ;;  %p4172_p3 = scmp.lt.s32.totalorder %s4166_s2, %s4166_s2 }
  0x62   :  { %p4173_p4 = por %p4172_p3, %p4171_p2 }
  0x64   :  { %p4174_p5 = pnand %p4173_p4, %p4167_p1 }
  0x66   :  { %4177 = shalt.err (!%p4174_p5)
}
  0x67   :  { %83 = dma.hbm_to_vmem [thread:$0]  %s5762_s6, 2048, %s78_s13, [#allocation9], %s4280_s1, %s4280_s1, %s4281_s22  }
  0x68   :  { %s4178_s26 = scalar_lea.hbm %s5765_s9, 2048 }
  0x69   :  { %p4179_p6 = scmp.ne.s32.totalorder %s5765_s9, %s4178_s26  ;;  %p4182_p7 = scmp.lt.u32.totalorder %s4178_s26, %s5765_s9 }
  0x6b   :  { %p4184_p8 = pnand %p4182_p7, %p4179_p6 }
  0x6d   :  { %4187 = shalt.err (!%p4184_p8)
}
  0x6e   :  { %s4188_s29 = scalar_lea.vmem %s104_s16, 2048  ;;  %p4193_p10 = scmp.lt.s32.totalorder %s104_s16, %s104_s16 }
  0x6f   :  { %p4189_p9 = scmp.ne.s32.totalorder %s104_s16, %s4188_s29  ;;  %p4194_p11 = scmp.lt.s32.totalorder %s4188_s29, %s4188_s29 }
  0x71   :  { %p4195_p12 = por %p4194_p11, %p4193_p10 }
  0x73   :  { %p4196_p13 = pnand %p4195_p12, %p4189_p9 }
  0x75   :  { %4199 = shalt.err (!%p4196_p13)
}
  0x76   :  { %109 = dma.hbm_to_vmem [thread:$0]  %s5765_s9, 2048, %s104_s16, [#allocation12], %s4280_s1, %s4280_s1, %s4281_s22  }
  0x77   :  { %4266 = dma.done.wait [#allocation3], 128  }
  0x78   :  { %4267 = vsyncadd [#allocation3], 4294967168 }
  0x79   :  { %4268 = dma.done.wait [#allocation6], 4224  }
  0x7a   :  { %4269 = vsyncadd [#allocation6], 4294963072 }
  0x7b   :  { %4270 = dma.done.wait [#allocation9], 4096  }
  0x7c   :  { %4271 = vsyncadd [#allocation9], 4294963200 }
  0x7d   :  { %4272 = dma.done.wait [#allocation12], 4096  }
  0x7e   :  { %4273 = vsyncadd [#allocation12], 4294963200  ;;  %v4289_v0 = vmov 1   ;;  %v4290_v1 = vmov 0.0   ;;  %v4291_v2 = vmov 0.0|0.0   ;;  %v133_v3 = vld [vmem:[#allocation7 + $0x8] sm:$0xff] }
  0x7f   :  { %4010 = vset.pattern.permute.xlu1 %v4289_v0  ;;  %240 = vmatprep.mubr.f32.mxu0 %v4290_v1  ;;  %v135_v4 = vld [vmem:[#allocation7 + $0x18] sm:$0xff]  ;;  %v132_v5 = vld [vmem:[#allocation7] sm:$0xff]  ;;  %v134_v7 = vld [vmem:[#allocation7 + $0x10] sm:$0xff]  ;;  %v4292_v39 = vmov 0   ;;  %vm4293_vm0 = vmmov 0   ;;  %s4298_s8 = smov [#allocation14]  }
  0x80   :  { %4012 = vset.pattern.permute.xlu0 %v4289_v0  ;;  %3668 = vmatprep.subr.bf16.mxu1 %v4291_v2  ;;  %v3636_v6 = vpack.c.bf16 %v135_v4, %v133_v3  ;;  %v137_v8 = vld [vmem:[#allocation7 + $0x28] sm:$0xff]  ;;  %v139_v9 = vld [vmem:[#allocation7 + $0x38] sm:$0xff]  ;;  %v3638_v10 = vpack.c.bf16 %v134_v7, %v132_v5  ;;  %v136_v12 = vld [vmem:[#allocation7 + $0x20] sm:$0xff]  ;;  %s2779_s30 = sshll.u32 %s4298_s8, 4  ;;  %s5521_s30 = int_to_ptr.vmem [resolvable:$true] %s2779_s30 }
  0x81   :  { %v3640_v11 = vpack.c.bf16 %v139_v9, %v137_v8  ;;  %v138_v13 = vld [vmem:[#allocation7 + $0x30] sm:$0xff]  ;;  %v141_v14 = vld [vmem:[#allocation7 + $0x48] sm:$0xff]  ;;  %v143_v15 = vld [vmem:[#allocation7 + $0x58] sm:$0xff]  ;;  %3150 = vmatprep.mubr.msk.f32.mxu1 %vm4293_vm0, %v4290_v1 }
  0x82   :  { %3637 = vmatprep.subr.bf16.mxu0 %v3636_v6  ;;  %v3642_v16 = vpack.c.bf16 %v138_v13, %v136_v12  ;;  %v3644_v17 = vpack.c.bf16 %v143_v15, %v141_v14  ;;  %v140_v18 = vld [vmem:[#allocation7 + $0x40] sm:$0xff]  ;;  %v142_v19 = vld [vmem:[#allocation7 + $0x50] sm:$0xff]  ;;  %v145_v20 = vld [vmem:[#allocation7 + $0x68] sm:$0xff] }
  0x83   :  { %3639 = vmatpush1.bf16.msra.mxu0 %v3638_v10  ;;  %v147_v21 = vld [vmem:[#allocation7 + $0x78] sm:$0xff]  ;;  %v4472_v22 = vld [vmem:[#allocation13] sm:$0xff]  ;;  %v3646_v23 = vpack.c.bf16 %v142_v19, %v140_v18  ;;  %v4475_v24 = vld [vmem:[#allocation13 + $0x8] sm:$0xff] }
  0x84   :  { %3641 = vmatprep.subr.bf16.mxu0 %v3640_v11  ;;  %574 = vperm.xlu1 %4010, %v4472_v22   ;;  %v3648_v25 = vpack.c.bf16 %v147_v21, %v145_v20  ;;  %v144_v26 = vld [vmem:[#allocation7 + $0x60] sm:$0xff]  ;;  %v146_v27 = vld [vmem:[#allocation7 + $0x70] sm:$0xff]  ;;  %v149_v28 = vld [vmem:[#allocation7 + $0x88] sm:$0xff] }
  0x85   :  { %v151_v29 = vld [vmem:[#allocation7 + $0x98] sm:$0xff]  ;;  %v3650_v30 = vpack.c.bf16 %v146_v27, %v144_v26  ;;  %v4478_v31 = vld [vmem:[#allocation13 + $0x10] sm:$0xff]  ;;  %v148_v33 = vld [vmem:[#allocation7 + $0x80] sm:$0xff] }
  0x86   :  { %v3652_v32 = vpack.c.bf16 %v151_v29, %v149_v28  ;;  %v150_v34 = vld [vmem:[#allocation7 + $0x90] sm:$0xff]  ;;  %v4480_v35 = vld [vmem:[#allocation13 + $0x18] sm:$0xff]  ;;  %582 = vperm.xlu0 %4012, %v4478_v31   ;;  %v153_v36 = vld [vmem:[#allocation7 + $0xa8] sm:$0xff] }
  0x87   :  { %3643 = vmatpush1.bf16.msra.mxu0 %v3642_v16  ;;  %v155_v37 = vld [vmem:[#allocation7 + $0xb8] sm:$0xff]  ;;  %v4483_v38 = vld [vmem:[#allocation13 + $0x30] sm:$0xff]  ;;  %v3654_v40 = vpack.c.bf16 %v150_v34, %v148_v33  ;;  %v249_v41 = vld [vmem:[#allocation8] sm:$0xff] }
  0x88   :  { %3645 = vmatprep.subr.bf16.mxu0 %v3644_v17  ;;  %578 = vperm.xlu1 %4010, %v4475_v24   ;;  %v250_v42 = vld [vmem:[#allocation8 + $0x8] sm:$0xff]  ;;  %v3656_v43 = vpack.c.bf16 %v155_v37, %v153_v36  ;;  %v152_v44 = vld [vmem:[#allocation7 + $0xa0] sm:$0xff]  ;;  %v154_v45 = vld [vmem:[#allocation7 + $0xb0] sm:$0xff] }
  0x89   :  { %v3669_v46 = vpack.c.bf16 %v250_v42, %v249_v41  ;;  %v251_v47 = vld [vmem:[#allocation8 + $0x10] sm:$0xff]  ;;  %v157_v48 = vld [vmem:[#allocation7 + $0xc8] sm:$0xff]  ;;  %v159_v49 = vld [vmem:[#allocation7 + $0xd8] sm:$0xff]  ;;  %v3658_v53 = vpack.c.bf16 %v154_v45, %v152_v44 }
  0x8a   :  { %598 = vperm.xlu0 %4012, %v4483_v38   ;;  %v252_v50 = vld [vmem:[#allocation8 + $0x18] sm:$0xff]  ;;  %v4488_v51 = vld [vmem:[#allocation13 + $0x50] sm:$0xff]  ;;  %v253_v54 = vld [vmem:[#allocation8 + $0x20] sm:$0xff]  ;;  %v3660_v56 = vpack.c.bf16 %v159_v49, %v157_v48 }
  0x8b   :  { %3647 = vmatpush1.bf16.msra.mxu0 %v3646_v23  ;;  %3670 = vmatpush3.bf16.msra.mxu1 %v3669_v46  ;;  %v3672_v52 = vpack.c.bf16 %v252_v50, %v251_v47  ;;  %v254_v55 = vld [vmem:[#allocation8 + $0x28] sm:$0xff]  ;;  %v156_v57 = vld [vmem:[#allocation7 + $0xc0] sm:$0xff]  ;;  %v158_v58 = vld [vmem:[#allocation7 + $0xd0] sm:$0xff] }
  0x8c   :  { %3649 = vmatprep.subr.bf16.mxu0 %v3648_v25  ;;  %4011 = vset.pattern.permute.xlu1 %v4292_v39  ;;  %v161_v59 = vld [vmem:[#allocation7 + $0xe8] sm:$0xff]  ;;  %v163_v60 = vld [vmem:[#allocation7 + $0xf8] sm:$0xff]  ;;  %v4494_v61 = vld [vmem:[#allocation13 + $0x20] sm:$0xff]  ;;  %v3675_v62 = vpack.c.bf16 %v254_v55, %v253_v54  ;;  %v3662_v63 = vpack.c.bf16 %v158_v58, %v156_v57 }
  0x8d   :  { %490 = vperm.xlu1 %4011, %v4480_v35   ;;  %3671 = vmatprep.subr.bf16.mxu1 %v4291_v2  ;;  %v160_v3 = vld [vmem:[#allocation7 + $0xe0] sm:$0xff]  ;;  %v3664_v4 = vpack.c.bf16 %v163_v60, %v161_v59  ;;  %v162_v5 = vld [vmem:[#allocation7 + $0xf0] sm:$0xff]  ;;  %v256_v7 = vld [vmem:[#allocation8 + $0x38] sm:$0xff] }
  0x8e   :  { %614 = vperm.xlu0 %4012, %v4488_v51   ;;  %v255_v6 = vld [vmem:[#allocation8 + $0x30] sm:$0xff]  ;;  %v3666_v8 = vpack.c.bf16 %v162_v5, %v160_v3  ;;  %v343_v10 = vld [vmem:[#allocation10] sm:$0xff]  ;;  %v344_v11 = vld [vmem:[#allocation10 + $0x8] sm:$0xff] }
  0x8f   :  { %3651 = vmatpush1.bf16.msra.mxu0 %v3650_v30  ;;  %3673 = vmatpush3.bf16.msra.mxu1 %v3672_v52  ;;  %v3678_v9 = vpack.c.bf16 %v256_v7, %v255_v6  ;;  %v257_v12 = vld [vmem:[#allocation8 + $0x40] sm:$0xff]  ;;  %v258_v13 = vld [vmem:[#allocation8 + $0x48] sm:$0xff]  ;;  %v131_v14 = vld [vmem:[#allocation2] sm:$0xff]  ;;  %v3693_v16 = vpack.c.bf16 %v344_v11, %v343_v10 }
  0x90   :  { %3653 = vmatprep.subr.bf16.mxu0 %v3652_v32  ;;  %3674 = vmatprep.subr.bf16.mxu1 %v4291_v2  ;;  %v4505_v15 = vld [vmem:[#allocation13 + $0x28] sm:$0xff]  ;;  %v345_v17 = vld [vmem:[#allocation10 + $0x10] sm:$0xff]  ;;  %v3681_v18 = vpack.c.bf16 %v258_v13, %v257_v12  ;;  %v346_v19 = vld [vmem:[#allocation10 + $0x18] sm:$0xff] }
  0x91   :  { %4013 = vset.pattern.permute.xlu1 %v4289_v0  ;;  %v259_v20 = vld [vmem:[#allocation8 + $0x50] sm:$0xff]  ;;  %v260_v21 = vld [vmem:[#allocation8 + $0x58] sm:$0xff]  ;;  %v3696_v25 = vpack.c.bf16 %v346_v19, %v345_v17  ;;  %v347_v27 = vld [vmem:[#allocation10 + $0x20] sm:$0xff] }
  0x92   :  { %586 = vperm.xlu1 %4013, %v4480_v35   ;;  %4021 = vset.pattern.permute.xlu0 %v4292_v39  ;;  %v4511_v23 = vld [vmem:[#allocation13 + $0x38] sm:$0xff]  ;;  %v3684_v26 = vpack.c.bf16 %v260_v21, %v259_v20  ;;  %v348_v28 = vld [vmem:[#allocation10 + $0x28] sm:$0xff]  ;;  %v261_v29 = vld [vmem:[#allocation8 + $0x60] sm:$0xff] }
  0x93   :  { %3655 = vmatpush1.bf16.msra.mxu0 %v3654_v40  ;;  %475 = vperm.xlu0 %4021, %v4472_v22   ;;  %v262_v30 = vld [vmem:[#allocation8 + $0x68] sm:$0xff]  ;;  %v3699_v32 = vpack.c.bf16 %v348_v28, %v347_v27  ;;  %v349_v33 = vld [vmem:[#allocation10 + $0x30] sm:$0xff]  ;;  %v350_v34 = vld [vmem:[#allocation10 + $0x38] sm:$0xff] }
  0x94   :  { %3657 = vmatprep.subr.bf16.mxu0 %v3656_v43  ;;  %3676 = vmatpush3.bf16.msra.mxu1 %v3675_v62  ;;  %v3687_v36 = vpack.c.bf16 %v262_v30, %v261_v29  ;;  %v263_v37 = vld [vmem:[#allocation8 + $0x70] sm:$0xff]  ;;  %v264_v40 = vld [vmem:[#allocation8 + $0x78] sm:$0xff]  ;;  %v3702_v41 = vpack.c.bf16 %v350_v34, %v349_v33  ;;  %v351_v42 = vld [vmem:[#allocation10 + $0x40] sm:$0xff] }
  0x95   :  { %3677 = vmatprep.subr.bf16.mxu1 %v4291_v2  ;;  %v352_v43 = vld [vmem:[#allocation10 + $0x48] sm:$0xff]  ;;  %v4524_v44 = vld [vmem:[#allocation13 + $0x40] sm:$0xff]  ;;  %v3690_v46 = vpack.c.bf16 %v264_v40, %v263_v37  ;;  %v353_v48 = vld [vmem:[#allocation10 + $0x50] sm:$0xff] }
  0x96   :  { %4014 = vset.pattern.permute.xlu1 %v4292_v39  ;;  %v4526_v45 = vld [vmem:[#allocation13 + $0x48] sm:$0xff]  ;;  %v3705_v47 = vpack.c.bf16 %v352_v43, %v351_v42  ;;  %v354_v49 = vld [vmem:[#allocation10 + $0x58] sm:$0xff]  ;;  %v4540_v55 = vld [vmem:[#allocation13 + $0x70] sm:$0xff] }
  0x97   :  { %3659 = vmatpush1.bf16.msra.mxu0 %v3658_v53  ;;  %495 = vperm.xlu1 %4014, %v4494_v61   ;;  %v4534_v50 = vld [vmem:[#allocation13 + $0x68] sm:$0xff]  ;;  %v3708_v52 = vpack.c.bf16 %v354_v49, %v353_v48  ;;  %v355_v53 = vld [vmem:[#allocation10 + $0x60] sm:$0xff]  ;;  %5814 = vst [vmem:[#allocation25_spill] sm:$0xff] %v4540_v55  ;;  %v357_v57 = vld [vmem:[#allocation10 + $0x70] sm:$0xff] }
  0x98   :  { %3661 = vmatprep.subr.bf16.mxu0 %v3660_v56  ;;  %480 = vperm.xlu0 %4021, %v4475_v24   ;;  %5813 = vst [vmem:[#allocation24_spill] sm:$0xff] %v4534_v50  ;;  %v356_v54 = vld [vmem:[#allocation10 + $0x68] sm:$0xff]  ;;  %v358_v58 = vld [vmem:[#allocation10 + $0x78] sm:$0xff]  ;;  %v4554_v62 = vld [vmem:[#allocation13 + $0x60] sm:$0xff] }
  0x99   :  { %3679 = vmatpush3.bf16.msra.mxu1 %v3678_v9  ;;  %v3711_v56 = vpack.c.bf16 %v356_v54, %v355_v53  ;;  %v4545_v59 = vld [vmem:[#allocation13 + $0x58] sm:$0xff]  ;;  %v3714_v60 = vpack.c.bf16 %v358_v58, %v357_v57  ;;  %5816 = vst [vmem:[#allocation27_spill] sm:$0xff] %v4554_v62 }
  0x9a   :  { %3680 = vmatprep.subr.bf16.mxu1 %v4291_v2  ;;  %5815 = vst [vmem:[#allocation26_spill] sm:$0xff] %v4545_v59  ;;  %v4579_v6 = vld [vmem:[#allocation5 + $0x2] ss:$0 sm:$0xff]  ;;  %v4583_v7 = vld [vmem:[#allocation5 + $0x4] ss:$0 sm:$0xff] }
  0x9b   :  { %3663 = vmatpush1.bf16.msra.mxu0 %v3662_v63  ;;  %4015 = vset.pattern.permute.xlu1 %v4289_v0  ;;  %5820 = vst [vmem:[#allocation31_spill] sm:$0xff] %v4583_v7  ;;  %v4589_v9 = vld [vmem:[#allocation5 + $0x5] ss:$0 sm:$0xff]  ;;  %v4591_v10 = vld [vmem:[#allocation5 + $0x6] ss:$0 sm:$0xff] }
  0x9c   :  { %3665 = vmatprep.subr.bf16.mxu0 %v3664_v4  ;;  %590 = vperm.xlu1 %4015, %v4494_v61   ;;  %5821 = vst [vmem:[#allocation32_spill] sm:$0xff] %v4589_v9  ;;  %v4593_v11 = vld [vmem:[#allocation5 + $0x7] ss:$0 sm:$0xff]  ;;  %v4625_v28 = vld [vmem:[#allocation5] ss:$0 sm:$0xff] }
  0x9d   :  { %485 = vperm.xlu0 %4021, %v4478_v31   ;;  %3682 = vmatpush3.bf16.msra.mxu1 %v3681_v18  ;;  %v4627_v29 = vld [vmem:[#allocation5 + $0x1] ss:$0 sm:$0xff] }
  0x9e   :  { %3683 = vmatprep.subr.bf16.mxu1 %v4291_v2 }
  0x9f   :  { %3667 = vmatpush1.bf16.msra.mxu0 %v3666_v8 }
  0xa0   :  { %3692 = vmatprep.subr.bf16.mxu0 %v4291_v2  ;;  %594 = vperm.xlu1 %4015, %v4505_v15  }
  0xa1   :  { %500 = vperm.xlu0 %4021, %v4505_v15   ;;  %3685 = vmatpush3.bf16.msra.mxu1 %v3684_v26 }
  0xa2   :  { %241 = vmatmul.mubr.f32.vlgmr.msra.gmra.mrb[0].mxu0 %v131_v14  ;;  %3686 = vmatprep.subr.bf16.mxu1 %v4291_v2 }
  0xa3   :  { %3694 = vmatpush3.bf16.msra.mxu0 %v3693_v16  ;;  %3185 = vmatprep.mubr.msk.f32.mxu0 %vm4293_vm0, %v4290_v1 }
  0xa4   :  { %3695 = vmatprep.subr.bf16.mxu0 %v4291_v2  ;;  %4016 = vset.pattern.permute.xlu1 %v4292_v39 }
  0xa5   :  { %510 = vperm.xlu1 %4016, %v4511_v23   ;;  %505 = vperm.xlu0 %4021, %v4483_v38  }
  0xa6   :  { %3688 = vmatpush3.bf16.msra.mxu1 %v3687_v36 }
  0xa7   :  { %3697 = vmatpush3.bf16.msra.mxu0 %v3696_v25  ;;  %3689 = vmatprep.subr.bf16.mxu1 %v4291_v2 }
  0xa8   :  { %3698 = vmatprep.subr.bf16.mxu0 %v4291_v2 }
  0xa9   :  { %4017 = vset.pattern.permute.xlu1 %v4289_v0  ;;  %520 = vperm.xlu0 %4021, %v4526_v45  }
  0xaa   :  { %602 = vperm.xlu1 %4017, %v4511_v23   ;;  %3691 = vmatpush3.bf16.msra.mxu1 %v3690_v46 }
  0xab   :  { %3700 = vmatpush3.bf16.msra.mxu0 %v3699_v32 }
  0xac   :  { %3701 = vmatprep.subr.bf16.mxu0 %v4291_v2 }
  0xad   :  { %525 = vperm.xlu0 %4021, %v4488_v51  }
  0xae   :  { %4018 = vset.pattern.permute.xlu1 %v4292_v39 }
  0xaf   :  { %3703 = vmatpush3.bf16.msra.mxu0 %v3702_v41  ;;  %515 = vperm.xlu1 %4018, %v4524_v44  }
  0xb0   :  { %3704 = vmatprep.subr.bf16.mxu0 %v4291_v2 }
  0xb1   :  { %540 = vperm.xlu0 %4021, %v4534_v50  }
  0xb3   :  { %3706 = vmatpush3.bf16.msra.mxu0 %v3705_v47  ;;  %4019 = vset.pattern.permute.xlu1 %v4289_v0 }
  0xb4   :  { %3707 = vmatprep.subr.bf16.mxu0 %v4291_v2  ;;  %606 = vperm.xlu1 %4019, %v4524_v44  }
  0xb5   :  { %545 = vperm.xlu0 %4021, %v4540_v55  }
  0xb7   :  { %3709 = vmatpush3.bf16.msra.mxu0 %v3708_v52 }
  0xb8   :  { %3710 = vmatprep.subr.bf16.mxu0 %v4291_v2  ;;  %610 = vperm.xlu1 %4019, %v4526_v45  }
  0xb9   :  { %4026 = vset.pattern.permute.xlu0 %v4289_v0 }
  0xba   :  { %630 = vperm.xlu0 %4026, %v4540_v55  }
  0xbb   :  { %3712 = vmatpush3.bf16.msra.mxu0 %v3711_v56 }
  0xbc   :  { %3713 = vmatprep.subr.bf16.mxu0 %v4291_v2  ;;  %4020 = vset.pattern.permute.xlu1 %v4292_v39  ;;  %v4561_v2 = vld [vmem:[#allocation13 + $0x78] sm:$0xff] }
  0xbd   :  { %530 = vperm.xlu1 %4020, %v4545_v59   ;;  %5817 = vst [vmem:[#allocation28_spill] sm:$0xff] %v4561_v2 }
  0xbf   :  { %3715 = vmatpush3.bf16.msra.mxu0 %v3714_v60 }
  0xc1   :  { %4022 = vset.pattern.permute.xlu1 %v4289_v0 }
  0xc2   :  { %618 = vperm.xlu1 %4022, %v4545_v59  }
  0xc6   :  { %4023 = vset.pattern.permute.xlu1 %v4292_v39 }
  0xc7   :  { %535 = vperm.xlu1 %4023, %v4554_v62  }
  0xcb   :  { %4024 = vset.pattern.permute.xlu1 %v4289_v0 }
  0xcc   :  { %622 = vperm.xlu1 %4024, %v4554_v62  }
  0xd0   :  { %626 = vperm.xlu1 %4024, %v4534_v50  }
  0xd4   :  { %4025 = vset.pattern.permute.xlu1 %v4292_v39 }
  0xd5   :  { %550 = vperm.xlu1 %4025, %v4561_v2  }
  0xd9   :  { %4027 = vset.pattern.permute.xlu1 %v4289_v0  ;;  %v4581_v0 = vld [vmem:[#allocation5 + $0x3] ss:$0 sm:$0xff] }
  0xda   :  { %634 = vperm.xlu1 %4027, %v4561_v2  }
 0x103   :  { %v4569_v63 = vpop.permute.xlu1 %574 }
 0x104   :  { %5818 = vst [vmem:[#allocation29_spill] sm:$0xff] %v4569_v63 }
 0x105   :  { %v4573_v4 = vpop.permute.xlu0 %582 }
 0x107   :  { %v4571_v3 = vpop.permute.xlu1 %578 }
 0x108   :  { %5819 = vst [vmem:[#allocation30_spill] sm:$0xff] %v4571_v3 }
 0x109   :  { %v4577_v39 = vpop.permute.xlu0 %598 }
 0x10c   :  { %v4575_v5 = vpop.permute.xlu1 %490 }
 0x10d   :  { %v1263_v8 = vmul.f32 %v4579_v6, %v4575_v5  ;;  %v1516_v1 = vmul.f32 %v4581_v0, %v4575_v5  ;;  %v1769_v12 = vmul.f32 %v4583_v7, %v4575_v5  ;;  %v2022_v13 = vmul.f32 %v4589_v9, %v4575_v5  ;;  %v4605_v18 = vpop.permute.xlu0 %614 }
 0x10e   :  { %v2275_v14 = vmul.f32 %v4591_v10, %v4575_v5  ;;  %v2528_v16 = vmul.f32 %v4593_v11, %v4575_v5 }
 0x111   :  { %v4603_v17 = vpop.permute.xlu1 %586 }
 0x112   :  { %v4608_v19 = vadd.f32 %v1263_v8, %v4603_v17  ;;  %v4611_v20 = vadd.f32 %v1516_v1, %v4603_v17  ;;  %v4614_v21 = vadd.f32 %v1769_v12, %v4603_v17  ;;  %v4617_v25 = vadd.f32 %v2022_v13, %v4603_v17  ;;  %v4629_v30 = vpop.permute.xlu0 %475 }
 0x113   :  { %v4620_v26 = vadd.f32 %v2275_v14, %v4603_v17  ;;  %v4623_v27 = vadd.f32 %v2528_v16, %v4603_v17  ;;  %v557_v32 = vmul.f32 %v4625_v28, %v4629_v30  ;;  %v1007_v33 = vmul.f32 %v4627_v29, %v4629_v30 }
 0x114   :  { %5822 = vst [vmem:[#allocation33_spill] sm:$0xff] %v4608_v19  ;;  %5823 = vst [vmem:[#allocation34_spill] sm:$0xff] %v4611_v20 }
 0x115   :  { %5824 = vst [vmem:[#allocation35_spill] sm:$0xff] %v4614_v21  ;;  %5825 = vst [vmem:[#allocation36_spill] sm:$0xff] %v4617_v25  ;;  %v637_v36 = vadd.f32 %v4569_v63, %v557_v32  ;;  %v1023_v37 = vadd.f32 %v1007_v33, %v4569_v63 }
 0x116   :  { %5826 = vst [vmem:[#allocation37_spill] sm:$0xff] %v4620_v26  ;;  %5827 = vst [vmem:[#allocation38_spill] sm:$0xff] %v4623_v27  ;;  %v4635_v34 = vpop.permute.xlu1 %495  ;;  %v5771_v27 = vmov 2  }
 0x117   :  { %5828 = vst [vmem:[#allocation39_spill] sm:$0xff] %v4635_v34  ;;  %v4639_v40 = vpop.permute.xlu0 %480  ;;  %v653_v46 = vmax.f32 %v637_v36, 0.0  ;;  %v1039_v48 = vmax.f32 %v1023_v37, 0.0  ;;  %4028 = vset.pattern.permute.xlu1 %v5771_v27  ;;  %4029 = vset.pattern.permute.xlu0 %v5771_v27 }
 0x118   :  { %v558_v41 = vmul.f32 %v4625_v28, %v4639_v40  ;;  %v1008_v42 = vmul.f32 %v4627_v29, %v4639_v40  ;;  %670 = vperm.xlu1 %4028, %v4472_v22   ;;  %674 = vperm.xlu0 %4029, %v4475_v24  }
 0x11a   :  { %v638_v43 = vadd.f32 %v4571_v3, %v558_v41  ;;  %v1024_v47 = vadd.f32 %v1008_v42, %v4571_v3 }
 0x11b   :  { %v4647_v49 = vpop.permute.xlu1 %590 }
 0x11c   :  { %v654_v52 = vmax.f32 %v638_v43, 0.0  ;;  %v1040_v53 = vmax.f32 %v1024_v47, 0.0  ;;  %v4667_v13 = vpop.permute.xlu0 %485  ;;  %678 = vperm.xlu1 %4028, %v4478_v31   ;;  %686 = vperm.xlu0 %4029, %v4494_v61  }
 0x11d   :  { %5831 = vst [vmem:[#allocation42_spill] sm:$0xff] %v4667_v13  ;;  %v1009_v19 = vmul.f32 %v4627_v29, %v4667_v13 }
 0x11e   :  { %v4649_v54 = vpack.c.bf16 %v654_v52, %v653_v46  ;;  %v4651_v56 = vpack.c.bf16 %v1040_v53, %v1039_v48 }
 0x11f   :  { %v4655_v57 = vpop.permute.xlu1 %594 }
 0x120   :  { %3717 = vmatprep.subr.bf16.mxu1 %v4649_v54  ;;  %3749 = vmatprep.subr.bf16.mxu0 %v4651_v56  ;;  %v4669_v14 = vpop.permute.xlu0 %500 }
 0x121   :  { %5832 = vst [vmem:[#allocation43_spill] sm:$0xff] %v4669_v14  ;;  %682 = vperm.xlu1 %4028, %v4480_v35   ;;  %v562_v50 = vmul.f32 %v4625_v28, %v4669_v14 }
 0x124   :  { %v4657_v58 = vpop.permute.xlu1 %510  ;;  %v4673_v32 = vpop.permute.xlu0 %505 }
 0x125   :  { %5829 = vst [vmem:[#allocation40_spill] sm:$0xff] %v4657_v58  ;;  %5833 = vst [vmem:[#allocation44_spill] sm:$0xff] %v4673_v32  ;;  %v1014_v63 = vmul.f32 %v4627_v29, %v4657_v58 }
 0x128   :  { %v4679_v37 = vpop.permute.xlu0 %520 }
 0x129   :  { %v4659_v60 = vpop.permute.xlu1 %602  ;;  %v1775_v41 = vmul.f32 %v4583_v7, %v4679_v37  ;;  %v2028_v52 = vmul.f32 %v4589_v9, %v4679_v37 }
 0x12a   :  { %5830 = vst [vmem:[#allocation41_spill] sm:$0xff] %v4659_v60 }
 0x12e   :  { %v4661_v8 = vpop.permute.xlu1 %515 }
 0x12f   :  { %v1774_v36 = vmul.f32 %v4583_v7, %v4661_v8  ;;  %v2027_v48 = vmul.f32 %v4589_v9, %v4661_v8 }
 0x133   :  { %v4663_v1 = vpop.permute.xlu1 %606 }
 0x134   :  { %v1790_v42 = vadd.f32 %v1774_v36, %v4663_v1  ;;  %v2043_v36 = vadd.f32 %v2027_v48, %v4663_v1 }
 0x136   :  { %v1806_v47 = vmax.f32 %v1790_v42, 0.0  ;;  %v2059_v2 = vmax.f32 %v2043_v36, 0.0  ;;  %v166_v36 = vlaneseq }
 0x137   :  { %v4665_v12 = vpop.permute.xlu1 %610 }
 0x138   :  { %v1791_v46 = vadd.f32 %v1775_v41, %v4665_v12  ;;  %v2044_v41 = vadd.f32 %v2028_v52, %v4665_v12 }
 0x13a   :  { %v1807_v53 = vmax.f32 %v1791_v46, 0.0  ;;  %v4701_v46 = vpop.permute.xlu0 %525  ;;  %v2060_v55 = vmax.f32 %v2044_v41, 0.0  ;;  %v560_v41 = vmul.f32 %v4625_v28, %v4575_v5 }
 0x13c   :  { %v4671_v16 = vpop.permute.xlu1 %530  ;;  %v4705_v21 = vpack.c.bf16 %v1807_v53, %v1806_v47  ;;  %v4710_v48 = vpack.c.bf16 %v2060_v55, %v2059_v2 }
 0x13d   :  { %v1777_v26 = vmul.f32 %v4583_v7, %v4671_v16  ;;  %v2030_v42 = vmul.f32 %v4589_v9, %v4671_v16 }
 0x13e   :  { %5834 = vst [vmem:[#allocation45_spill] sm:$0xff] %v4705_v21  ;;  %5836 = vst [vmem:[#allocation47_spill] sm:$0xff] %v4710_v48  ;;  %v4714_v52 = vpop.permute.xlu0 %540  ;;  %v561_v21 = vmul.f32 %v4625_v28, %v4635_v34 }
 0x13f   :  { %v1779_v53 = vmul.f32 %v4583_v7, %v4714_v52  ;;  %v2032_v55 = vmul.f32 %v4589_v9, %v4714_v52 }
 0x141   :  { %v4675_v33 = vpop.permute.xlu1 %618 }
 0x142   :  { %v4708_v27 = vadd.f32 %v1777_v26, %v4675_v33  ;;  %v4717_v20 = vadd.f32 %v2030_v42, %v4675_v33  ;;  %v1010_v42 = vmul.f32 %v4627_v29, %v4575_v5  ;;  %v1011_v5 = vmul.f32 %v4627_v29, %v4635_v34 }
 0x144   :  { %5835 = vst [vmem:[#allocation46_spill] sm:$0xff] %v4708_v27  ;;  %5837 = vst [vmem:[#allocation48_spill] sm:$0xff] %v4717_v20  ;;  %v1026_v59 = vadd.f32 %v1010_v42, %v4603_v17 }
 0x146   :  { %v4684_v43 = vpop.permute.xlu1 %535 }
 0x147   :  { %v1778_v47 = vmul.f32 %v4583_v7, %v4684_v43  ;;  %v2031_v26 = vmul.f32 %v4589_v9, %v4684_v43  ;;  %v559_v7 = vmul.f32 %v4625_v28, %v4667_v13  ;;  %v563_v13 = vmul.f32 %v4625_v28, %v4673_v32 }
 0x14b   :  { %v4703_v25 = vpop.permute.xlu1 %622 }
 0x14c   :  { %v1794_v48 = vadd.f32 %v1778_v47, %v4703_v25  ;;  %v2047_v27 = vadd.f32 %v2031_v26, %v4703_v25  ;;  %v1012_v26 = vmul.f32 %v4627_v29, %v4669_v14  ;;  %v640_v14 = vadd.f32 %v4603_v17, %v560_v41 }
 0x14d   :  { %v643_v17 = vadd.f32 %v4577_v39, %v563_v13 }
 0x14e   :  { %v1810_v47 = vmax.f32 %v1794_v48, 0.0  ;;  %v2063_v3 = vmax.f32 %v2047_v27, 0.0  ;;  %v1013_v48 = vmul.f32 %v4627_v29, %v4673_v32  ;;  %v167_v27 = vshrl.u32 %v166_v36, 7 }
 0x14f   :  { %v4727_v2 = vpop.permute.xlu1 %626  ;;  %v1025_v32 = vadd.f32 %v1009_v19, %v4573_v4  ;;  %v1027_v36 = vadd.f32 %v1011_v5, %v4647_v49  ;;  %v1028_v41 = vadd.f32 %v1012_v26, %v4655_v57 }
 0x150   :  { %v1795_v20 = vadd.f32 %v1779_v53, %v4727_v2  ;;  %v2048_v9 = vadd.f32 %v2032_v55, %v4727_v2  ;;  %v564_v55 = vmul.f32 %v4625_v28, %v4657_v58  ;;  %v639_v58 = vadd.f32 %v4573_v4, %v559_v7 }
 0x151   :  { %v1029_v42 = vadd.f32 %v1013_v48, %v4577_v39  ;;  %v1030_v7 = vadd.f32 %v1014_v63, %v4659_v60  ;;  %v172_v19 = vsub.s32 1, %v167_v27  ;;  %v1041_v5 = vmax.f32 %v1025_v32, 0.0 }
 0x152   :  { %v1811_v62 = vmax.f32 %v1795_v20, 0.0  ;;  %v2064_v53 = vmax.f32 %v2048_v9, 0.0  ;;  %v5797_v9 = vmov 3   ;;  %v1044_v48 = vmax.f32 %v1028_v41, 0.0 }
 0x153   :  { %4030 = vset.pattern.permute.xlu1 %v5797_v9  ;;  %4031 = vset.pattern.permute.xlu0 %v5797_v9  ;;  %v659_v9 = vmax.f32 %v643_v17, 0.0  ;;  %v566_v32 = vmul.f32 %v4625_v28, %v4679_v37  ;;  %v1016_v41 = vmul.f32 %v4627_v29, %v4679_v37 }
 0x154   :  { %v4758_v34 = vpack.c.bf16 %v1811_v62, %v1810_v47  ;;  %v4760_v20 = vpack.c.bf16 %v2064_v53, %v2063_v3  ;;  %895 = vperm.xlu1 %4030, %v4472_v22   ;;  %v641_v62 = vadd.f32 %v4647_v49, %v561_v21  ;;  %v642_v3 = vadd.f32 %v4655_v57, %v562_v50 }
 0x155   :  { %899 = vperm.xlu0 %4031, %v4475_v24   ;;  %v644_v22 = vadd.f32 %v4659_v60, %v564_v55  ;;  %v168_v47 = vsub.s32 0, %v167_v27  ;;  %v656_v53 = vmax.f32 %v640_v14, 0.0  ;;  %v1042_v21 = vmax.f32 %v1026_v59, 0.0  ;;  %v164_v24 = vld [vmem:[%s5759_s3] sm:$0x3] }
 0x156   :  { %5838 = vst [vmem:[#allocation49_spill] sm:$0xff] %v4758_v34  ;;  %5839 = vst [vmem:[#allocation50_spill] sm:$0xff] %v4760_v20  ;;  %v655_v50 = vmax.f32 %v639_v58, 0.0  ;;  %v657_v26 = vmax.f32 %v641_v62, 0.0  ;;  %v658_v13 = vmax.f32 %v642_v3, 0.0  ;;  %v1043_v55 = vmax.f32 %v1027_v36, 0.0 }
 0x157   :  { %v660_v63 = vmax.f32 %v644_v22, 0.0  ;;  %v1045_v20 = vmax.f32 %v1029_v42, 0.0  ;;  %v1046_v27 = vmax.f32 %v1030_v7, 0.0  ;;  %v169_v14 = vrot.slane %v164_v24, %v168_v47 }
 0x158   :  { %903 = vperm.xlu1 %4030, %v4478_v31   ;;  %v173_v59 = vrot.slane %v164_v24, %v172_v19  ;;  %v5840_v34 = vmov 2   ;;  %v4784_v31 = vpack.c.bf16 %v656_v53, %v655_v50  ;;  %v4786_v60 = vpack.c.bf16 %v1042_v21, %v1041_v5 }
 0x159   :  { %907 = vperm.xlu0 %4031, %v4480_v35   ;;  %v4788_v58 = vpack.c.bf16 %v658_v13, %v657_v26  ;;  %v4792_v35 = vpack.c.bf16 %v1044_v48, %v1043_v55  ;;  %v2280_v62 = vmul.f32 %v4591_v10, %v4661_v8  ;;  %v4800_v3 = vpack.c.bf16 %v660_v63, %v659_v9 }
 0x15a   :  { %v4802_v36 = vpack.c.bf16 %v1046_v27, %v1045_v20  ;;  %v565_v22 = vmul.f32 %v4625_v28, %v4661_v8  ;;  %v567_v42 = vmul.f32 %v4625_v28, %v4701_v46  ;;  %v2534_v19 = vmul.f32 %v4593_v11, %v4679_v37 }
 0x15b   :  { %v2296_v7 = vadd.f32 %v2280_v62, %v4663_v1  ;;  %v1015_v24 = vmul.f32 %v4627_v29, %v4661_v8  ;;  %v1017_v13 = vmul.f32 %v4627_v29, %v4701_v46  ;;  %v4832_v62 = vld [vmem:[#allocation11] sm:$0xff] }
 0x15c   :  { %4032 = vset.pattern.permute.xlu1 %v5840_v34  ;;  %v2281_v34 = vmul.f32 %v4591_v10, %v4679_v37  ;;  %v2550_v55 = vadd.f32 %v2534_v19, %v4665_v12  ;;  %v4825_v27 = vadd.f32 %v4605_v18, %v567_v42 }
 0x15d   :  { %690 = vperm.xlu1 %4032, %v4505_v15   ;;  %911 = vperm.xlu0 %4031, %v4494_v61   ;;  %v2533_v61 = vmul.f32 %v4593_v11, %v4661_v8  ;;  %v2312_v50 = vmax.f32 %v2296_v7, 0.0  ;;  %v1031_v42 = vadd.f32 %v1015_v24, %v4663_v1 }
 0x15e   :  { %v2297_v9 = vadd.f32 %v2281_v34, %v4665_v12  ;;  %v2566_v34 = vmax.f32 %v2550_v55, 0.0 }
 0x15f   :  { %v2549_v53 = vadd.f32 %v2533_v61, %v4663_v1  ;;  %v2536_v61 = vmul.f32 %v4593_v11, %v4671_v16 }
 0x160   :  { %v2313_v5 = vmax.f32 %v2297_v9, 0.0  ;;  %v646_v9 = vadd.f32 %v4665_v12, %v566_v32  ;;  %v2537_v32 = vmul.f32 %v4593_v11, %v4684_v43 }
 0x161   :  { %694 = vperm.xlu1 %4032, %v4483_v38   ;;  %915 = vperm.xlu0 %4031, %v4505_v15   ;;  %v2565_v48 = vmax.f32 %v2549_v53, 0.0  ;;  %v2283_v15 = vmul.f32 %v4591_v10, %v4671_v16  ;;  %v2538_v53 = vmul.f32 %v4593_v11, %v4714_v52  ;;  %v570_v11 = vmul.f32 %v4625_v28, %v4714_v52 }
 0x163   :  { %v4842_v7 = vadd.f32 %v2283_v15, %v4675_v33  ;;  %v2554_v55 = vadd.f32 %v2538_v53, %v4727_v2 }
 0x165   :  { %698 = vperm.xlu1 %4032, %v4511_v23   ;;  %919 = vperm.xlu0 %4031, %v4483_v38   ;;  %v662_v38 = vmax.f32 %v646_v9, 0.0  ;;  %v663_v9 = vmax.f32 %v4825_v27, 0.0  ;;  %v650_v27 = vadd.f32 %v4727_v2, %v570_v11  ;;  %v1513_v11 = vmul.f32 %v4581_v0, %v4629_v30 }
 0x169   :  { %702 = vperm.xlu1 %4032, %v4524_v44   ;;  %923 = vperm.xlu0 %4031, %v4511_v23  }
 0x16d   :  { %706 = vperm.xlu1 %4032, %v4526_v45   ;;  %927 = vperm.xlu0 %4031, %v4524_v44   ;;  %v1514_v44 = vmul.f32 %v4581_v0, %v4639_v40 }
 0x171   :  { %710 = vperm.xlu1 %4032, %v4488_v51   ;;  %931 = vperm.xlu0 %4031, %v4526_v45  }
 0x175   :  { %v242_v17 = vpop.f32.mrb[0].mxu0  ;;  %935 = vperm.xlu0 %4031, %v4488_v51  }
 0x176   :  { %v243_v47 = vadd.f32 %v242_v17, %v169_v14  ;;  %v244_v20 = vpop.f32.mrb[1].mxu0  ;;  %v4827_v14 = vpack.c.bf16 %v2313_v5, %v2312_v50  ;;  %v2284_v17 = vmul.f32 %v4591_v10, %v4684_v43  ;;  %v4874_v5 = vpop.permute.xlu0 %545 }
 0x177   :  { %v245_v21 = vadd.f32 %v244_v20, %v173_v59  ;;  %v645_v59 = vadd.f32 %v4663_v1, %v565_v22  ;;  %v2285_v22 = vmul.f32 %v4591_v10, %v4714_v52  ;;  %v4852_v20 = vadd.f32 %v2536_v61, %v4675_v33 }
 0x178   :  { %v247_v26 = vmax.f32 %v243_v47, 0.0  ;;  %v4849_v47 = vpack.c.bf16 %v2566_v34, %v2565_v48  ;;  %v2300_v19 = vadd.f32 %v2284_v17, %v4703_v25  ;;  %v1047_v48 = vmax.f32 %v1031_v42, 0.0 }
 0x179   :  { %v248_v63 = vmax.f32 %v245_v21, 0.0  ;;  %v2301_v10 = vadd.f32 %v2285_v22, %v4727_v2  ;;  %v4871_v21 = vadd.f32 %v1017_v13, %v4605_v18  ;;  %v4882_v13 = vpop.permute.xlu1 %550  ;;  %v2570_v61 = vmax.f32 %v2554_v55, 0.0 }
 0x17a   :  { %3151 = vmatmul.mubr.f32.vlgmr.msra.gmra.mrb[0].mxu1 %v247_v26  ;;  %5841 = vst [vmem:[#allocation51_spill] sm:$0xff] %v4849_v47  ;;  %v2316_v24 = vmax.f32 %v2300_v19, 0.0  ;;  %v661_v26 = vmax.f32 %v645_v59, 0.0  ;;  %v1019_v22 = vmul.f32 %v4627_v29, %v4684_v43  ;;  %v1020_v42 = vmul.f32 %v4627_v29, %v4714_v52 }
 0x17b   :  { %3719 = vmatpush3.bf16.msra.mxu1 %v4649_v54  ;;  %3186 = vmatmul.mubr.f32.vlgmr.msra.gmra.mrb[2].mxu0 %v248_v63  ;;  %v1032_v54 = vadd.f32 %v1016_v41, %v4665_v12  ;;  %v1018_v41 = vmul.f32 %v4627_v29, %v4671_v16  ;;  %v2317_v50 = vmax.f32 %v2301_v10, 0.0  ;;  %v1021_v23 = vmul.f32 %v4627_v29, %v4874_v5 }
 0x17c   :  { %3721 = vmatprep.subr.bf16.mxu1 %v4784_v31  ;;  %3751 = vmatpush3.bf16.msra.mxu0 %v4651_v56  ;;  %v568_v56 = vmul.f32 %v4625_v28, %v4671_v16 }
 0x17d   :  { %3753 = vmatprep.subr.bf16.mxu0 %v4786_v60  ;;  %3220 = vmatprep.mubr.f32.mxu1 %v4832_v62  ;;  %v1048_v63 = vmax.f32 %v1032_v54, 0.0  ;;  %v4885_v15 = vpack.c.bf16 %v2317_v50, %v2316_v24  ;;  %v1034_v17 = vadd.f32 %v1018_v41, %v4675_v33  ;;  %v1049_v54 = vmax.f32 %v4871_v21, 0.0  ;;  %v4916_v21 = vpop.permute.xlu1 %634 }
 0x17e   :  { %3276 = vmatprep.mubr.f32.mxu0 %v4832_v62  ;;  %v648_v34 = vadd.f32 %v4675_v33, %v568_v56  ;;  %v571_v56 = vmul.f32 %v4625_v28, %v4874_v5  ;;  %v572_v41 = vmul.f32 %v4625_v28, %v4882_v13  ;;  %v1035_v50 = vadd.f32 %v1019_v22, %v4703_v25  ;;  %v5845_v22 = vld [vmem:[#allocation29_spill] sm:$0xff] }
 0x17f   :  { %3723 = vmatpush3.bf16.msra.mxu1 %v4784_v31  ;;  %v2553_v31 = vadd.f32 %v2537_v32, %v4703_v25  ;;  %5842 = vst [vmem:[#allocation52_spill] sm:$0xff] %v4885_v15  ;;  %v3764_v10 = vpack.c.bf16 %v1048_v63, %v1047_v48  ;;  %v4909_v32 = vpop.permute.xlu0 %630  ;;  %v1050_v24 = vmax.f32 %v1034_v17, 0.0 }
 0x180   :  { %3725 = vmatprep.subr.bf16.mxu1 %v4788_v58  ;;  %3755 = vmatpush3.bf16.msra.mxu0 %v4786_v60  ;;  %v569_v60 = vmul.f32 %v4625_v28, %v4684_v43  ;;  %v664_v53 = vmax.f32 %v648_v34, 0.0  ;;  %v1260_v28 = vmul.f32 %v4579_v6, %v4629_v30  ;;  %v1037_v55 = vadd.f32 %v1021_v23, %v4909_v32  ;;  %v5844_v34 = vld [vmem:[#allocation26_spill] sm:$0xff] }
 0x181   :  { %3757 = vmatprep.subr.bf16.mxu0 %v4792_v35  ;;  %v2569_v59 = vmax.f32 %v2553_v31, 0.0  ;;  %v1022_v31 = vmul.f32 %v4627_v29, %v4882_v13  ;;  %v652_v63 = vadd.f32 %v4916_v21, %v572_v41  ;;  %714 = vperm.xlu1 %4032, %v5844_v34   ;;  %v1529_v23 = vadd.f32 %v1513_v11, %v5845_v22 }
 0x182   :  { %v3736_v29 = vpack.c.bf16 %v664_v53, %v663_v9  ;;  %v5846_v9 = vld [vmem:[#allocation30_spill] sm:$0xff]  ;;  %939 = vperm.xlu0 %4031, %v5844_v34  }
 0x183   :  { %3727 = vmatpush3.bf16.msra.mxu1 %v4788_v58  ;;  %v4902_v19 = vpack.c.bf16 %v2570_v61, %v2569_v59  ;;  %v3732_v58 = vpack.c.bf16 %v662_v38, %v661_v26  ;;  %v1036_v26 = vadd.f32 %v1020_v42, %v4727_v2  ;;  %v1261_v38 = vmul.f32 %v4579_v6, %v4639_v40 }
 0x184   :  { %3729 = vmatprep.subr.bf16.mxu1 %v4800_v3  ;;  %3759 = vmatpush3.bf16.msra.mxu0 %v4792_v35  ;;  %v649_v35 = vadd.f32 %v4703_v25, %v569_v60  ;;  %v3768_v60 = vpack.c.bf16 %v1050_v24, %v1049_v54  ;;  %v1051_v59 = vmax.f32 %v1035_v50, 0.0  ;;  %v1038_v17 = vadd.f32 %v1022_v31, %v4916_v21  ;;  %v5848_v24 = vld [vmem:[#allocation27_spill] sm:$0xff] }
 0x185   :  { %5843 = vst [vmem:[#allocation53_spill] sm:$0xff] %v4902_v19  ;;  %3761 = vmatprep.subr.bf16.mxu0 %v4802_v36  ;;  %v1052_v61 = vmax.f32 %v1036_v26, 0.0  ;;  %v1276_v42 = vadd.f32 %v1260_v28, %v5845_v22  ;;  %v1530_v53 = vadd.f32 %v1514_v44, %v5846_v9  ;;  %v668_v41 = vmax.f32 %v652_v63, 0.0  ;;  %718 = vperm.xlu1 %4032, %v5848_v24   ;;  %v5849_v28 = vld [vmem:[#allocation39_spill] sm:$0xff] }
 0x186   :  { %v665_v48 = vmax.f32 %v649_v35, 0.0  ;;  %v5847_v35 = vld [vmem:[#allocation42_spill] sm:$0xff]  ;;  %v1053_v50 = vmax.f32 %v1037_v55, 0.0  ;;  %v1054_v26 = vmax.f32 %v1038_v17, 0.0  ;;  %v1264_v11 = vmul.f32 %v4579_v6, %v5849_v28  ;;  %v5850_v63 = vld [vmem:[#allocation43_spill] sm:$0xff]  ;;  %v5852_v17 = vld [vmem:[#allocation44_spill] sm:$0xff]  ;;  %943 = vperm.xlu0 %4031, %v5848_v24  }
 0x187   :  { %3731 = vmatpush3.bf16.msra.mxu1 %v4800_v3  ;;  %v651_v3 = vadd.f32 %v4909_v32, %v571_v56  ;;  %v1277_v56 = vadd.f32 %v1261_v38, %v5846_v9  ;;  %v1262_v54 = vmul.f32 %v4579_v6, %v5847_v35  ;;  %v1515_v45 = vmul.f32 %v4581_v0, %v5847_v35  ;;  %v4990_v24 = vld [vmem:[#allocation11 + $0x10] sm:$0xff] }
 0x188   :  { %3733 = vmatprep.subr.bf16.mxu1 %v3732_v58  ;;  %3763 = vmatpush3.bf16.msra.mxu0 %v4802_v36  ;;  %v666_v36 = vmax.f32 %v650_v27, 0.0  ;;  %v1292_v31 = vmax.f32 %v1276_v42, 0.0  ;;  %v1545_v44 = vmax.f32 %v1529_v23, 0.0  ;;  %v1265_v51 = vmul.f32 %v4579_v6, %v5850_v63 }
 0x189   :  { %3765 = vmatprep.subr.bf16.mxu0 %v3764_v10  ;;  %v667_v27 = vmax.f32 %v651_v3, 0.0  ;;  %v1517_v3 = vmul.f32 %v4581_v0, %v5849_v28  ;;  %v1293_v38 = vmax.f32 %v1277_v56, 0.0  ;;  %v1531_v55 = vadd.f32 %v1515_v45, %v4573_v4  ;;  %v5853_v56 = vld [vmem:[#allocation40_spill] sm:$0xff] }
 0x18a   :  { %v1266_v42 = vmul.f32 %v4579_v6, %v5852_v17  ;;  %v1267_v23 = vmul.f32 %v4579_v6, %v5853_v56  ;;  %v1519_v15 = vmul.f32 %v4581_v0, %v5852_v17  ;;  %v1520_v34 = vmul.f32 %v4581_v0, %v5853_v56 }
 0x18b   :  { %3735 = vmatpush3.bf16.msra.mxu1 %v3732_v58  ;;  %v3740_v58 = vpack.c.bf16 %v666_v36, %v665_v48  ;;  %v1546_v48 = vmax.f32 %v1530_v53, 0.0  ;;  %v3744_v36 = vpack.c.bf16 %v668_v41, %v667_v27  ;;  %v5854_v53 = vld [vmem:[#allocation33_spill] sm:$0xff]  ;;  %v5855_v27 = vld [vmem:[#allocation34_spill] sm:$0xff]  ;;  %v3780_v45 = vpack.c.bf16 %v1293_v38, %v1292_v31 }
 0x18c   :  { %3737 = vmatprep.subr.bf16.mxu1 %v3736_v29  ;;  %3767 = vmatpush3.bf16.msra.mxu0 %v3764_v10  ;;  %v3772_v10 = vpack.c.bf16 %v1052_v61, %v1051_v59  ;;  %v5851_v59 = vld [vmem:[#allocation24_spill] sm:$0xff]  ;;  %v3776_v61 = vpack.c.bf16 %v1054_v26, %v1053_v50  ;;  %v1548_v41 = vmax.f32 %v5855_v27, 0.0  ;;  %v1533_v50 = vadd.f32 %v1517_v3, %v4647_v49  ;;  %v5857_v3 = vld [vmem:[#allocation41_spill] sm:$0xff] }
 0x18d   :  { %3769 = vmatprep.subr.bf16.mxu0 %v3768_v60  ;;  %722 = vperm.xlu1 %4032, %v5851_v59   ;;  %v3812_v19 = vpack.c.bf16 %v1546_v48, %v1545_v44  ;;  %v1281_v59 = vadd.f32 %v1265_v51, %v4655_v57  ;;  %v1547_v31 = vmax.f32 %v1531_v55, 0.0  ;;  %v1283_v44 = vadd.f32 %v1267_v23, %v5857_v3  ;;  %v5858_v27 = vld [vmem:[#allocation28_spill] sm:$0xff] }
 0x18e   :  { %v1268_v48 = vmul.f32 %v4579_v6, %v4661_v8  ;;  %v1522_v51 = vmul.f32 %v4581_v0, %v4679_v37  ;;  %v1536_v23 = vadd.f32 %v1520_v34, %v5857_v3  ;;  %v5009_v34 = vld [vmem:[#allocation11 + $0x20] sm:$0xff] }
 0x18f   :  { %3739 = vmatpush3.bf16.msra.mxu1 %v3736_v29  ;;  %v1278_v29 = vadd.f32 %v1262_v54, %v4573_v4  ;;  %v1295_v54 = vmax.f32 %v5854_v53, 0.0  ;;  %v4975_v53 = vld [vmem:[#allocation11 + $0x8] sm:$0xff] }
 0x190   :  { %3741 = vmatprep.subr.bf16.mxu1 %v3740_v58  ;;  %3771 = vmatpush3.bf16.msra.mxu0 %v3768_v60  ;;  %v1518_v60 = vmul.f32 %v4581_v0, %v5850_v63 }
 0x191   :  { %3773 = vmatprep.subr.bf16.mxu0 %v3772_v10  ;;  %v1294_v26 = vmax.f32 %v1278_v29, 0.0  ;;  %v1269_v29 = vmul.f32 %v4579_v6, %v4679_v37 }
 0x192   :  { %v1534_v38 = vadd.f32 %v1518_v60, %v4655_v57 }
 0x193   :  { %3743 = vmatpush3.bf16.msra.mxu1 %v3740_v58  ;;  %v1280_v58 = vadd.f32 %v1264_v11, %v4647_v49  ;;  %v1282_v11 = vadd.f32 %v1266_v42, %v4577_v39  ;;  %v3784_v60 = vpack.c.bf16 %v1295_v54, %v1294_v26  ;;  %v1535_v42 = vadd.f32 %v1519_v15, %v4577_v39 }
 0x194   :  { %3745 = vmatprep.subr.bf16.mxu1 %v3744_v36  ;;  %3775 = vmatpush3.bf16.msra.mxu0 %v3772_v10  ;;  %v5856_v10 = vld [vmem:[#allocation25_spill] sm:$0xff]  ;;  %v1550_v37 = vmax.f32 %v1534_v38, 0.0  ;;  %v1299_v54 = vmax.f32 %v1283_v44, 0.0  ;;  %v1284_v26 = vadd.f32 %v1268_v48, %v4663_v1  ;;  %v1285_v15 = vadd.f32 %v1269_v29, %v4665_v12 }
 0x195   :  { %3777 = vmatprep.subr.bf16.mxu0 %v3776_v61  ;;  %726 = vperm.xlu1 %4032, %v5856_v10   ;;  %v1296_v55 = vmax.f32 %v1280_v58, 0.0  ;;  %v4996_v58 = vld [vmem:[#allocation11 + $0x18] sm:$0xff]  ;;  %v1549_v10 = vmax.f32 %v1533_v50, 0.0  ;;  %v1298_v47 = vmax.f32 %v1282_v11, 0.0  ;;  %v1523_v50 = vmul.f32 %v4581_v0, %v4701_v46  ;;  %v5014_v11 = vld [vmem:[#allocation11 + $0x28] sm:$0xff] }
 0x196   :  { %v1271_v38 = vmul.f32 %v4579_v6, %v4671_v16  ;;  %v1524_v44 = vmul.f32 %v4581_v0, %v4671_v16  ;;  %v1300_v29 = vmax.f32 %v1284_v26, 0.0  ;;  %v5025_v16 = vld [vmem:[#allocation11 + $0x30] sm:$0xff] }
 0x197   :  { %3747 = vmatpush3.bf16.msra.mxu1 %v3744_v36  ;;  %v1521_v36 = vmul.f32 %v4581_v0, %v4661_v8  ;;  %v3816_v8 = vpack.c.bf16 %v1548_v41, %v1547_v31  ;;  %v1270_v41 = vmul.f32 %v4579_v6, %v4701_v46  ;;  %v1551_v31 = vmax.f32 %v1535_v42, 0.0 }
 0x198   :  { %3779 = vmatpush3.bf16.msra.mxu0 %v3776_v61  ;;  %3781 = vmatprep.subr.bf16.mxu1 %v3780_v45  ;;  %v1297_v61 = vmax.f32 %v1281_v59, 0.0  ;;  %v3792_v48 = vpack.c.bf16 %v1299_v54, %v1298_v47  ;;  %v1539_v42 = vadd.f32 %v1523_v50, %v4605_v18  ;;  %v1526_v54 = vmul.f32 %v4581_v0, %v4714_v52 }
 0x199   :  { %3813 = vmatprep.subr.bf16.mxu0 %v3812_v19  ;;  %730 = vperm.xlu1 %4032, %v5858_v27   ;;  %v1537_v59 = vadd.f32 %v1521_v36, %v4663_v1  ;;  %v1552_v1 = vmax.f32 %v1536_v23, 0.0  ;;  %v1301_v36 = vmax.f32 %v1285_v15, 0.0  ;;  %v1287_v23 = vadd.f32 %v1271_v38, %v4675_v33 }
 0x19a   :  { %3221 = vmatmul.mubr.f32.vlgmr.msra.gmra.mrb[2].mxu1 %v4975_v53  ;;  %v1272_v27 = vmul.f32 %v4579_v6, %v4684_v43  ;;  %v1274_v15 = vmul.f32 %v4579_v6, %v4874_v5 }
 0x19b   :  { %3277 = vmatmul.mubr.f32.vlgmr.msra.gmra.mrb[4].mxu0 %v4975_v53  ;;  %3783 = vmatpush3.bf16.msra.mxu1 %v3780_v45  ;;  %v1538_v45 = vadd.f32 %v1522_v51, %v4665_v12  ;;  %v3820_v12 = vpack.c.bf16 %v1550_v37, %v1549_v10  ;;  %v1553_v51 = vmax.f32 %v1537_v59, 0.0  ;;  %v3824_v47 = vpack.c.bf16 %v1552_v1, %v1551_v31  ;;  %v5052_v1 = vld [vmem:[#allocation11 + $0x48] sm:$0xff] }
 0x19c   :  { %3785 = vmatprep.subr.bf16.mxu1 %v3784_v60  ;;  %3815 = vmatpush3.bf16.msra.mxu0 %v3812_v19  ;;  %v3788_v19 = vpack.c.bf16 %v1297_v61, %v1296_v55  ;;  %v1273_v55 = vmul.f32 %v4579_v6, %v4714_v52  ;;  %v1540_v10 = vadd.f32 %v1524_v44, %v4675_v33  ;;  %v1303_v52 = vmax.f32 %v1287_v23, 0.0 }
 0x19d   :  { %3223 = vmatprep.mubr.f32.mxu1 %v4990_v24  ;;  %3817 = vmatprep.subr.bf16.mxu0 %v3816_v8  ;;  %v1554_v61 = vmax.f32 %v1538_v45, 0.0  ;;  %v1525_v37 = vmul.f32 %v4581_v0, %v4684_v43  ;;  %v3796_v26 = vpack.c.bf16 %v1301_v36, %v1300_v29  ;;  %v1527_v33 = vmul.f32 %v4581_v0, %v4874_v5  ;;  %v5045_v43 = vld [vmem:[#allocation11 + $0x40] sm:$0xff]  ;;  %v5859_v36 = vld [vmem:[#allocation31_spill] sm:$0xff] }
 0x19e   :  { %3224 = vmatmul.mubr.f32.gmra.mrb[4].mxu1 %v4996_v58  ;;  %3279 = vmatprep.mubr.f32.mxu0 %v4990_v24  ;;  %v1288_v50 = vadd.f32 %v1272_v27, %v4703_v25  ;;  %v1275_v31 = vmul.f32 %v4579_v6, %v4882_v13  ;;  %v1556_v38 = vmax.f32 %v1540_v10, 0.0  ;;  %v1542_v44 = vadd.f32 %v1526_v54, %v4727_v2  ;;  %v5075_v10 = vld [vmem:[#allocation11 + $0x58] sm:$0xff] }
 0x19f   :  { %3280 = vmatmul.mubr.f32.gmra.mrb[6].mxu0 %v4996_v58  ;;  %3787 = vmatpush3.bf16.msra.mxu1 %v3784_v60  ;;  %v1286_v60 = vadd.f32 %v1270_v41, %v4605_v18  ;;  %v3828_v59 = vpack.c.bf16 %v1554_v61, %v1553_v51  ;;  %v1555_v41 = vmax.f32 %v1539_v42, 0.0  ;;  %v1528_v29 = vmul.f32 %v4581_v0, %v4882_v13 }
 0x1a0   :  { %3789 = vmatprep.subr.bf16.mxu1 %v3788_v19  ;;  %3819 = vmatpush3.bf16.msra.mxu0 %v3816_v8  ;;  %v5031_v8 = vld [vmem:[#allocation11 + $0x38] sm:$0xff]  ;;  %v1767_v6 = vmul.f32 %v5859_v36, %v4639_v40  ;;  %v1304_v42 = vmax.f32 %v1288_v50, 0.0  ;;  %v1291_v23 = vadd.f32 %v1275_v31, %v4916_v21  ;;  %v1558_v54 = vmax.f32 %v1542_v44, 0.0 }
 0x1a1   :  { %3226 = vmatprep.mubr.f32.mxu1 %v5009_v34  ;;  %3821 = vmatprep.subr.bf16.mxu0 %v3820_v12  ;;  %v1302_v45 = vmax.f32 %v1286_v60, 0.0  ;;  %v5071_v60 = vld [vmem:[#allocation11 + $0x50] sm:$0xff]  ;;  %v3832_v27 = vpack.c.bf16 %v1556_v38, %v1555_v41  ;;  %v1768_v41 = vmul.f32 %v5859_v36, %v5847_v35 }
 0x1a2   :  { %3227 = vmatmul.mubr.f32.gmra.mrb[6].mxu1 %v5014_v11  ;;  %3282 = vmatprep.mubr.f32.mxu0 %v5009_v34  ;;  %v1307_v31 = vmax.f32 %v1291_v23, 0.0  ;;  %v5102_v23 = vld [vmem:[#allocation11 + $0x70] sm:$0xff] }
 0x1a3   :  { %3283 = vmatmul.mubr.f32.gmra.mrb[8].mxu0 %v5014_v11  ;;  %3791 = vmatpush3.bf16.msra.mxu1 %v3788_v19  ;;  %v1289_v19 = vadd.f32 %v1273_v55, %v4727_v2  ;;  %v1766_v55 = vmul.f32 %v5859_v36, %v4629_v30  ;;  %v1543_v2 = vadd.f32 %v1527_v33, %v4909_v32 }
 0x1a4   :  { %3793 = vmatprep.subr.bf16.mxu1 %v3792_v48  ;;  %3823 = vmatpush3.bf16.msra.mxu0 %v3820_v12  ;;  %v1541_v12 = vadd.f32 %v1525_v37, %v4703_v25  ;;  %v1290_v25 = vadd.f32 %v1274_v15, %v4909_v32  ;;  %v3800_v61 = vpack.c.bf16 %v1303_v52, %v1302_v45 }
 0x1a5   :  { %3229 = vmatprep.mubr.f32.mxu1 %v5025_v16  ;;  %3825 = vmatprep.subr.bf16.mxu0 %v3824_v47  ;;  %v1544_v15 = vadd.f32 %v1528_v29, %v4916_v21  ;;  %v1782_v45 = vadd.f32 %v1766_v55, %v5845_v22  ;;  %v1783_v33 = vadd.f32 %v1767_v6, %v5846_v9  ;;  %v1559_v44 = vmax.f32 %v1543_v2, 0.0 }
 0x1a6   :  { %3230 = vmatmul.mubr.f32.gmra.mrb[8].mxu1 %v5031_v8  ;;  %3285 = vmatprep.mubr.f32.mxu0 %v5025_v16  ;;  %v1557_v37 = vmax.f32 %v1541_v12, 0.0  ;;  %v5090_v12 = vld [vmem:[#allocation11 + $0x68] sm:$0xff] }
 0x1a7   :  { %3286 = vmatmul.mubr.f32.gmra.mrb[10].mxu0 %v5031_v8  ;;  %3795 = vmatpush3.bf16.msra.mxu1 %v3792_v48  ;;  %v5860_v48 = vld [vmem:[#allocation32_spill] sm:$0xff]  ;;  %v1560_v29 = vmax.f32 %v1544_v15, 0.0  ;;  %v1798_v6 = vmax.f32 %v1782_v45, 0.0 }
 0x1a8   :  { %3797 = vmatprep.subr.bf16.mxu1 %v3796_v26  ;;  %3827 = vmatpush3.bf16.msra.mxu0 %v3824_v47  ;;  %v2019_v51 = vmul.f32 %v5860_v48, %v4629_v30  ;;  %v2020_v0 = vmul.f32 %v5860_v48, %v4639_v40  ;;  %v1305_v47 = vmax.f32 %v1289_v19, 0.0  ;;  %v1306_v19 = vmax.f32 %v1290_v25, 0.0 }
 0x1a9   :  { %3232 = vmatprep.mubr.f32.mxu1 %v5045_v43  ;;  %3829 = vmatprep.subr.bf16.mxu0 %v3828_v59  ;;  %v3836_v38 = vpack.c.bf16 %v1558_v54, %v1557_v37  ;;  %v2021_v55 = vmul.f32 %v5860_v48, %v5847_v35  ;;  %v2023_v2 = vmul.f32 %v5860_v48, %v5849_v28  ;;  %v5107_v54 = vld [vmem:[#allocation11 + $0x78] sm:$0xff] }
 0x1aa   :  { %3233 = vmatmul.mubr.f32.gmra.mrb[10].mxu1 %v5052_v1  ;;  %3288 = vmatprep.mubr.f32.mxu0 %v5045_v43  ;;  %v2035_v52 = vadd.f32 %v2019_v51, %v5845_v22  ;;  %v3804_v50 = vpack.c.bf16 %v1305_v47, %v1304_v42  ;;  %v1799_v51 = vmax.f32 %v1783_v33, 0.0  ;;  %v1784_v42 = vadd.f32 %v1768_v41, %v4573_v4 }
 0x1ab   :  { %3289 = vmatmul.mubr.f32.gmra.mrb[12].mxu0 %v5052_v1  ;;  %3799 = vmatpush3.bf16.msra.mxu1 %v3796_v26  ;;  %v2036_v26 = vadd.f32 %v2020_v0, %v5846_v9  ;;  %v1770_v0 = vmul.f32 %v5859_v36, %v5849_v28  ;;  %v3808_v47 = vpack.c.bf16 %v1307_v31, %v1306_v19  ;;  %v5862_v31 = vld [vmem:[#allocation36_spill] sm:$0xff] }
 0x1ac   :  { %3801 = vmatprep.subr.bf16.mxu1 %v3800_v61  ;;  %3831 = vmatpush3.bf16.msra.mxu0 %v3828_v59  ;;  %v5087_v59 = vld [vmem:[#allocation11 + $0x60] sm:$0xff]  ;;  %v2051_v25 = vmax.f32 %v2035_v52, 0.0  ;;  %v3840_v37 = vpack.c.bf16 %v1560_v29, %v1559_v44  ;;  %v2037_v15 = vadd.f32 %v2021_v55, %v4573_v4  ;;  %v2024_v45 = vmul.f32 %v5860_v48, %v5850_v63  ;;  %v5861_v52 = vld [vmem:[#allocation35_spill] sm:$0xff]  ;;  %v5120_v44 = vld [vmem:[#allocation5 + $0x4] ss:$0 sm:$0xff] }
 0x1ad   :  { %3235 = vmatprep.mubr.f32.mxu1 %v5071_v60  ;;  %3833 = vmatprep.subr.bf16.mxu0 %v3832_v27  ;;  %v3844_v33 = vpack.c.bf16 %v1799_v51, %v1798_v6  ;;  %v1800_v41 = vmax.f32 %v1784_v42, 0.0  ;;  %v2039_v19 = vadd.f32 %v2023_v2, %v4647_v49  ;;  %v2054_v48 = vmax.f32 %v5862_v31, 0.0 }
 0x1ae   :  { %3236 = vmatmul.mubr.f32.gmra.mrb[12].mxu1 %v5075_v10  ;;  %3291 = vmatprep.mubr.f32.mxu0 %v5071_v60  ;;  %v1772_v29 = vmul.f32 %v5120_v44, %v5852_v17  ;;  %v1773_v55 = vmul.f32 %v5120_v44, %v5853_v56  ;;  %v2053_v6 = vmax.f32 %v2037_v15, 0.0  ;;  %v2040_v51 = vadd.f32 %v2024_v45, %v4655_v57 }
 0x1af   :  { %3292 = vmatmul.mubr.f32.gmra.mrb[14].mxu0 %v5075_v10  ;;  %3803 = vmatpush3.bf16.msra.mxu1 %v3800_v61  ;;  %v2052_v61 = vmax.f32 %v2036_v26, 0.0  ;;  %v1801_v26 = vmax.f32 %v5861_v52, 0.0 }
 0x1b0   :  { %3805 = vmatprep.subr.bf16.mxu1 %v3804_v50  ;;  %3835 = vmatpush3.bf16.msra.mxu0 %v3832_v27  ;;  %v1771_v27 = vmul.f32 %v5859_v36, %v5850_v63  ;;  %v1788_v15 = vadd.f32 %v1772_v29, %v4577_v39  ;;  %v1789_v45 = vadd.f32 %v1773_v55, %v5857_v3  ;;  %v2056_v52 = vmax.f32 %v2040_v51, 0.0 }
 0x1b1   :  { %3238 = vmatprep.mubr.f32.mxu1 %v5087_v59  ;;  %3837 = vmatprep.subr.bf16.mxu0 %v3836_v38  ;;  %v3876_v36 = vpack.c.bf16 %v2052_v61, %v2051_v25  ;;  %v3848_v42 = vpack.c.bf16 %v1801_v26, %v1800_v41 }
 0x1b2   :  { %3239 = vmatmul.mubr.f32.gmra.mrb[14].mxu1 %v5090_v12  ;;  %3294 = vmatprep.mubr.f32.mxu0 %v5087_v59 }
 0x1b3   :  { %3295 = vmatmul.mubr.f32.gmra.mrb[16].mxu0 %v5090_v12  ;;  %3807 = vmatpush3.bf16.msra.mxu1 %v3804_v50  ;;  %v1786_v50 = vadd.f32 %v1770_v0, %v4647_v49  ;;  %v5128_v0 = vld [vmem:[#allocation5 + $0x5] ss:$0 sm:$0xff] }
 0x1b4   :  { %3809 = vmatprep.subr.bf16.mxu1 %v3808_v47  ;;  %3839 = vmatpush3.bf16.msra.mxu0 %v3836_v38  ;;  %v1787_v38 = vadd.f32 %v1771_v27, %v4655_v57  ;;  %v2025_v25 = vmul.f32 %v5128_v0, %v5852_v17  ;;  %v2026_v61 = vmul.f32 %v5128_v0, %v5853_v56  ;;  %v2055_v27 = vmax.f32 %v2039_v19, 0.0 }
 0x1b5   :  { %3241 = vmatprep.mubr.f32.mxu1 %v5102_v23  ;;  %3841 = vmatprep.subr.bf16.mxu0 %v3840_v37  ;;  %v1802_v2 = vmax.f32 %v1786_v50, 0.0  ;;  %v1804_v50 = vmax.f32 %v1788_v15, 0.0  ;;  %v1805_v19 = vmax.f32 %v1789_v45, 0.0  ;;  %v5864_v45 = vld [vmem:[#allocation48_spill] sm:$0xff] }
 0x1b6   :  { %3242 = vmatmul.mubr.f32.gmra.mrb[16].mxu1 %v5107_v54  ;;  %3297 = vmatprep.mubr.f32.mxu0 %v5102_v23  ;;  %v2041_v31 = vadd.f32 %v2025_v25, %v4577_v39  ;;  %v2042_v26 = vadd.f32 %v2026_v61, %v5857_v3 }
 0x1b7   :  { %3298 = vmatmul.mubr.f32.gmra.mrb[18].mxu0 %v5107_v54  ;;  %3811 = vmatpush3.bf16.msra.mxu1 %v3808_v47  ;;  %v1803_v47 = vmax.f32 %v1787_v38, 0.0  ;;  %v3856_v55 = vpack.c.bf16 %v1805_v19, %v1804_v50  ;;  %v5866_v19 = vld [vmem:[#allocation47_spill] sm:$0xff] }
 0x1b8   :  { %3843 = vmatpush3.bf16.msra.mxu0 %v3840_v37  ;;  %3845 = vmatprep.subr.bf16.mxu1 %v3844_v33  ;;  %v3880_v37 = vpack.c.bf16 %v2054_v48, %v2053_v6  ;;  %v3884_v48 = vpack.c.bf16 %v2056_v52, %v2055_v27  ;;  %v2057_v38 = vmax.f32 %v2041_v31, 0.0  ;;  %v2058_v29 = vmax.f32 %v2042_v26, 0.0  ;;  %v5865_v26 = vld [vmem:[#allocation45_spill] sm:$0xff] }
 0x1b9   :  { %3332 = vmatprep.mubr.f32.mxu1 %v4832_v62  ;;  %3877 = vmatprep.subr.bf16.mxu0 %v3876_v36  ;;  %v3852_v41 = vpack.c.bf16 %v1803_v47, %v1802_v2  ;;  %v1780_v47 = vmul.f32 %v5120_v44, %v4874_v5  ;;  %v1781_v27 = vmul.f32 %v5120_v44, %v4882_v13 }
 0x1ba   :  { %3333 = vmatmul.mubr.f32.vlgmr.msra.gmra.mrb[18].mxu1 %v4975_v53  ;;  %3388 = vmatprep.mubr.f32.mxu0 %v4832_v62  ;;  %v3888_v51 = vpack.c.bf16 %v2058_v29, %v2057_v38  ;;  %v2033_v52 = vmul.f32 %v5128_v0, %v4874_v5  ;;  %v2034_v31 = vmul.f32 %v5128_v0, %v4882_v13 }
 0x1bb   :  { %3389 = vmatmul.mubr.f32.vlgmr.msra.gmra.mrb[20].mxu0 %v4975_v53  ;;  %3847 = vmatpush3.bf16.msra.mxu1 %v3844_v33  ;;  %v1776_v33 = vmul.f32 %v5120_v44, %v4701_v46  ;;  %v1796_v29 = vadd.f32 %v1780_v47, %v4909_v32 }
 0x1bc   :  { %3849 = vmatprep.subr.bf16.mxu1 %v3848_v42  ;;  %3879 = vmatpush3.bf16.msra.mxu0 %v3876_v36  ;;  %v2029_v36 = vmul.f32 %v5128_v0, %v4701_v46 }
 0x1bd   :  { %3335 = vmatprep.mubr.f32.mxu1 %v4990_v24  ;;  %3881 = vmatprep.subr.bf16.mxu0 %v3880_v37  ;;  %v1792_v6 = vadd.f32 %v1776_v33, %v4605_v18  ;;  %v5179_v33 = vld [vmem:[#allocation5 + $0x7] ss:$0 sm:$0xff] }
 0x1be   :  { %3336 = vmatmul.mubr.f32.gmra.mrb[20].mxu1 %v4996_v58  ;;  %3391 = vmatprep.mubr.f32.mxu0 %v4990_v24  ;;  %v2045_v25 = vadd.f32 %v2029_v36, %v4605_v18  ;;  %v2525_v0 = vmul.f32 %v5179_v33, %v4629_v30  ;;  %v1797_v36 = vadd.f32 %v1781_v27, %v4916_v21 }
 0x1bf   :  { %3392 = vmatmul.mubr.f32.gmra.mrb[22].mxu0 %v4996_v58  ;;  %3851 = vmatpush3.bf16.msra.mxu1 %v3848_v42  ;;  %v1808_v61 = vmax.f32 %v1792_v6, 0.0  ;;  %v5863_v42 = vld [vmem:[#allocation46_spill] sm:$0xff]  ;;  %v2049_v6 = vadd.f32 %v2033_v52, %v4909_v32  ;;  %v2527_v27 = vmul.f32 %v5179_v33, %v5847_v35 }
 0x1c0   :  { %3853 = vmatprep.subr.bf16.mxu1 %v3852_v41  ;;  %3883 = vmatpush3.bf16.msra.mxu0 %v3880_v37  ;;  %v1809_v2 = vmax.f32 %v5863_v42, 0.0  ;;  %v2061_v15 = vmax.f32 %v2045_v25, 0.0  ;;  %v2062_v37 = vmax.f32 %v5864_v45, 0.0  ;;  %v2541_v25 = vadd.f32 %v2525_v0, %v5845_v22 }
 0x1c1   :  { %3338 = vmatprep.mubr.f32.mxu1 %v5009_v34  ;;  %3885 = vmatprep.subr.bf16.mxu0 %v3884_v48  ;;  %v1813_v47 = vmax.f32 %v1797_v36, 0.0  ;;  %v2543_v0 = vadd.f32 %v2527_v27, %v4573_v4  ;;  %v5869_v36 = vld [vmem:[#allocation37_spill] sm:$0xff]  ;;  %v2531_v27 = vmul.f32 %v5179_v33, %v5852_v17 }
 0x1c2   :  { %3339 = vmatmul.mubr.f32.gmra.mrb[22].mxu1 %v5014_v11  ;;  %3394 = vmatprep.mubr.f32.mxu0 %v5009_v34  ;;  %v3864_v38 = vpack.c.bf16 %v1809_v2, %v1808_v61  ;;  %v1812_v2 = vmax.f32 %v1796_v29, 0.0  ;;  %v2530_v29 = vmul.f32 %v5179_v33, %v5850_v63 }
 0x1c3   :  { %3395 = vmatmul.mubr.f32.gmra.mrb[24].mxu0 %v5014_v11  ;;  %3855 = vmatpush3.bf16.msra.mxu1 %v3852_v41  ;;  %v5171_v41 = vld [vmem:[#allocation5 + $0x6] ss:$0 sm:$0xff] }
 0x1c4   :  { %3857 = vmatprep.subr.bf16.mxu1 %v3856_v55  ;;  %3887 = vmatpush3.bf16.msra.mxu0 %v3884_v48  ;;  %v2272_v44 = vmul.f32 %v5171_v41, %v4629_v30  ;;  %v2273_v50 = vmul.f32 %v5171_v41, %v4639_v40  ;;  %v2526_v48 = vmul.f32 %v5179_v33, %v4639_v40 }
 0x1c5   :  { %3341 = vmatprep.mubr.f32.mxu1 %v5025_v16  ;;  %3889 = vmatprep.subr.bf16.mxu0 %v3888_v51  ;;  %v2050_v30 = vadd.f32 %v2034_v31, %v4916_v21  ;;  %v2274_v42 = vmul.f32 %v5171_v41, %v5847_v35  ;;  %v2276_v52 = vmul.f32 %v5171_v41, %v5849_v28  ;;  %v5868_v31 = vld [vmem:[#allocation50_spill] sm:$0xff] }
 0x1c6   :  { %3342 = vmatmul.mubr.f32.gmra.mrb[24].mxu1 %v5031_v8  ;;  %3397 = vmatprep.mubr.f32.mxu0 %v5025_v16  ;;  %v2288_v40 = vadd.f32 %v2272_v44, %v5845_v22  ;;  %v2542_v61 = vadd.f32 %v2526_v48, %v5846_v9  ;;  %v5867_v22 = vld [vmem:[#allocation49_spill] sm:$0xff]  ;;  %v2529_v48 = vmul.f32 %v5179_v33, %v5849_v28 }
 0x1c7   :  { %3398 = vmatmul.mubr.f32.gmra.mrb[26].mxu0 %v5031_v8  ;;  %3859 = vmatpush3.bf16.msra.mxu1 %v3856_v55  ;;  %v3896_v55 = vpack.c.bf16 %v2062_v37, %v2061_v15  ;;  %v2065_v15 = vmax.f32 %v2049_v6, 0.0  ;;  %v2066_v45 = vmax.f32 %v2050_v30, 0.0  ;;  %v2290_v35 = vadd.f32 %v2274_v42, %v4573_v4  ;;  %v5870_v6 = vld [vmem:[#allocation38_spill] sm:$0xff] }
 0x1c8   :  { %3861 = vmatprep.subr.bf16.mxu1 %v5865_v26  ;;  %3891 = vmatpush3.bf16.msra.mxu0 %v3888_v51  ;;  %v2289_v51 = vadd.f32 %v2273_v50, %v5846_v9  ;;  %v2304_v9 = vmax.f32 %v2288_v40, 0.0  ;;  %v2558_v44 = vmax.f32 %v2542_v61, 0.0  ;;  %v2277_v50 = vmul.f32 %v5171_v41, %v5850_v63 }
 0x1c9   :  { %3344 = vmatprep.mubr.f32.mxu1 %v5045_v43  ;;  %3893 = vmatprep.subr.bf16.mxu0 %v5866_v19  ;;  %v2560_v30 = vmax.f32 %v5870_v6, 0.0  ;;  %v2292_v4 = vadd.f32 %v2276_v52, %v4647_v49  ;;  %v2559_v63 = vmax.f32 %v2543_v0, 0.0  ;;  %v2545_v61 = vadd.f32 %v2529_v48, %v4647_v49 }
 0x1ca   :  { %3345 = vmatmul.mubr.f32.gmra.mrb[26].mxu1 %v5052_v1  ;;  %3400 = vmatprep.mubr.f32.mxu0 %v5045_v43  ;;  %v2305_v37 = vmax.f32 %v2289_v51, 0.0  ;;  %v2306_v51 = vmax.f32 %v2290_v35, 0.0  ;;  %v2278_v42 = vmul.f32 %v5171_v41, %v5852_v17  ;;  %v2547_v52 = vadd.f32 %v2531_v27, %v4577_v39  ;;  %v4043_v27 = vld [vmem:[#allocation13 + $0x68] sm:$0xff] }
 0x1cb   :  { %3401 = vmatmul.mubr.f32.gmra.mrb[28].mxu0 %v5052_v1  ;;  %3863 = vmatpush3.bf16.msra.mxu1 %v5865_v26  ;;  %v2557_v26 = vmax.f32 %v2541_v25, 0.0  ;;  %v2293_v25 = vadd.f32 %v2277_v50, %v4655_v57  ;;  %v2282_v35 = vmul.f32 %v5171_v41, %v4701_v46 }
 0x1cc   :  { %3865 = vmatprep.subr.bf16.mxu1 %v3864_v38  ;;  %3895 = vmatpush3.bf16.msra.mxu0 %v5866_v19  ;;  %v3872_v19 = vpack.c.bf16 %v1813_v47, %v1812_v2  ;;  %v3908_v28 = vpack.c.bf16 %v2305_v37, %v2304_v9  ;;  %v2279_v2 = vmul.f32 %v5171_v41, %v5853_v56 }
 0x1cd   :  { %3347 = vmatprep.mubr.f32.mxu1 %v5071_v60  ;;  %3897 = vmatprep.subr.bf16.mxu0 %v3896_v55  ;;  %v5228_v40 = vpack.c.bf16 %v2558_v44, %v2557_v26  ;;  %v2546_v47 = vadd.f32 %v2530_v29, %v4655_v57  ;;  %v2309_v57 = vmax.f32 %v2293_v25, 0.0  ;;  %v2294_v17 = vadd.f32 %v2278_v42, %v4577_v39 }
 0x1ce   :  { %3348 = vmatmul.mubr.f32.gmra.mrb[28].mxu1 %v5075_v10  ;;  %3403 = vmatprep.mubr.f32.mxu0 %v5071_v60  ;;  %v2295_v9 = vadd.f32 %v2279_v2, %v5857_v3  ;;  %v2298_v48 = vadd.f32 %v2282_v35, %v4605_v18 }
 0x1cf   :  { %3404 = vmatmul.mubr.f32.gmra.mrb[30].mxu0 %v5075_v10  ;;  %3867 = vmatpush3.bf16.msra.mxu1 %v3864_v38  ;;  %v3904_v38 = vpack.c.bf16 %v2066_v45, %v2065_v15  ;;  %v2532_v15 = vmul.f32 %v5179_v33, %v5853_v56  ;;  %v2308_v45 = vmax.f32 %v2292_v4, 0.0  ;;  %v2561_v56 = vmax.f32 %v2545_v61, 0.0  ;;  %v5872_v61 = vld [vmem:[#allocation52_spill] sm:$0xff] }
 0x1d0   :  { %3869 = vmatprep.subr.bf16.mxu1 %v5867_v22  ;;  %3899 = vmatpush3.bf16.msra.mxu0 %v3896_v55  ;;  %v2307_v55 = vmax.f32 %v5869_v36, 0.0  ;;  %v2562_v37 = vmax.f32 %v2546_v47, 0.0  ;;  %v2310_v26 = vmax.f32 %v2294_v17, 0.0  ;;  %v2311_v44 = vmax.f32 %v2295_v9, 0.0  ;;  %v4042_v47 = vld [vmem:[#allocation11] sm:$0xff] }
 0x1d1   :  { %3350 = vmatprep.mubr.f32.mxu1 %v5087_v59  ;;  %3901 = vmatprep.subr.bf16.mxu0 %v5868_v31  ;;  %v2314_v29 = vmax.f32 %v2298_v48, 0.0  ;;  %v2315_v36 = vmax.f32 %v4842_v7, 0.0  ;;  %v2539_v4 = vmul.f32 %v5179_v33, %v4874_v5  ;;  %v5871_v7 = vld [vmem:[#allocation51_spill] sm:$0xff] }
 0x1d2   :  { %3351 = vmatmul.mubr.f32.gmra.mrb[30].mxu1 %v5090_v12  ;;  %3406 = vmatprep.mubr.f32.mxu0 %v5087_v59  ;;  %v3912_v49 = vpack.c.bf16 %v2307_v55, %v2306_v51  ;;  %v5263_v39 = vpack.c.bf16 %v2562_v37, %v2561_v56  ;;  %v3920_v0 = vpack.c.bf16 %v2311_v44, %v2310_v26 }
 0x1d3   :  { %3407 = vmatmul.mubr.f32.gmra.mrb[32].mxu0 %v5090_v12  ;;  %3871 = vmatpush3.bf16.msra.mxu1 %v5867_v22  ;;  %v5248_v22 = vpack.c.bf16 %v2560_v30, %v2559_v63  ;;  %v2286_v55 = vmul.f32 %v5171_v41, %v4874_v5  ;;  %v2568_v30 = vmax.f32 %v4852_v20, 0.0 }
 0x1d4   :  { %3873 = vmatprep.subr.bf16.mxu1 %v3872_v19  ;;  %3903 = vmatpush3.bf16.msra.mxu0 %v5868_v31  ;;  %v2548_v31 = vadd.f32 %v2532_v15, %v5857_v3  ;;  %v2563_v3 = vmax.f32 %v2547_v52, 0.0  ;;  %v5874_v15 = vmov 3  }
 0x1d5   :  { %3353 = vmatprep.mubr.f32.mxu1 %v5102_v23  ;;  %3905 = vmatprep.subr.bf16.mxu0 %v3904_v38  ;;  %v2302_v20 = vadd.f32 %v2286_v55, %v4909_v32 }
 0x1d6   :  { %3354 = vmatmul.mubr.f32.gmra.mrb[32].mxu1 %v5107_v54  ;;  %3409 = vmatprep.mubr.f32.mxu0 %v5102_v23  ;;  %v2564_v50 = vmax.f32 %v2548_v31, 0.0 }
 0x1d7   :  { %3410 = vmatmul.mubr.f32.gmra.mrb[34].mxu0 %v5107_v54  ;;  %3875 = vmatpush3.bf16.msra.mxu1 %v3872_v19  ;;  %v2535_v19 = vmul.f32 %v5179_v33, %v4701_v46  ;;  %v2318_v25 = vmax.f32 %v2302_v20, 0.0 }
 0x1d8   :  { %3907 = vmatpush3.bf16.msra.mxu0 %v3904_v38  ;;  %3909 = vmatprep.subr.bf16.mxu1 %v3908_v28  ;;  %v5274_v38 = vpack.c.bf16 %v2564_v50, %v2563_v3 }
 0x1d9   :  { %3444 = vmatprep.mubr.f32.mxu1 %v4832_v62  ;;  %3941 = vmatprep.subr.bf16.mxu0 %v5228_v40  ;;  %v2551_v46 = vadd.f32 %v2535_v19, %v4605_v18  ;;  %v2287_v18 = vmul.f32 %v5171_v41, %v4882_v13  ;;  %v3928_v41 = vpack.c.bf16 %v2315_v36, %v2314_v29 }
 0x1da   :  { %3445 = vmatmul.mubr.f32.vlgmr.msra.gmra.mrb[34].mxu1 %v4975_v53  ;;  %3500 = vmatprep.mubr.f32.mxu0 %v4832_v62  ;;  %v3916_v62 = vpack.c.bf16 %v2309_v57, %v2308_v45 }
 0x1db   :  { %3501 = vmatmul.mubr.f32.vlgmr.msra.gmra.mrb[36].mxu0 %v4975_v53  ;;  %3911 = vmatpush3.bf16.msra.mxu1 %v3908_v28  ;;  %v2567_v6 = vmax.f32 %v2551_v46, 0.0  ;;  %v2540_v28 = vmul.f32 %v5179_v33, %v4882_v13  ;;  %v2303_v5 = vadd.f32 %v2287_v18, %v4916_v21  ;;  %v2555_v33 = vadd.f32 %v2539_v4, %v4909_v32 }
 0x1dc   :  { %3913 = vmatprep.subr.bf16.mxu1 %v3912_v49  ;;  %3943 = vmatpush3.bf16.msra.mxu0 %v5228_v40 }
 0x1dd   :  { %3447 = vmatprep.mubr.f32.mxu1 %v4990_v24  ;;  %3945 = vmatprep.subr.bf16.mxu0 %v5248_v22  ;;  %v5303_v13 = vpack.c.bf16 %v2568_v30, %v2567_v6  ;;  %v2556_v51 = vadd.f32 %v2540_v28, %v4916_v21  ;;  %v2319_v63 = vmax.f32 %v2303_v5, 0.0  ;;  %v5873_v21 = vld [vmem:[#allocation53_spill] sm:$0xff] }
 0x1de   :  { %3448 = vmatmul.mubr.f32.gmra.mrb[36].mxu1 %v4996_v58  ;;  %3503 = vmatprep.mubr.f32.mxu0 %v4990_v24 }
 0x1df   :  { %3504 = vmatmul.mubr.f32.gmra.mrb[38].mxu0 %v4996_v58  ;;  %3915 = vmatpush3.bf16.msra.mxu1 %v3912_v49  ;;  %v2572_v32 = vmax.f32 %v2556_v51, 0.0  ;;  %v3936_v42 = vpack.c.bf16 %v2319_v63, %v2318_v25  ;;  %v4044_v49 = vld [vmem:[#allocation13 + $0x78] sm:$0xff] }
 0x1e0   :  { %3917 = vmatprep.subr.bf16.mxu1 %v3916_v62  ;;  %3947 = vmatpush3.bf16.msra.mxu0 %v5248_v22 }
 0x1e1   :  { %3450 = vmatprep.mubr.f32.mxu1 %v5009_v34  ;;  %3949 = vmatprep.subr.bf16.mxu0 %v5263_v39 }
 0x1e2   :  { %3451 = vmatmul.mubr.f32.gmra.mrb[38].mxu1 %v5014_v11  ;;  %3506 = vmatprep.mubr.f32.mxu0 %v5009_v34 }
 0x1e3   :  { %3507 = vmatmul.mubr.f32.gmra.mrb[40].mxu0 %v5014_v11  ;;  %3919 = vmatpush3.bf16.msra.mxu1 %v3916_v62 }
 0x1e4   :  { %3921 = vmatprep.subr.bf16.mxu1 %v3920_v0  ;;  %3951 = vmatpush3.bf16.msra.mxu0 %v5263_v39 }
 0x1e5   :  { %3453 = vmatprep.mubr.f32.mxu1 %v5025_v16  ;;  %3953 = vmatprep.subr.bf16.mxu0 %v5274_v38 }
 0x1e6   :  { %3454 = vmatmul.mubr.f32.gmra.mrb[40].mxu1 %v5031_v8  ;;  %3509 = vmatprep.mubr.f32.mxu0 %v5025_v16 }
 0x1e7   :  { %3510 = vmatmul.mubr.f32.gmra.mrb[42].mxu0 %v5031_v8  ;;  %3923 = vmatpush3.bf16.msra.mxu1 %v3920_v0 }
 0x1e8   :  { %3925 = vmatprep.subr.bf16.mxu1 %v4827_v14  ;;  %3955 = vmatpush3.bf16.msra.mxu0 %v5274_v38 }
 0x1e9   :  { %3456 = vmatprep.mubr.f32.mxu1 %v5045_v43  ;;  %3957 = vmatprep.subr.bf16.mxu0 %v5871_v7 }
 0x1ea   :  { %3457 = vmatmul.mubr.f32.gmra.mrb[42].mxu1 %v5052_v1  ;;  %3512 = vmatprep.mubr.f32.mxu0 %v5045_v43 }
 0x1eb   :  { %3513 = vmatmul.mubr.f32.gmra.mrb[44].mxu0 %v5052_v1  ;;  %3927 = vmatpush3.bf16.msra.mxu1 %v4827_v14  ;;  %v2571_v14 = vmax.f32 %v2555_v33, 0.0 }
 0x1ec   :  { %3929 = vmatprep.subr.bf16.mxu1 %v3928_v41  ;;  %3959 = vmatpush3.bf16.msra.mxu0 %v5871_v7 }
 0x1ed   :  { %3459 = vmatprep.mubr.f32.mxu1 %v5071_v60  ;;  %3961 = vmatprep.subr.bf16.mxu0 %v5303_v13  ;;  %v3968_v2 = vpack.c.bf16 %v2572_v32, %v2571_v14 }
 0x1ee   :  { %3460 = vmatmul.mubr.f32.gmra.mrb[44].mxu1 %v5075_v10  ;;  %3515 = vmatprep.mubr.f32.mxu0 %v5071_v60 }
 0x1ef   :  { %3516 = vmatmul.mubr.f32.gmra.mrb[46].mxu0 %v5075_v10  ;;  %3931 = vmatpush3.bf16.msra.mxu1 %v3928_v41 }
 0x1f0   :  { %3933 = vmatprep.subr.bf16.mxu1 %v5872_v61  ;;  %3963 = vmatpush3.bf16.msra.mxu0 %v5303_v13 }
 0x1f1   :  { %3462 = vmatprep.mubr.f32.mxu1 %v5087_v59  ;;  %3965 = vmatprep.subr.bf16.mxu0 %v5873_v21 }
 0x1f2   :  { %3463 = vmatmul.mubr.f32.gmra.mrb[46].mxu1 %v5090_v12  ;;  %3518 = vmatprep.mubr.f32.mxu0 %v5087_v59 }
 0x1f3   :  { %3519 = vmatmul.mubr.f32.gmra.mrb[48].mxu0 %v5090_v12  ;;  %3935 = vmatpush3.bf16.msra.mxu1 %v5872_v61 }
 0x1f4   :  { %3937 = vmatprep.subr.bf16.mxu1 %v3936_v42  ;;  %3967 = vmatpush3.bf16.msra.mxu0 %v5873_v21 }
 0x1f5   :  { %3465 = vmatprep.mubr.f32.mxu1 %v5102_v23  ;;  %3969 = vmatprep.subr.bf16.mxu0 %v3968_v2 }
 0x1f6   :  { %3466 = vmatmul.mubr.f32.gmra.mrb[48].mxu1 %v5107_v54  ;;  %3521 = vmatprep.mubr.f32.mxu0 %v5102_v23 }
 0x1f7   :  { %3522 = vmatmul.mubr.f32.gmra.mrb[50].mxu0 %v5107_v54  ;;  %3939 = vmatpush3.bf16.msra.mxu1 %v3936_v42 }
 0x1f8   :  { %3972 = vmatprep.subr.bf16.mxu1 %v5228_v40  ;;  %3971 = vmatpush3.bf16.msra.mxu0 %v3968_v2 }
 0x1f9   :  { %3556 = vmatprep.mubr.f32.mxu1 %v4042_v47  ;;  %3612 = vmatprep.mubr.f32.mxu0 %v4042_v47 }
 0x1fa   :  { %3557 = vmatmul.mubr.f32.vlgmr.msra.gmra.mrb[50].mxu1 %v4975_v53  ;;  %947 = vperm.xlu0 %4031, %v4043_v27  }
 0x1fb   :  { %3980 = vmatpush3.bf16.msra.mxu1 %v5228_v40  ;;  %3613 = vmatmul.mubr.f32.vlgmr.msra.gmra.mrb[52].mxu0 %v4975_v53  ;;  %v4045_v53 = vld [vmem:[#allocation13 + $0x70] sm:$0xff]  ;;  %v455_v40 = vld [vmem:[#allocation13] sm:$0x1] }
 0x1fc   :  { %3973 = vmatprep.subr.bf16.mxu1 %v5248_v22  ;;  %3559 = vmatprep.mubr.f32.mxu1 %v4990_v24 }
 0x1fd   :  { %3615 = vmatprep.mubr.f32.mxu0 %v4990_v24  ;;  %4033 = vset.pattern.permute.xlu1 %v5874_v15  ;;  %v4296_v24 = vmov 4  }
 0x1fe   :  { %3560 = vmatmul.mubr.f32.gmra.mrb[52].mxu1 %v4996_v58  ;;  %955 = vperm.xlu0 %4031, %v4044_v49  }
 0x1ff   :  { %3981 = vmatpush3.bf16.msra.mxu1 %v5248_v22  ;;  %3616 = vmatmul.mubr.f32.gmra.mrb[54].mxu0 %v4996_v58  ;;  %v5371_v58 = vpop.permute.xlu1 %670 }
 0x200   :  { %3974 = vmatprep.subr.bf16.mxu1 %v5263_v39  ;;  %3562 = vmatprep.mubr.f32.mxu1 %v5009_v34 }
 0x201   :  { %3618 = vmatprep.mubr.f32.mxu0 %v5009_v34  ;;  %951 = vperm.xlu1 %4033, %v4045_v53  }
 0x202   :  { %3563 = vmatmul.mubr.f32.gmra.mrb[54].mxu1 %v5014_v11  ;;  %4035 = vset.pattern.permute.xlu0 %v4296_v24 }
 0x203   :  { %3982 = vmatpush3.bf16.msra.mxu1 %v5263_v39  ;;  %3619 = vmatmul.mubr.f32.gmra.mrb[56].mxu0 %v5014_v11  ;;  %v5373_v34 = vpop.permute.xlu1 %678 }
 0x204   :  { %3975 = vmatprep.subr.bf16.mxu1 %v5274_v38  ;;  %3565 = vmatprep.mubr.f32.mxu1 %v5025_v16  ;;  %5875 = vst [vmem:[#allocation26_spill] sm:$0xff] %v5373_v34 }
 0x205   :  { %3621 = vmatprep.mubr.f32.mxu0 %v5025_v16  ;;  %4034 = vset.pattern.permute.xlu1 %v4296_v24  ;;  %v5377_v16 = vpop.permute.xlu0 %674 }
 0x206   :  { %3566 = vmatmul.mubr.f32.gmra.mrb[56].mxu1 %v5031_v8  ;;  %997 = vperm.xlu1 %4034, %v455_v40  }
 0x207   :  { %3983 = vmatpush3.bf16.msra.mxu1 %v5274_v38  ;;  %3622 = vmatmul.mubr.f32.gmra.mrb[58].mxu0 %v5031_v8  ;;  %v5375_v11 = vpop.permute.xlu1 %682 }
 0x208   :  { %3976 = vmatprep.subr.bf16.mxu1 %v5871_v7  ;;  %3568 = vmatprep.mubr.f32.mxu1 %v5045_v43 }
 0x20a   :  { %3569 = vmatmul.mubr.f32.gmra.mrb[58].mxu1 %v5052_v1 }
 0x20b   :  { %3984 = vmatpush3.bf16.msra.mxu1 %v5871_v7  ;;  %3571 = vmatprep.mubr.f32.mxu1 %v5071_v60  ;;  %v5379_v8 = vpop.permute.xlu1 %895 }
 0x20c   :  { %3977 = vmatprep.subr.bf16.mxu1 %v5303_v13 }
 0x20e   :  { %3572 = vmatmul.mubr.f32.gmra.mrb[60].mxu1 %v5075_v10 }
 0x20f   :  { %3985 = vmatpush3.bf16.msra.mxu1 %v5303_v13  ;;  %3574 = vmatprep.mubr.f32.mxu1 %v5087_v59 }
 0x210   :  { %3978 = vmatprep.subr.bf16.mxu1 %v5873_v21 }
 0x212   :  { %3575 = vmatmul.mubr.f32.gmra.mrb[62].mxu1 %v5090_v12 }
 0x213   :  { %3986 = vmatpush3.bf16.msra.mxu1 %v5873_v21  ;;  %3577 = vmatprep.mubr.f32.mxu1 %v5102_v23 }
 0x214   :  { %3979 = vmatprep.subr.bf16.mxu1 %v3968_v2 }
 0x216   :  { %3578 = vmatmul.mubr.f32.gmra.mrb[64].mxu1 %v5107_v54 }
 0x217   :  { %3987 = vmatpush3.bf16.msra.mxu1 %v3968_v2  ;;  %3624 = vmatprep.mubr.f32.mxu1 %v5045_v43  ;;  %v5381_v43 = vpop.permute.xlu0 %686 }
 0x218   :  { %5876 = vst [vmem:[#allocation29_spill] sm:$0xff] %v5381_v43 }
 0x21a   :  { %3625 = vmatmul.mubr.f32.vlgmr.msra.gmra.mrb[66].mxu1 %v5052_v1  ;;  %v5383_v1 = vpop.permute.xlu1 %903 }
 0x21b   :  { %3627 = vmatprep.mubr.f32.mxu1 %v5071_v60  ;;  %v5385_v60 = vpop.permute.xlu0 %899 }
 0x21c   :  { %5877 = vst [vmem:[#allocation30_spill] sm:$0xff] %v5385_v60 }
 0x21e   :  { %3628 = vmatmul.mubr.f32.gmra.mrb[68].mxu1 %v5075_v10  ;;  %v5387_v10 = vpop.permute.xlu1 %690 }
 0x21f   :  { %3630 = vmatprep.mubr.f32.mxu1 %v5087_v59  ;;  %5878 = vst [vmem:[#allocation42_spill] sm:$0xff] %v5387_v10  ;;  %v5389_v59 = vpop.permute.xlu0 %907 }
 0x222   :  { %3631 = vmatmul.mubr.f32.gmra.mrb[70].mxu1 %v5090_v12  ;;  %v2818_v12 = vld [vmem:[%s5761_s5] ss:$0 sm:$0xff]  ;;  %v5397_v45 = vpop.permute.xlu1 %694  ;;  %s4297_s5 = smov [#allocation15]  }
 0x223   :  { %3633 = vmatprep.mubr.f32.mxu1 %v5102_v23  ;;  %v2819_v23 = vld [vmem:[%s5763_s7] ss:$0 sm:$0xff]  ;;  %v5399_v37 = vpop.permute.xlu0 %911  ;;  %s2789_s7 = sshll.u32 %s4297_s5, 4  ;;  %s2790_s7 = int_to_ptr.vmem [resolvable:$true] %s2789_s7 }
 0x224   :  { %s4200_s17 = scalar_lea.vmem %s2790_s7, 128  ;;  %p4205_p1 = scmp.lt.s32.totalorder %s2790_s7, %s2790_s7 }
 0x225   :  { %p4201_p0 = scmp.ne.s32.totalorder %s2790_s7, %s4200_s17  ;;  %p4206_p2 = scmp.lt.s32.totalorder %s4200_s17, %s4200_s17 }
 0x226   :  { %3634 = vmatmul.mubr.f32.gmra.mrb[72].mxu1 %v5107_v54  ;;  %v5401_v31 = vpop.permute.xlu1 %698 }
 0x227   :  { %v5403_v62 = vpop.permute.xlu0 %915  ;;  %p4207_p3 = por %p4206_p2, %p4205_p1 }
 0x229   :  { %p4208_p4 = pnand %p4207_p3, %p4201_p0 }
 0x22a   :  { %v5405_v26 = vpop.permute.xlu1 %702 }
 0x22b   :  { %v5407_v44 = vpop.permute.xlu0 %919 }
 0x22e   :  { %v5409_v39 = vpop.permute.xlu1 %706 }
 0x22f   :  { %v5411_v3 = vpop.permute.xlu0 %923 }
 0x232   :  { %v5413_v50 = vpop.permute.xlu1 %710 }
 0x233   :  { %v5415_v19 = vpop.permute.xlu0 %927 }
 0x236   :  { %v5417_v0 = vpop.permute.xlu1 %714 }
 0x237   :  { %v5419_v38 = vpop.permute.xlu0 %931 }
 0x23a   :  { %v5425_v20 = vpop.permute.xlu1 %718 }
 0x23b   :  { %v5433_v42 = vpop.permute.xlu0 %935 }
 0x24d   :  { %v338_v54 = vpop.f32.mrb[0].mxu1 }
 0x24e   :  { %v339_v22 = vadd.f32 %v2818_v12, %v338_v54  ;;  %v3152_v57 = vpop.f32.mrb[1].mxu1  ;;  %v432_v17 = vpop.f32.mrb[2].mxu0 }
 0x24f   :  { %v433_v9 = vadd.f32 %v2819_v23, %v432_v17  ;;  %v3187_v56 = vpop.f32.mrb[3].mxu0 }
 0x250   :  { %342 = vst [vmem:[#allocation14] sm:$0xff] %v339_v22 }
 0x251   :  { %v436_v52 = vmul.f32 1.442695, %v433_v9 }
 0x253   :  { %4036 = vpow2.f32 %v436_v52  ;;  %v5441_v52 = vpop.permute.xlu1 %722 }
 0x25d   :  { %v4037_v35 = vpop.eup %4036 }
 0x25e   :  { %438 = vst [vmem:[#allocation15] sm:$0xff] %v4037_v35 }
 0x26d   :  { %v3222_v48 = vpop.f32.mrb[2].mxu1 }
 0x26e   :  { %v805_v46 = vadd.f32 %v3222_v48, %v5377_v16  ;;  %v799_v29 = vpop.f32.mrb[3].mxu1  ;;  %v3278_v36 = vpop.f32.mrb[4].mxu0 }
 0x26f   :  { %v800_v55 = vadd.f32 %v799_v29, %v5371_v58  ;;  %v1127_v18 = vadd.f32 %v3278_v36, %v5377_v16  ;;  %v1121_v6 = vpop.f32.mrb[5].mxu0 }
 0x270   :  { %v879_v30 = vmax.f32 %v805_v46, 0.0  ;;  %v1122_v4 = vadd.f32 %v1121_v6, %v5371_v58 }
 0x271   :  { %v878_v28 = vmax.f32 %v800_v55, 0.0  ;;  %v3225_v7 = vpop.f32.mrb[4].mxu1  ;;  %v1201_v41 = vmax.f32 %v1127_v18, 0.0 }
 0x272   :  { %v959_v5 = vmul.f32 %v5385_v60, %v879_v30  ;;  %v815_v13 = vadd.f32 %v3225_v7, %v5375_v11  ;;  %v809_v33 = vpop.f32.mrb[5].mxu1  ;;  %v1200_v51 = vmax.f32 %v1122_v4, 0.0  ;;  %v3281_v25 = vpop.f32.mrb[6].mxu0 }
 0x273   :  { %v958_v63 = vmul.f32 %v5379_v8, %v878_v28  ;;  %v810_v14 = vadd.f32 %v809_v33, %v5373_v34  ;;  %v1217_v32 = vmul.f32 %v1201_v41, %v5385_v60  ;;  %v1137_v61 = vadd.f32 %v3281_v25, %v5375_v11  ;;  %v1131_v21 = vpop.f32.mrb[7].mxu0  ;;  %v5447_v4 = vpop.permute.xlu0 %939 }
 0x274   :  { %v881_v2 = vmax.f32 %v815_v13, 0.0  ;;  %v1216_v47 = vmul.f32 %v1200_v51, %v5379_v8  ;;  %v1132_v27 = vadd.f32 %v1131_v21, %v5373_v34 }
 0x275   :  { %v974_v15 = vadd.f32 %v959_v5, %v958_v63  ;;  %v880_v49 = vmax.f32 %v810_v14, 0.0  ;;  %v3228_v53 = vpop.f32.mrb[6].mxu1  ;;  %v1203_v24 = vmax.f32 %v1137_v61, 0.0 }
 0x276   :  { %v825_v40 = vadd.f32 %v3228_v53, %v5387_v10  ;;  %v819_v12 = vpop.f32.mrb[7].mxu1  ;;  %v1232_v23 = vadd.f32 %v1217_v32, %v1216_v47  ;;  %v1202_v54 = vmax.f32 %v1132_v27, 0.0  ;;  %v3284_v22 = vpop.f32.mrb[8].mxu0  ;;  %v961_v35 = vmul.f32 %v5389_v59, %v881_v2 }
 0x277   :  { %v960_v57 = vmul.f32 %v5383_v1, %v880_v49  ;;  %v820_v17 = vadd.f32 %v819_v12, %v5381_v43  ;;  %v1147_v9 = vadd.f32 %v3284_v22, %v5387_v10  ;;  %v1141_v56 = vpop.f32.mrb[9].mxu0  ;;  %v1219_v48 = vmul.f32 %v1203_v24, %v5389_v59  ;;  %v5457_v24 = vpop.permute.xlu1 %726 }
 0x278   :  { %v1218_v46 = vmul.f32 %v1202_v54, %v5383_v1  ;;  %v1142_v29 = vadd.f32 %v1141_v56, %v5381_v43  ;;  %v883_v55 = vmax.f32 %v825_v40, 0.0 }
 0x279   :  { %v975_v36 = vadd.f32 %v974_v15, %v960_v57  ;;  %v882_v18 = vmax.f32 %v820_v17, 0.0  ;;  %v3231_v6 = vpop.f32.mrb[8].mxu1  ;;  %v1205_v30 = vmax.f32 %v1147_v9, 0.0 }
 0x27a   :  { %v835_v28 = vadd.f32 %v3231_v6, %v5401_v31  ;;  %v829_v7 = vpop.f32.mrb[9].mxu1  ;;  %v1233_v41 = vadd.f32 %v1232_v23, %v1218_v46  ;;  %v1204_v5 = vmax.f32 %v1142_v29, 0.0  ;;  %v3287_v13 = vpop.f32.mrb[10].mxu0  ;;  %v963_v47 = vmul.f32 %v5403_v62, %v883_v55 }
 0x27b   :  { %v962_v33 = vmul.f32 %v5399_v37, %v882_v18  ;;  %v976_v51 = vadd.f32 %v975_v36, %v961_v35  ;;  %v830_v25 = vadd.f32 %v829_v7, %v5397_v45  ;;  %v1221_v63 = vmul.f32 %v1205_v30, %v5403_v62  ;;  %v1151_v14 = vpop.f32.mrb[11].mxu0 }
 0x27c   :  { %v885_v32 = vmax.f32 %v835_v28, 0.0  ;;  %v1220_v61 = vmul.f32 %v1204_v5, %v5399_v37  ;;  %v1234_v21 = vadd.f32 %v1233_v41, %v1219_v48  ;;  %v1157_v2 = vadd.f32 %v3287_v13, %v5401_v31  ;;  %v5463_v48 = vpop.permute.xlu0 %943 }
 0x27d   :  { %v977_v27 = vadd.f32 %v976_v51, %v962_v33  ;;  %v884_v15 = vmax.f32 %v830_v25, 0.0  ;;  %v3234_v49 = vpop.f32.mrb[10].mxu1  ;;  %v1152_v53 = vadd.f32 %v1151_v14, %v5397_v45 }
 0x27e   :  { %v965_v40 = vmul.f32 %v5411_v3, %v885_v32  ;;  %v845_v12 = vadd.f32 %v3234_v49, %v5409_v39  ;;  %v839_v23 = vpop.f32.mrb[11].mxu1  ;;  %v1235_v54 = vadd.f32 %v1234_v21, %v1220_v61  ;;  %v1207_v22 = vmax.f32 %v1157_v2, 0.0  ;;  %v3290_v57 = vpop.f32.mrb[12].mxu0 }
 0x27f   :  { %v964_v17 = vmul.f32 %v5407_v44, %v884_v15  ;;  %v978_v9 = vadd.f32 %v977_v27, %v963_v47  ;;  %v840_v56 = vadd.f32 %v839_v23, %v5405_v26  ;;  %v1206_v35 = vmax.f32 %v1152_v53, 0.0  ;;  %v1161_v46 = vpop.f32.mrb[13].mxu0  ;;  %v5475_v49 = vpop.permute.xlu1 %730 }
 0x280   :  { %v887_v29 = vmax.f32 %v845_v12, 0.0  ;;  %v1223_v36 = vmul.f32 %v1207_v22, %v5411_v3  ;;  %v1236_v55 = vadd.f32 %v1235_v54, %v1221_v63  ;;  %v1167_v18 = vadd.f32 %v3290_v57, %v5409_v39  ;;  %v5477_v22 = vpop.permute.xlu0 %947 }
 0x281   :  { %v979_v6 = vadd.f32 %v978_v9, %v964_v17  ;;  %v886_v30 = vmax.f32 %v840_v56, 0.0  ;;  %v3237_v28 = vpop.f32.mrb[12].mxu1  ;;  %v1222_v7 = vmul.f32 %v1206_v35, %v5407_v44  ;;  %v1162_v41 = vadd.f32 %v1161_v46, %v5405_v26 }
 0x282   :  { %v967_v5 = vmul.f32 %v5419_v38, %v887_v29  ;;  %v855_v13 = vadd.f32 %v3237_v28, %v5417_v0  ;;  %v849_v33 = vpop.f32.mrb[13].mxu1  ;;  %v1209_v51 = vmax.f32 %v1167_v18, 0.0  ;;  %v3293_v25 = vpop.f32.mrb[14].mxu0 }
 0x283   :  { %v966_v14 = vmul.f32 %v5415_v19, %v886_v30  ;;  %v980_v32 = vadd.f32 %v979_v6, %v965_v40  ;;  %v850_v63 = vadd.f32 %v849_v33, %v5413_v50  ;;  %v1237_v61 = vadd.f32 %v1236_v55, %v1222_v7  ;;  %v1171_v21 = vpop.f32.mrb[15].mxu0 }
 0x284   :  { %v889_v2 = vmax.f32 %v855_v13, 0.0  ;;  %v1225_v47 = vmul.f32 %v1209_v51, %v5419_v38  ;;  %v1208_v27 = vmax.f32 %v1162_v41, 0.0  ;;  %v1177_v15 = vadd.f32 %v3293_v25, %v5417_v0 }
 0x285   :  { %v981_v53 = vadd.f32 %v980_v32, %v966_v14  ;;  %v888_v12 = vmax.f32 %v850_v63, 0.0  ;;  %v3240_v23 = vpop.f32.mrb[14].mxu1  ;;  %v1238_v54 = vadd.f32 %v1237_v61, %v1223_v36  ;;  %v1172_v40 = vadd.f32 %v1171_v21, %v5413_v50 }
 0x286   :  { %v865_v57 = vadd.f32 %v3240_v23, %v5441_v52  ;;  %v859_v17 = vpop.f32.mrb[15].mxu1  ;;  %v969_v9 = vmul.f32 %v5447_v4, %v889_v2  ;;  %v1224_v56 = vmul.f32 %v1208_v27, %v5415_v19  ;;  %v1211_v35 = vmax.f32 %v1177_v15, 0.0  ;;  %v3296_v46 = vpop.f32.mrb[16].mxu0 }
 0x287   :  { %v968_v29 = vmul.f32 %v5433_v42, %v888_v12  ;;  %v982_v55 = vadd.f32 %v981_v53, %v967_v5  ;;  %v860_v18 = vadd.f32 %v859_v17, %v5425_v20  ;;  %v1210_v6 = vmax.f32 %v1172_v40, 0.0  ;;  %v1181_v36 = vpop.f32.mrb[17].mxu0  ;;  %v5493_v12 = vpop.permute.xlu0 %955 }
 0x288   :  { %v891_v30 = vmax.f32 %v865_v57, 0.0  ;;  %v1239_v28 = vadd.f32 %v1238_v54, %v1224_v56  ;;  %v1227_v7 = vmul.f32 %v1211_v35, %v5447_v4  ;;  %v1187_v41 = vadd.f32 %v3296_v46, %v5441_v52  ;;  %v5496_v56 = vpop.permute.xlu1 %951 }
 0x289   :  { %v983_v13 = vadd.f32 %v982_v55, %v968_v29  ;;  %v890_v33 = vmax.f32 %v860_v18, 0.0  ;;  %v3243_v51 = vpop.f32.mrb[16].mxu1  ;;  %v1226_v25 = vmul.f32 %v1210_v6, %v5433_v42  ;;  %v1182_v14 = vadd.f32 %v1181_v36, %v5425_v20 }
 0x28a   :  { %v971_v32 = vmul.f32 %v5477_v22, %v891_v30  ;;  %v869_v5 = vpop.f32.mrb[17].mxu1  ;;  %v1240_v63 = vadd.f32 %v1239_v28, %v1225_v47  ;;  %v1213_v61 = vmax.f32 %v1187_v41, 0.0  ;;  %v875_v21 = vadd.f32 %v3243_v51, %v5475_v49  ;;  %v3299_v2 = vpop.f32.mrb[18].mxu0 }
 0x28b   :  { %v970_v27 = vmul.f32 %v5463_v48, %v890_v33  ;;  %v984_v15 = vadd.f32 %v983_v13, %v969_v9  ;;  %v870_v53 = vadd.f32 %v869_v5, %v5457_v24  ;;  %v1212_v23 = vmax.f32 %v1182_v14, 0.0  ;;  %v1191_v54 = vpop.f32.mrb[19].mxu0 }
 0x28c   :  { %v1241_v40 = vadd.f32 %v1240_v63, %v1226_v25  ;;  %v1229_v57 = vmul.f32 %v1213_v61, %v5477_v22  ;;  %v893_v17 = vmax.f32 %v875_v21, 0.0  ;;  %v1197_v47 = vadd.f32 %v3299_v2, %v5475_v49 }
 0x28d   :  { %v985_v35 = vadd.f32 %v984_v15, %v970_v27  ;;  %v892_v46 = vmax.f32 %v870_v53, 0.0  ;;  %v3334_v29 = vpop.f32.mrb[18].mxu1  ;;  %v1228_v55 = vmul.f32 %v1212_v23, %v5463_v48  ;;  %v1192_v9 = vadd.f32 %v1191_v54, %v5457_v24 }
 0x28e   :  { %v1380_v18 = vadd.f32 %v3334_v29, %v5377_v16  ;;  %v5503_v6 = vmul.f32 %v5493_v12, %v893_v17  ;;  %v1242_v36 = vadd.f32 %v1241_v40, %v1227_v7  ;;  %v1374_v30 = vpop.f32.mrb[19].mxu1  ;;  %v1215_v28 = vmax.f32 %v1197_v47, 0.0  ;;  %v3390_v41 = vpop.f32.mrb[20].mxu0 }
 0x28f   :  { %v986_v13 = vadd.f32 %v985_v35, %v971_v32  ;;  %v972_v33 = vmul.f32 %v5496_v56, %v892_v46  ;;  %v1375_v51 = vadd.f32 %v1374_v30, %v5371_v58  ;;  %v1214_v25 = vmax.f32 %v1192_v9, 0.0  ;;  %v1627_v14 = vpop.f32.mrb[21].mxu0 }
 0x290   :  { %v1454_v5 = vmax.f32 %v1380_v18, 0.0  ;;  %v1243_v63 = vadd.f32 %v1242_v36, %v1228_v55  ;;  %v1231_v61 = vmul.f32 %v1215_v28, %v5493_v12  ;;  %v1633_v21 = vadd.f32 %v3390_v41, %v5377_v16 }
 0x291   :  { %v5509_v2 = vadd.f32 %v986_v13, %v972_v33  ;;  %v1453_v27 = vmax.f32 %v1375_v51, 0.0  ;;  %v3337_v7 = vpop.f32.mrb[20].mxu1  ;;  %v1230_v15 = vmul.f32 %v1214_v25, %v5496_v56  ;;  %v1628_v32 = vadd.f32 %v1627_v14, %v5371_v58 }
 0x292   :  { %v1470_v53 = vmul.f32 %v1454_v5, %v5385_v60  ;;  %v1390_v23 = vadd.f32 %v3337_v7, %v5375_v11  ;;  %v1244_v54 = vadd.f32 %v1243_v63, %v1229_v57  ;;  %v1384_v40 = vpop.f32.mrb[21].mxu1  ;;  %v1707_v17 = vmax.f32 %v1633_v21, 0.0  ;;  %v3393_v47 = vpop.f32.mrb[22].mxu0 }
 0x293   :  { %v1469_v35 = vmul.f32 %v1453_v27, %v5379_v8  ;;  %v1385_v46 = vadd.f32 %v1384_v40, %v5373_v34  ;;  %v1706_v29 = vmax.f32 %v1628_v32, 0.0  ;;  %v1643_v55 = vadd.f32 %v3393_v47, %v5375_v11  ;;  %v1637_v9 = vpop.f32.mrb[23].mxu0 }
 0x294   :  { %v1456_v18 = vmax.f32 %v1390_v23, 0.0  ;;  %v1245_v36 = vadd.f32 %v1244_v54, %v1230_v15  ;;  %v1723_v30 = vmul.f32 %v1707_v17, %v5385_v60  ;;  %v1638_v28 = vadd.f32 %v1637_v9, %v5373_v34 }
 0x295   :  { %v1485_v57 = vadd.f32 %v1470_v53, %v1469_v35  ;;  %v1455_v41 = vmax.f32 %v1385_v46, 0.0  ;;  %v3340_v13 = vpop.f32.mrb[22].mxu1  ;;  %v1722_v33 = vmul.f32 %v1706_v29, %v5379_v8  ;;  %v1709_v51 = vmax.f32 %v1643_v55, 0.0 }
 0x296   :  { %v1472_v25 = vmul.f32 %v1456_v18, %v5389_v59  ;;  %v1246_v14 = vadd.f32 %v1245_v36, %v1231_v61  ;;  %v1400_v5 = vadd.f32 %v3340_v13, %v5387_v10  ;;  %v1394_v63 = vpop.f32.mrb[23].mxu1  ;;  %v1708_v21 = vmax.f32 %v1638_v28, 0.0  ;;  %v3396_v27 = vpop.f32.mrb[24].mxu0 }
 0x297   :  { %4211 = shalt.err (!%p4208_p4)
}
 0x298   :  { %s4212_s21 = scalar_lea.hbm %s5767_s11, 128 }
 0x299   :  { %p4213_p5 = scmp.ne.s32.totalorder %s5767_s11, %s4212_s21  ;;  %p4216_p6 = scmp.lt.u32.totalorder %s4212_s21, %s5767_s11 }
 0x29b   :  { %p4218_p7 = pnand %p4216_p6, %p4213_p5 }
 0x29d   :  { %4221 = shalt.err (!%p4218_p7)
}
 0x29e   :  { %2792 = dma.vmem_to_hbm [thread:$0]  %s2790_s7, 128, %s5767_s11, [#allocation16]   ;;  %v1471_v61 = vmul.f32 %v1455_v41, %v5383_v1  ;;  %v1395_v7 = vadd.f32 %v1394_v63, %v5381_v43  ;;  %v1738_v15 = vadd.f32 %v1723_v30, %v1722_v33  ;;  %v1725_v32 = vmul.f32 %v1709_v51, %v5389_v59  ;;  %v1647_v53 = vpop.f32.mrb[25].mxu0 }
 0x29f   :  { %s4222_s26 = scalar_lea.vmem %s5521_s30, 128  ;;  %p4227_p9 = scmp.lt.s32.totalorder %s5521_s30, %s5521_s30 }
 0x2a0   :  { %p4223_p8 = scmp.ne.s32.totalorder %s5521_s30, %s4222_s26  ;;  %p4228_p10 = scmp.lt.s32.totalorder %s4222_s26, %s4222_s26 }
 0x2a2   :  { %p4229_p11 = por %p4228_p10, %p4227_p9 }
 0x2a4   :  { %p4230_p12 = pnand %p4229_p11, %p4223_p8 }
 0x2a6   :  { %4233 = shalt.err (!%p4230_p12)
}
 0x2a7   :  { %s4234_s11 = scalar_lea.hbm %s5766_s10, 128 }
 0x2a8   :  { %p4235_p13 = scmp.ne.s32.totalorder %s5766_s10, %s4234_s11  ;;  %p4238_p0 = scmp.lt.u32.totalorder %s4234_s11, %s5766_s10 }
 0x2aa   :  { %p4240_p1 = pnand %p4238_p0, %p4235_p13 }
 0x2ac   :  { %4243 = shalt.err (!%p4240_p1)
}
 0x2ad   :  { %2782 = dma.vmem_to_hbm [thread:$0]  %s5521_s30, 128, %s5766_s10, [#allocation4]   ;;  %v1247_v23 = vrot.slane %v1246_v14, 4  ;;  %v1458_v54 = vmax.f32 %v1400_v5, 0.0  ;;  %v1724_v40 = vmul.f32 %v1708_v21, %v5383_v1  ;;  %v1653_v17 = vadd.f32 %v3396_v27, %v5387_v10  ;;  %v3343_v46 = vpop.f32.mrb[24].mxu1  ;;  %v3399_v41 = vpop.f32.mrb[26].mxu0 }
 0x2ae   :  { %v1486_v47 = vadd.f32 %v1485_v57, %v1471_v61  ;;  %v1457_v35 = vmax.f32 %v1395_v7, 0.0  ;;  %v1648_v29 = vadd.f32 %v1647_v53, %v5381_v43  ;;  %v988_v55 = vadd.f32 %v5509_v2, %v5503_v6  ;;  %v1404_v30 = vpop.f32.mrb[25].mxu1  ;;  %v1657_v5 = vpop.f32.mrb[27].mxu0  ;;  %s4299_s10 = smov [#allocation17]  }
 0x2af   :  { %v1248_v9 = vadd.f32 %v1247_v23, %v1246_v14  ;;  %v1474_v18 = vmul.f32 %v1458_v54, %v5403_v62  ;;  %v1410_v36 = vadd.f32 %v3343_v46, %v5401_v31  ;;  %v1739_v28 = vadd.f32 %v1738_v15, %v1724_v40  ;;  %v3346_v14 = vpop.f32.mrb[26].mxu1  ;;  %s2799_s1 = sshll.u32 %s4299_s10, 4  ;;  %s2800_s1 = int_to_ptr.vmem [resolvable:$true] %s2799_s1 }
 0x2b0   :  { %v1473_v13 = vmul.f32 %v1457_v35, %v5399_v37  ;;  %v1487_v33 = vadd.f32 %v1486_v47, %v1472_v25  ;;  %v1405_v57 = vadd.f32 %v1404_v30, %v5397_v45  ;;  %v1711_v51 = vmax.f32 %v1653_v17, 0.0  ;;  %v1414_v25 = vpop.f32.mrb[27].mxu1  ;;  %v3402_v17 = vpop.f32.mrb[28].mxu0  ;;  %s4244_s3 = scalar_lea.vmem %s2800_s1, 128  ;;  %p4249_p3 = scmp.lt.s32.totalorder %s2800_s1, %s2800_s1 }
 0x2b1   :  { %v1249_v63 = vrot.slane %v1248_v9, 2  ;;  %v1460_v21 = vmax.f32 %v1410_v36, 0.0  ;;  %v1710_v27 = vmax.f32 %v1648_v29, 0.0  ;;  %v1740_v61 = vadd.f32 %v1739_v28, %v1725_v32  ;;  %v1667_v29 = vpop.f32.mrb[29].mxu0  ;;  %p4245_p2 = scmp.ne.s32.totalorder %s2800_s1, %s4244_s3  ;;  %p4250_p4 = scmp.lt.s32.totalorder %s4244_s3, %s4244_s3 }
 0x2b2   :  { %v1488_v6 = vadd.f32 %v1487_v33, %v1473_v13  ;;  %v1459_v2 = vmax.f32 %v1405_v57, 0.0  ;;  %v1727_v7 = vmul.f32 %v1711_v51, %v5403_v62  ;;  %v989_v53 = vrot.slane %v988_v55, 4  ;;  %v3349_v51 = vpop.f32.mrb[28].mxu1 }
 0x2b3   :  { %v1250_v23 = vadd.f32 %v1249_v63, %v1248_v9  ;;  %v1476_v15 = vmul.f32 %v1460_v21, %v5411_v3  ;;  %v1420_v54 = vadd.f32 %v3346_v14, %v5409_v39  ;;  %v1726_v40 = vmul.f32 %v1710_v27, %v5399_v37  ;;  %p4251_p5 = por %p4250_p4, %p4249_p3 }
 0x2b4   :  { %v1475_v47 = vmul.f32 %v1459_v2, %v5407_v44  ;;  %v1489_v35 = vadd.f32 %v1488_v6, %v1474_v18  ;;  %v1415_v32 = vadd.f32 %v1414_v25, %v5405_v26  ;;  %v990_v46 = vadd.f32 %v989_v53, %v988_v55  ;;  %v1424_v2 = vpop.f32.mrb[29].mxu1  ;;  %v3405_v55 = vpop.f32.mrb[30].mxu0 }
 0x2b5   :  { %v1251_v36 = vrot.slane %v1250_v23, 1  ;;  %v1462_v30 = vmax.f32 %v1420_v54, 0.0  ;;  %v1741_v28 = vadd.f32 %v1740_v61, %v1726_v40  ;;  %v1663_v9 = vadd.f32 %v3399_v41, %v5401_v31  ;;  %v5577_v61 = vpop.permute.xlu1 %997  ;;  %v1677_v25 = vpop.f32.mrb[31].mxu0  ;;  %p4252_p6 = pnand %p4251_p5, %p4245_p2 }
 0x2b6   :  { %v1490_v13 = vadd.f32 %v1489_v35, %v1475_v47  ;;  %v1461_v33 = vmax.f32 %v1415_v32, 0.0  ;;  %v991_v57 = vrot.slane %v990_v46, 2  ;;  %v1658_v63 = vadd.f32 %v1657_v5, %v5397_v45 }
 0x2b7   :  { %v1252_v21 = vadd.f32 %v1251_v36, %v1250_v23  ;;  %v1478_v27 = vmul.f32 %v1462_v30, %v5419_v38  ;;  %v1430_v18 = vadd.f32 %v3349_v51, %v5417_v0  ;;  %v1713_v6 = vmax.f32 %v1663_v9, 0.0  ;;  %v3352_v9 = vpop.f32.mrb[30].mxu1  ;;  %v3408_v51 = vpop.f32.mrb[32].mxu0 }
 0x2b8   :  { %v1477_v14 = vmul.f32 %v1461_v33, %v5415_v19  ;;  %v1491_v53 = vadd.f32 %v1490_v13, %v1476_v15  ;;  %v992_v41 = vadd.f32 %v991_v57, %v990_v46  ;;  %v1425_v54 = vadd.f32 %v1424_v2, %v5413_v50  ;;  %v1434_v57 = vpop.f32.mrb[31].mxu1  ;;  %v1687_v2 = vpop.f32.mrb[33].mxu0 }
 0x2b9   :  { %v1253_v40 = vadd.f32 %v1252_v21, %v5577_v61  ;;  %v1464_v5 = vmax.f32 %v1430_v18, 0.0  ;;  %v1729_v23 = vmul.f32 %v1713_v6, %v5411_v3  ;;  %v1712_v47 = vmax.f32 %v1658_v63, 0.0 }
 0x2ba   :  { %v1492_v35 = vadd.f32 %v1491_v53, %v1477_v14  ;;  %v993_v32 = vrot.slane %v992_v41, 1  ;;  %v1463_v36 = vmax.f32 %v1425_v54, 0.0  ;;  %v1742_v30 = vadd.f32 %v1741_v28, %v1727_v7 }
 0x2bb   :  { %1254 = vst [vmem:[#allocation17 + $0x1] sm:$0x1] %v1253_v40  ;;  %v1480_v15 = vmul.f32 %v1464_v5, %v5447_v4  ;;  %v1728_v13 = vmul.f32 %v1712_v47, %v5407_v44  ;;  %v1440_v46 = vadd.f32 %v3352_v9, %v5441_v52  ;;  %v1673_v33 = vadd.f32 %v3402_v17, %v5409_v39  ;;  %v3355_v47 = vpop.f32.mrb[32].mxu1  ;;  %v3411_v9 = vpop.f32.mrb[34].mxu0 }
 0x2bc   :  { %v994_v21 = vadd.f32 %v993_v32, %v992_v41  ;;  %v1479_v18 = vmul.f32 %v1463_v36, %v5433_v42  ;;  %v1493_v63 = vadd.f32 %v1492_v35, %v1478_v27  ;;  %v1435_v6 = vadd.f32 %v1434_v57, %v5425_v20  ;;  %v1444_v36 = vpop.f32.mrb[33].mxu1 }
 0x2bd   :  { %v1743_v7 = vadd.f32 %v1742_v30, %v1728_v13  ;;  %v1466_v28 = vmax.f32 %v1440_v46, 0.0  ;;  %v1715_v14 = vmax.f32 %v1673_v33, 0.0  ;;  %v1668_v53 = vadd.f32 %v1667_v29, %v5405_v26  ;;  %v1697_v33 = vpop.f32.mrb[35].mxu0 }
 0x2be   :  { %v1000_v54 = vadd.f32 %v5577_v61, %v994_v21  ;;  %v1494_v40 = vadd.f32 %v1493_v63, %v1479_v18  ;;  %v1465_v5 = vmax.f32 %v1435_v6, 0.0  ;;  %v1683_v17 = vadd.f32 %v3405_v55, %v5417_v0 }
 0x2bf   :  { %v1482_v41 = vmul.f32 %v1466_v28, %v5477_v22  ;;  %v1731_v32 = vmul.f32 %v1715_v14, %v5419_v38  ;;  %v1714_v27 = vmax.f32 %v1668_v53, 0.0  ;;  %v1744_v35 = vadd.f32 %v1743_v7, %v1729_v23  ;;  %v3446_v28 = vpop.f32.mrb[34].mxu1 }
 0x2c0   :  { %1001 = vst [vmem:[#allocation17] sm:$0x1] %v1000_v54  ;;  %v1481_v30 = vmul.f32 %v1465_v5, %v5463_v48  ;;  %v1495_v13 = vadd.f32 %v1494_v40, %v1480_v15  ;;  %v1450_v29 = vadd.f32 %v3355_v47, %v5475_v49  ;;  %v1717_v46 = vmax.f32 %v1683_v17, 0.0  ;;  %v1880_v40 = vpop.f32.mrb[35].mxu1  ;;  %v3502_v5 = vpop.f32.mrb[36].mxu0 }
 0x2c1   :  { %v1730_v57 = vmul.f32 %v1714_v27, %v5415_v19  ;;  %v1445_v55 = vadd.f32 %v1444_v36, %v5457_v24  ;;  %v1678_v21 = vadd.f32 %v1677_v25, %v5413_v50  ;;  %v1693_v18 = vadd.f32 %v3408_v51, %v5441_v52  ;;  %v2133_v51 = vpop.f32.mrb[37].mxu0 }
 0x2c2   :  { %v1496_v63 = vadd.f32 %v1495_v13, %v1481_v30  ;;  %v1468_v23 = vmax.f32 %v1450_v29, 0.0  ;;  %v1733_v6 = vmul.f32 %v1717_v46, %v5447_v4  ;;  %v1688_v7 = vadd.f32 %v1687_v2, %v5425_v20 }
 0x2c3   :  { %v1745_v15 = vadd.f32 %v1744_v35, %v1730_v57  ;;  %v1467_v14 = vmax.f32 %v1445_v55, 0.0  ;;  %v1716_v53 = vmax.f32 %v1678_v21, 0.0  ;;  %v1719_v54 = vmax.f32 %v1693_v18, 0.0  ;;  %v3449_v55 = vpop.f32.mrb[36].mxu1 }
 0x2c4   :  { %v1484_v47 = vmul.f32 %v1468_v23, %v5493_v12  ;;  %v1497_v17 = vadd.f32 %v1496_v63, %v1482_v41  ;;  %v1718_v27 = vmax.f32 %v1688_v7, 0.0  ;;  %v1886_v25 = vadd.f32 %v3446_v28, %v5377_v16  ;;  %v1890_v23 = vpop.f32.mrb[37].mxu1  ;;  %v3505_v7 = vpop.f32.mrb[38].mxu0 }
 0x2c5   :  { %v1483_v36 = vmul.f32 %v1467_v14, %v5496_v56  ;;  %v1732_v30 = vmul.f32 %v1716_v53, %v5433_v42  ;;  %v1746_v13 = vadd.f32 %v1745_v15, %v1731_v32  ;;  %v1735_v2 = vmul.f32 %v1719_v54, %v5477_v22  ;;  %v2143_v53 = vpop.f32.mrb[39].mxu0 }
 0x2c6   :  { %v1734_v35 = vmul.f32 %v1718_v27, %v5463_v48  ;;  %v1960_v29 = vmax.f32 %v1886_v25, 0.0  ;;  %v1703_v46 = vadd.f32 %v3411_v9, %v5475_v49  ;;  %v1881_v57 = vadd.f32 %v1880_v40, %v5371_v58 }
 0x2c7   :  { %v1498_v41 = vadd.f32 %v1497_v17, %v1483_v36  ;;  %v1747_v21 = vadd.f32 %v1746_v13, %v1732_v30  ;;  %v1698_v18 = vadd.f32 %v1697_v33, %v5457_v24  ;;  %v2139_v63 = vadd.f32 %v3502_v5, %v5377_v16  ;;  %v3452_v36 = vpop.f32.mrb[38].mxu1 }
 0x2c8   :  { %v1976_v32 = vmul.f32 %v1960_v29, %v5385_v60  ;;  %v1721_v28 = vmax.f32 %v1703_v46, 0.0  ;;  %v1959_v15 = vmax.f32 %v1881_v57, 0.0  ;;  %v1896_v14 = vadd.f32 %v3449_v55, %v5375_v11  ;;  %v1900_v57 = vpop.f32.mrb[39].mxu1  ;;  %v3508_v55 = vpop.f32.mrb[40].mxu0 }
 0x2c9   :  { %v1499_v54 = vadd.f32 %v1498_v41, %v1484_v47  ;;  %v1748_v9 = vadd.f32 %v1747_v21, %v1733_v6  ;;  %v1720_v27 = vmax.f32 %v1698_v18, 0.0  ;;  %v2213_v40 = vmax.f32 %v2139_v63, 0.0  ;;  %v2153_v18 = vpop.f32.mrb[41].mxu0 }
 0x2ca   :  { %v1737_v17 = vmul.f32 %v1721_v28, %v5493_v12  ;;  %v1975_v25 = vmul.f32 %v1959_v15, %v5379_v8  ;;  %v1962_v33 = vmax.f32 %v1896_v14, 0.0  ;;  %v2134_v5 = vadd.f32 %v2133_v51, %v5371_v58 }
 0x2cb   :  { %v1500_v30 = vrot.slane %v1499_v54, 4  ;;  %v1749_v13 = vadd.f32 %v1748_v9, %v1734_v35  ;;  %v1736_v29 = vmul.f32 %v1720_v27, %v5496_v56  ;;  %v2229_v46 = vmul.f32 %v2213_v40, %v5385_v60  ;;  %v3511_v60 = vpop.f32.mrb[42].mxu0 }
 0x2cc   :  { %v1991_v47 = vadd.f32 %v1976_v32, %v1975_v25  ;;  %v1978_v6 = vmul.f32 %v1962_v33, %v5389_v59  ;;  %v2212_v41 = vmax.f32 %v2134_v5, 0.0  ;;  %v1891_v21 = vadd.f32 %v1890_v23, %v5373_v34  ;;  %v3455_v32 = vpop.f32.mrb[40].mxu1 }
 0x2cd   :  { %v1501_v63 = vadd.f32 %v1500_v30, %v1499_v54  ;;  %v1750_v28 = vadd.f32 %v1749_v13, %v1735_v2  ;;  %v2149_v51 = vadd.f32 %v3505_v7, %v5375_v11  ;;  %v2144_v15 = vadd.f32 %v2143_v53, %v5373_v34  ;;  %v1910_v23 = vpop.f32.mrb[41].mxu1  ;;  %v2163_v53 = vpop.f32.mrb[43].mxu0 }
 0x2ce   :  { %v2228_v35 = vmul.f32 %v2212_v41, %v5379_v8  ;;  %v1961_v14 = vmax.f32 %v1891_v21, 0.0  ;;  %v1906_v9 = vadd.f32 %v3452_v36, %v5387_v10  ;;  %v1901_v27 = vadd.f32 %v1900_v57, %v5381_v43 }
 0x2cf   :  { %v1502_v40 = vrot.slane %v1501_v63, 2  ;;  %v1751_v25 = vadd.f32 %v1750_v28, %v1736_v29  ;;  %v2215_v33 = vmax.f32 %v2149_v51, 0.0  ;;  %v2214_v5 = vmax.f32 %v2144_v15, 0.0  ;;  %v3458_v51 = vpop.f32.mrb[42].mxu1 }
 0x2d0   :  { %v2244_v54 = vadd.f32 %v2229_v46, %v2228_v35  ;;  %v1977_v2 = vmul.f32 %v1961_v14, %v5383_v1  ;;  %v1964_v7 = vmax.f32 %v1906_v9, 0.0  ;;  %v1963_v30 = vmax.f32 %v1901_v27, 0.0  ;;  %v1920_v9 = vpop.f32.mrb[43].mxu1 }
 0x2d1   :  { %v1503_v13 = vadd.f32 %v1502_v40, %v1501_v63  ;;  %v1752_v41 = vadd.f32 %v1751_v25, %v1737_v17  ;;  %v2231_v21 = vmul.f32 %v2215_v33, %v5389_v59  ;;  %v2230_v36 = vmul.f32 %v2214_v5, %v5383_v1  ;;  %v3514_v63 = vpop.f32.mrb[44].mxu0 }
 0x2d2   :  { %v1992_v57 = vadd.f32 %v1991_v47, %v1977_v2  ;;  %v1980_v34 = vmul.f32 %v1964_v7, %v5403_v62  ;;  %v1979_v29 = vmul.f32 %v1963_v30, %v5399_v37  ;;  %v2159_v28 = vadd.f32 %v3508_v55, %v5387_v10  ;;  %v2173_v25 = vpop.f32.mrb[45].mxu0 }
 0x2d3   :  { %v1504_v46 = vrot.slane %v1503_v13, 1  ;;  %v1753_v15 = vrot.slane %v1752_v41, 4  ;;  %v2245_v35 = vadd.f32 %v2244_v54, %v2230_v36  ;;  %v2154_v14 = vadd.f32 %v2153_v18, %v5381_v43  ;;  %v3461_v36 = vpop.f32.mrb[44].mxu1 }
 0x2d4   :  { %v1993_v17 = vadd.f32 %v1992_v57, %v1978_v6  ;;  %v2217_v27 = vmax.f32 %v2159_v28, 0.0  ;;  %v1916_v40 = vadd.f32 %v3455_v32, %v5401_v31  ;;  %v1911_v47 = vadd.f32 %v1910_v23, %v5397_v45  ;;  %v1930_v57 = vpop.f32.mrb[45].mxu1  ;;  %v3517_v23 = vpop.f32.mrb[46].mxu0 }
 0x2d5   :  { %v1505_v33 = vadd.f32 %v1504_v46, %v1503_v13  ;;  %v1754_v5 = vadd.f32 %v1753_v15, %v1752_v41  ;;  %v2216_v2 = vmax.f32 %v2154_v14, 0.0  ;;  %v2246_v7 = vadd.f32 %v2245_v35, %v2231_v21  ;;  %v2183_v28 = vpop.f32.mrb[47].mxu0 }
 0x2d6   :  { %v1994_v55 = vadd.f32 %v1993_v17, %v1979_v29  ;;  %v2233_v30 = vmul.f32 %v2217_v27, %v5403_v62  ;;  %v1966_v10 = vmax.f32 %v1916_v40, 0.0  ;;  %v1965_v54 = vmax.f32 %v1911_v47, 0.0  ;;  %v3464_v47 = vpop.f32.mrb[46].mxu1 }
 0x2d7   :  { %v1506_v18 = vadd.f32 %v1505_v33, %v5577_v61  ;;  %v1755_v43 = vrot.slane %v1754_v5, 2  ;;  %v2232_v6 = vmul.f32 %v2216_v2, %v5399_v37  ;;  %v2169_v32 = vadd.f32 %v3511_v60, %v5401_v31 }
 0x2d8   :  { %v1982_v13 = vmul.f32 %v1966_v10, %v5411_v3  ;;  %v1981_v41 = vmul.f32 %v1965_v54, %v5407_v44  ;;  %v1995_v21 = vadd.f32 %v1994_v55, %v1980_v34  ;;  %v2164_v29 = vadd.f32 %v2163_v53, %v5397_v45  ;;  %v1940_v53 = vpop.f32.mrb[47].mxu1  ;;  %v3520_v55 = vpop.f32.mrb[48].mxu0 }
 0x2d9   :  { %1507 = vst [vmem:[#allocation17 + $0x2] sm:$0x1] %v1506_v18  ;;  %v1756_v46 = vadd.f32 %v1755_v43, %v1754_v5  ;;  %v2247_v15 = vadd.f32 %v2246_v7, %v2232_v6  ;;  %v2219_v35 = vmax.f32 %v2169_v32, 0.0  ;;  %v1926_v14 = vadd.f32 %v3458_v51, %v5409_v39  ;;  %v2193_v51 = vpop.f32.mrb[49].mxu0 }
 0x2da   :  { %v1996_v17 = vadd.f32 %v1995_v21, %v1981_v41  ;;  %v2218_v27 = vmax.f32 %v2164_v29, 0.0  ;;  %v1921_v60 = vadd.f32 %v1920_v9, %v5405_v26  ;;  %v2179_v40 = vadd.f32 %v3514_v63, %v5409_v39  ;;  %v3467_v29 = vpop.f32.mrb[48].mxu1 }
 0x2db   :  { %v1757_v10 = vrot.slane %v1756_v46, 1  ;;  %v2235_v33 = vmul.f32 %v2219_v35, %v5411_v3  ;;  %v2248_v34 = vadd.f32 %v2247_v15, %v2233_v30  ;;  %v1968_v2 = vmax.f32 %v1926_v14, 0.0  ;;  %v1950_v14 = vpop.f32.mrb[49].mxu1 }
 0x2dc   :  { %v2234_v43 = vmul.f32 %v2218_v27, %v5407_v44  ;;  %v1967_v5 = vmax.f32 %v1921_v60, 0.0  ;;  %v1997_v7 = vadd.f32 %v1996_v17, %v1982_v13  ;;  %v2221_v54 = vmax.f32 %v2179_v40, 0.0  ;;  %v3523_v17 = vpop.f32.mrb[50].mxu0 }
 0x2dd   :  { %v1758_v18 = vadd.f32 %v1757_v10, %v1756_v46  ;;  %v1984_v6 = vmul.f32 %v1968_v2, %v5419_v38  ;;  %v2174_v9 = vadd.f32 %v2173_v25, %v5405_v26  ;;  %v1936_v63 = vadd.f32 %v3461_v36, %v5417_v0  ;;  %v2203_v40 = vpop.f32.mrb[51].mxu0 }
 0x2de   :  { %v2249_v32 = vadd.f32 %v2248_v34, %v2234_v43  ;;  %v1983_v41 = vmul.f32 %v1967_v5, %v5415_v19  ;;  %v2237_v30 = vmul.f32 %v2221_v54, %v5419_v38  ;;  %v1931_v21 = vadd.f32 %v1930_v57, %v5413_v50 }
 0x2df   :  { %v1759_v15 = vadd.f32 %v1758_v18, %v5577_v61  ;;  %v2220_v13 = vmax.f32 %v2174_v9, 0.0  ;;  %v1970_v35 = vmax.f32 %v1936_v63, 0.0  ;;  %v2189_v46 = vadd.f32 %v3517_v23, %v5417_v0 }
 0x2e0   :  { %v1998_v27 = vadd.f32 %v1997_v7, %v1983_v41  ;;  %v2250_v25 = vadd.f32 %v2249_v32, %v2235_v33  ;;  %v1969_v60 = vmax.f32 %v1931_v21, 0.0  ;;  %v2184_v36 = vadd.f32 %v2183_v28, %v5413_v50  ;;  %v3558_v7 = vpop.f32.mrb[50].mxu1  ;;  %v3614_v32 = vpop.f32.mrb[52].mxu0 }
 0x2e1   :  { %1760 = vst [vmem:[#allocation17 + $0x3] sm:$0x1] %v1759_v15  ;;  %v2236_v10 = vmul.f32 %v2220_v13, %v5415_v19  ;;  %v1986_v57 = vmul.f32 %v1970_v35, %v5447_v4  ;;  %v2223_v34 = vmax.f32 %v2189_v46, 0.0  ;;  %v1946_v2 = vadd.f32 %v3464_v47, %v5441_v52  ;;  %v2386_v63 = vpop.f32.mrb[51].mxu1  ;;  %v2639_v13 = vpop.f32.mrb[53].mxu0 }
 0x2e2   :  { %v1985_v43 = vmul.f32 %v1969_v60, %v5433_v42  ;;  %v1999_v5 = vadd.f32 %v1998_v27, %v1984_v6  ;;  %v2222_v23 = vmax.f32 %v2184_v36, 0.0  ;;  %v1941_v54 = vadd.f32 %v1940_v53, %v5425_v20  ;;  %v3561_v36 = vpop.f32.mrb[52].mxu1 }
 0x2e3   :  { %v2251_v33 = vadd.f32 %v2250_v25, %v2236_v10  ;;  %v2239_v18 = vmul.f32 %v2223_v34, %v5447_v4  ;;  %v1972_v28 = vmax.f32 %v1946_v2, 0.0  ;;  %v2199_v9 = vadd.f32 %v3520_v55, %v5441_v52 }
 0x2e4   :  { %v2000_v41 = vadd.f32 %v1999_v5, %v1985_v43  ;;  %v2238_v21 = vmul.f32 %v2222_v23, %v5433_v42  ;;  %v1971_v15 = vmax.f32 %v1941_v54, 0.0  ;;  %v2194_v47 = vadd.f32 %v2193_v51, %v5425_v20  ;;  %v2396_v43 = vpop.f32.mrb[53].mxu1 }
 0x2e5   :  { %v2252_v6 = vadd.f32 %v2251_v33, %v2237_v30  ;;  %v1988_v35 = vmul.f32 %v1972_v28, %v5477_v22  ;;  %v2225_v53 = vmax.f32 %v2199_v9, 0.0  ;;  %v1956_v46 = vadd.f32 %v3467_v29, %v5475_v49  ;;  %v3617_v30 = vpop.f32.mrb[54].mxu0 }
 0x2e6   :  { %v1987_v27 = vmul.f32 %v1971_v15, %v5463_v48  ;;  %v2001_v25 = vadd.f32 %v2000_v41, %v1986_v57  ;;  %v2224_v60 = vmax.f32 %v2194_v47, 0.0  ;;  %v1951_v55 = vadd.f32 %v1950_v14, %v5457_v24  ;;  %v2649_v33 = vpop.f32.mrb[55].mxu0  ;;  %v3564_v47 = vpop.f32.mrb[54].mxu1 }
 0x2e7   :  { %v2253_v10 = vadd.f32 %v2252_v6, %v2238_v21  ;;  %v2241_v34 = vmul.f32 %v2225_v53, %v5477_v22  ;;  %v1974_v2 = vmax.f32 %v1956_v46, 0.0  ;;  %v2209_v51 = vadd.f32 %v3523_v17, %v5475_v49 }
 0x2e8   :  { %v2002_v5 = vadd.f32 %v2001_v25, %v1987_v27  ;;  %v2240_v23 = vmul.f32 %v2224_v60, %v5463_v48  ;;  %v1973_v54 = vmax.f32 %v1951_v55, 0.0  ;;  %v2204_v29 = vadd.f32 %v2203_v40, %v5457_v24  ;;  %v2406_v27 = vpop.f32.mrb[55].mxu1 }
 0x2e9   :  { %v2254_v57 = vadd.f32 %v2253_v10, %v2239_v18  ;;  %v1990_v28 = vmul.f32 %v1974_v2, %v5493_v12  ;;  %v2227_v14 = vmax.f32 %v2209_v51, 0.0  ;;  %v2392_v9 = vadd.f32 %v3558_v7, %v5377_v16  ;;  %v3620_v18 = vpop.f32.mrb[56].mxu0  ;;  %v5879_v2 = vld [vmem:[#allocation30_spill] sm:$0xff] }
 0x2ea   :  { %v1989_v41 = vmul.f32 %v1973_v54, %v5496_v56  ;;  %v2003_v21 = vadd.f32 %v2002_v5, %v1988_v35  ;;  %v2226_v15 = vmax.f32 %v2204_v29, 0.0  ;;  %v2387_v17 = vadd.f32 %v2386_v63, %v5371_v58  ;;  %v2659_v10 = vpop.f32.mrb[57].mxu0 }
 0x2eb   :  { %v2255_v6 = vadd.f32 %v2254_v57, %v2240_v23  ;;  %v2243_v53 = vmul.f32 %v2227_v14, %v5493_v12  ;;  %v2466_v46 = vmax.f32 %v2392_v9, 0.0  ;;  %v2645_v40 = vadd.f32 %v3614_v32, %v5377_v16  ;;  %v5880_v16 = vld [vmem:[#allocation26_spill] sm:$0xff]  ;;  %v3567_v57 = vpop.f32.mrb[56].mxu1 }
 0x2ec   :  { %v2004_v25 = vadd.f32 %v2003_v21, %v1989_v41  ;;  %v2242_v60 = vmul.f32 %v2226_v15, %v5496_v56  ;;  %v2465_v55 = vmax.f32 %v2387_v17, 0.0  ;;  %v2640_v7 = vadd.f32 %v2639_v13, %v5371_v58  ;;  %v2416_v13 = vpop.f32.mrb[57].mxu1 }
 0x2ed   :  { %v2256_v35 = vadd.f32 %v2255_v6, %v2241_v34  ;;  %v2482_v51 = vmul.f32 %v2466_v46, %v5879_v2  ;;  %v2719_v63 = vmax.f32 %v2645_v40, 0.0  ;;  %v2402_v5 = vadd.f32 %v3561_v36, %v5375_v11  ;;  %v3623_v34 = vpop.f32.mrb[58].mxu0 }
 0x2ee   :  { %v2005_v23 = vadd.f32 %v2004_v25, %v1990_v28  ;;  %v2481_v54 = vmul.f32 %v2465_v55, %v5379_v8  ;;  %v2718_v29 = vmax.f32 %v2640_v7, 0.0  ;;  %v2397_v32 = vadd.f32 %v2396_v43, %v5880_v16  ;;  %v2669_v28 = vpop.f32.mrb[59].mxu0  ;;  %v5881_v7 = vld [vmem:[#allocation42_spill] sm:$0xff] }
 0x2ef   :  { %v2257_v14 = vadd.f32 %v2256_v35, %v2242_v60  ;;  %v2735_v9 = vmul.f32 %v2719_v63, %v5879_v2  ;;  %v2468_v41 = vmax.f32 %v2402_v5, 0.0  ;;  %v2655_v58 = vadd.f32 %v3617_v30, %v5375_v11  ;;  %v3570_v30 = vpop.f32.mrb[58].mxu1 }
 0x2f0   :  { %v2006_v21 = vrot.slane %v2005_v23, 4  ;;  %v2497_v15 = vadd.f32 %v2482_v51, %v2481_v54  ;;  %v2734_v17 = vmul.f32 %v2718_v29, %v5379_v8  ;;  %v2467_v36 = vmax.f32 %v2397_v32, 0.0  ;;  %v5882_v8 = vld [vmem:[#allocation29_spill] sm:$0xff]  ;;  %v2426_v5 = vpop.f32.mrb[59].mxu1 }
 0x2f1   :  { %v2258_v6 = vadd.f32 %v2257_v14, %v2243_v53  ;;  %v2484_v46 = vmul.f32 %v2468_v41, %v5389_v59  ;;  %v2721_v40 = vmax.f32 %v2655_v58, 0.0  ;;  %v2650_v43 = vadd.f32 %v2649_v33, %v5880_v16  ;;  %v3573_v58 = vpop.f32.mrb[60].mxu1 }
 0x2f2   :  { %v2007_v25 = vadd.f32 %v2006_v21, %v2005_v23  ;;  %v2750_v60 = vadd.f32 %v2735_v9, %v2734_v17  ;;  %v2483_v55 = vmul.f32 %v2467_v36, %v5383_v1  ;;  %v2412_v11 = vadd.f32 %v3564_v47, %v5881_v7  ;;  %v2436_v36 = vpop.f32.mrb[61].mxu1 }
 0x2f3   :  { %v2259_v35 = vrot.slane %v2258_v6, 4  ;;  %v2737_v2 = vmul.f32 %v2721_v40, %v5389_v59  ;;  %v2720_v51 = vmax.f32 %v2650_v43, 0.0  ;;  %v2407_v63 = vadd.f32 %v2406_v27, %v5882_v8 }
 0x2f4   :  { %v2008_v53 = vrot.slane %v2007_v25, 2  ;;  %v2498_v54 = vadd.f32 %v2497_v15, %v2483_v55  ;;  %v2470_v29 = vmax.f32 %v2412_v11, 0.0  ;;  %v2665_v32 = vadd.f32 %v3620_v18, %v5881_v7 }
 0x2f5   :  { %v2260_v33 = vadd.f32 %v2259_v35, %v2258_v6  ;;  %v2736_v23 = vmul.f32 %v2720_v51, %v5383_v1  ;;  %v2469_v16 = vmax.f32 %v2407_v63, 0.0  ;;  %v2660_v14 = vadd.f32 %v2659_v10, %v5882_v8  ;;  %v3576_v35 = vpop.f32.mrb[62].mxu1 }
 0x2f6   :  { %v2009_v47 = vadd.f32 %v2008_v53, %v2007_v25  ;;  %v2486_v9 = vmul.f32 %v2470_v29, %v5403_v62  ;;  %v2499_v41 = vadd.f32 %v2498_v54, %v2484_v46  ;;  %v2723_v59 = vmax.f32 %v2665_v32, 0.0  ;;  %v2446_v53 = vpop.f32.mrb[63].mxu1 }
 0x2f7   :  { %v2261_v21 = vrot.slane %v2260_v33, 2  ;;  %v2751_v27 = vadd.f32 %v2750_v60, %v2736_v23  ;;  %v2485_v17 = vmul.f32 %v2469_v16, %v5399_v37  ;;  %v2722_v15 = vmax.f32 %v2660_v14, 0.0 }
 0x2f8   :  { %v2010_v40 = vrot.slane %v2009_v47, 1  ;;  %v2739_v18 = vmul.f32 %v2723_v59, %v5403_v62  ;;  %v2422_v1 = vadd.f32 %v3567_v57, %v5401_v31  ;;  %v2417_v6 = vadd.f32 %v2416_v13, %v5397_v45 }
 0x2f9   :  { %v2262_v10 = vadd.f32 %v2261_v21, %v2260_v33  ;;  %v2500_v43 = vadd.f32 %v2499_v41, %v2485_v17  ;;  %v2738_v25 = vmul.f32 %v2722_v15, %v5399_v37  ;;  %v2752_v46 = vadd.f32 %v2751_v27, %v2737_v2 }
 0x2fa   :  { %v2011_v55 = vadd.f32 %v2010_v40, %v2009_v47  ;;  %v2472_v7 = vmax.f32 %v2422_v1, 0.0  ;;  %v2471_v11 = vmax.f32 %v2417_v6, 0.0  ;;  %v2675_v60 = vadd.f32 %v3623_v34, %v5401_v31 }
 0x2fb   :  { %v2263_v51 = vrot.slane %v2262_v10, 1  ;;  %v2753_v8 = vadd.f32 %v2752_v46, %v2738_v25  ;;  %v2501_v63 = vadd.f32 %v2500_v43, %v2486_v9  ;;  %v2670_v62 = vadd.f32 %v2669_v28, %v5397_v45  ;;  %v3579_v45 = vpop.f32.mrb[64].mxu1 }
 0x2fc   :  { %v2012_v57 = vadd.f32 %v2011_v55, %v5577_v61  ;;  %v2488_v13 = vmul.f32 %v2472_v7, %v5411_v3  ;;  %v2487_v54 = vmul.f32 %v2471_v11, %v5407_v44  ;;  %v2432_v32 = vadd.f32 %v3570_v30, %v5409_v39  ;;  %v2456_v9 = vpop.f32.mrb[65].mxu1 }
 0x2fd   :  { %v2264_v37 = vadd.f32 %v2263_v51, %v2262_v10  ;;  %v2724_v2 = vmax.f32 %v2670_v62, 0.0  ;;  %v2754_v29 = vadd.f32 %v2753_v8, %v2739_v18  ;;  %v2725_v34 = vmax.f32 %v2675_v60, 0.0  ;;  %v3626_v15 = vpop.f32.mrb[66].mxu1 }
 0x2fe   :  { %2013 = vst [vmem:[#allocation17 + $0x4] sm:$0x1] %v2012_v57  ;;  %v2502_v31 = vadd.f32 %v2501_v63, %v2487_v54  ;;  %v2427_v33 = vadd.f32 %v2426_v5, %v5405_v26  ;;  %v2442_v23 = vadd.f32 %v3573_v58, %v5417_v0  ;;  %v2474_v14 = vmax.f32 %v2432_v32, 0.0  ;;  %v2679_v1 = vpop.f32.mrb[67].mxu1 }
 0x2ff   :  { %v2265_v28 = vadd.f32 %v2264_v37, %v5577_v61  ;;  %v2740_v16 = vmul.f32 %v2724_v2, %v5407_v44  ;;  %v2437_v47 = vadd.f32 %v2436_v36, %v5413_v50  ;;  %v2447_v27 = vadd.f32 %v2446_v53, %v5425_v20  ;;  %v3629_v60 = vpop.f32.mrb[68].mxu1 }
 0x300   :  { %v2473_v41 = vmax.f32 %v2427_v33, 0.0  ;;  %v2503_v59 = vadd.f32 %v2502_v31, %v2488_v13  ;;  %v2741_v5 = vmul.f32 %v2725_v34, %v5411_v3  ;;  %v2476_v17 = vmax.f32 %v2442_v23, 0.0  ;;  %v2689_v63 = vpop.f32.mrb[69].mxu1 }
 0x301   :  { %2266 = vst [vmem:[#allocation17 + $0x5] sm:$0x1] %v2265_v28  ;;  %v2755_v30 = vadd.f32 %v2754_v29, %v2740_v16  ;;  %v2475_v21 = vmax.f32 %v2437_v47, 0.0  ;;  %v2490_v40 = vmul.f32 %v2474_v14, %v5419_v38  ;;  %v2452_v44 = vadd.f32 %v3576_v35, %v5441_v52  ;;  %v3632_v32 = vpop.f32.mrb[70].mxu1 }
 0x302   :  { %v2489_v58 = vmul.f32 %v2473_v41, %v5415_v19  ;;  %v2457_v36 = vadd.f32 %v2456_v9, %v5457_v24  ;;  %v2685_v18 = vadd.f32 %v3626_v15, %v5409_v39  ;;  %v2477_v43 = vmax.f32 %v2447_v27, 0.0  ;;  %v2699_v23 = vpop.f32.mrb[71].mxu1 }
 0x303   :  { %v2491_v10 = vmul.f32 %v2475_v21, %v5433_v42  ;;  %v2680_v25 = vadd.f32 %v2679_v1, %v5405_v26  ;;  %v2756_v46 = vadd.f32 %v2755_v30, %v2741_v5  ;;  %v2492_v55 = vmul.f32 %v2476_v17, %v5447_v4  ;;  %v3635_v41 = vpop.f32.mrb[72].mxu1 }
 0x304   :  { %v2504_v6 = vadd.f32 %v2503_v59, %v2489_v58  ;;  %v2727_v3 = vmax.f32 %v2685_v18, 0.0  ;;  %v2478_v51 = vmax.f32 %v2452_v44, 0.0  ;;  %v2462_v35 = vadd.f32 %v3579_v45, %v5475_v49  ;;  %v2709_v21 = vpop.f32.mrb[73].mxu1 }
 0x305   :  { %v2726_v11 = vmax.f32 %v2680_v25, 0.0  ;;  %v2479_v8 = vmax.f32 %v2457_v36, 0.0  ;;  %v2695_v39 = vadd.f32 %v3629_v60, %v5417_v0  ;;  %v2493_v53 = vmul.f32 %v2477_v43, %v5463_v48 }
 0x306   :  { %v2505_v7 = vadd.f32 %v2504_v6, %v2490_v40  ;;  %v2690_v26 = vadd.f32 %v2689_v63, %v5413_v50  ;;  %v2743_v13 = vmul.f32 %v2727_v3, %v5419_v38  ;;  %v2494_v31 = vmul.f32 %v2478_v51, %v5477_v22 }
 0x307   :  { %v2742_v57 = vmul.f32 %v2726_v11, %v5415_v19  ;;  %v2729_v2 = vmax.f32 %v2695_v39, 0.0  ;;  %v2480_v34 = vmax.f32 %v2462_v35, 0.0  ;;  %v2495_v0 = vmul.f32 %v2479_v8, %v5496_v56 }
 0x308   :  { %v2506_v62 = vadd.f32 %v2505_v7, %v2491_v10  ;;  %v2728_v29 = vmax.f32 %v2690_v26, 0.0  ;;  %v2705_v33 = vadd.f32 %v3632_v32, %v5441_v52  ;;  %v2700_v50 = vadd.f32 %v2699_v23, %v5425_v20 }
 0x309   :  { %v2757_v37 = vadd.f32 %v2756_v46, %v2742_v57  ;;  %v2745_v14 = vmul.f32 %v2729_v2, %v5447_v4  ;;  %v2496_v59 = vmul.f32 %v2480_v34, %v5493_v12  ;;  %v2715_v30 = vadd.f32 %v3635_v41, %v5475_v49 }
 0x30a   :  { %v2507_v54 = vadd.f32 %v2506_v62, %v2492_v55  ;;  %v2744_v19 = vmul.f32 %v2728_v29, %v5433_v42  ;;  %v2731_v38 = vmax.f32 %v2705_v33, 0.0  ;;  %v2730_v9 = vmax.f32 %v2700_v50, 0.0 }
 0x30b   :  { %v2758_v28 = vadd.f32 %v2757_v37, %v2743_v13  ;;  %v2710_v42 = vadd.f32 %v2709_v21, %v5457_v24  ;;  %v2733_v15 = vmax.f32 %v2715_v30, 0.0 }
 0x30c   :  { %v2508_v45 = vadd.f32 %v2507_v54, %v2493_v53  ;;  %v2746_v27 = vmul.f32 %v2730_v9, %v5463_v48  ;;  %v2747_v20 = vmul.f32 %v2731_v38, %v5477_v22 }
 0x30d   :  { %v2759_v47 = vadd.f32 %v2758_v28, %v2744_v19  ;;  %v2732_v4 = vmax.f32 %v2710_v42, 0.0  ;;  %v2749_v49 = vmul.f32 %v2733_v15, %v5493_v12 }
 0x30e   :  { %v2509_v16 = vadd.f32 %v2508_v45, %v2494_v31 }
 0x30f   :  { %v2760_v5 = vadd.f32 %v2759_v47, %v2745_v14  ;;  %v2748_v44 = vmul.f32 %v2732_v4, %v5496_v56 }
 0x310   :  { %v2510_v52 = vadd.f32 %v2509_v16, %v2495_v0 }
 0x311   :  { %v2761_v17 = vadd.f32 %v2760_v5, %v2746_v27 }
 0x312   :  { %v2511_v58 = vadd.f32 %v2510_v52, %v2496_v59 }
 0x313   :  { %v2762_v36 = vadd.f32 %v2761_v17, %v2747_v20 }
 0x314   :  { %v2512_v40 = vrot.slane %v2511_v58, 4 }
 0x315   :  { %v2763_v1 = vadd.f32 %v2762_v36, %v2748_v44 }
 0x316   :  { %v2513_v18 = vadd.f32 %v2512_v40, %v2511_v58 }
 0x317   :  { %v2764_v10 = vadd.f32 %v2763_v1, %v2749_v49 }
 0x318   :  { %v2514_v6 = vrot.slane %v2513_v18, 2 }
 0x319   :  { %v2765_v43 = vrot.slane %v2764_v10, 4 }
 0x31a   :  { %v2515_v48 = vadd.f32 %v2514_v6, %v2513_v18 }
 0x31b   :  { %v2766_v24 = vadd.f32 %v2765_v43, %v2764_v10 }
 0x31c   :  { %v2516_v25 = vrot.slane %v2515_v48, 1 }
 0x31d   :  { %v2767_v22 = vrot.slane %v2766_v24, 2 }
 0x31e   :  { %v2517_v3 = vadd.f32 %v2516_v25, %v2515_v48 }
 0x31f   :  { %v2768_v55 = vadd.f32 %v2767_v22, %v2766_v24 }
 0x320   :  { %v2518_v46 = vadd.f32 %v2517_v3, %v5577_v61 }
 0x321   :  { %v2769_v7 = vrot.slane %v2768_v55, 1 }
 0x322   :  { %2519 = vst [vmem:[#allocation17 + $0x6] sm:$0x1] %v2518_v46 }
 0x323   :  { %v2770_v56 = vadd.f32 %v2769_v7, %v2768_v55 }
 0x325   :  { %v2771_v11 = vadd.f32 %v2770_v56, %v5577_v61 }
 0x327   :  { %2772 = vst [vmem:[#allocation17 + $0x7] sm:$0x1] %v2771_v11 }
 0x328   :  { %4255 = shalt.err (!%p4252_p6)
}
 0x329   :  { %s4256_s16 = scalar_lea.hbm %s5768_s12, 128 }
 0x32a   :  { %p4257_p7 = scmp.ne.s32.totalorder %s5768_s12, %s4256_s16  ;;  %p4260_p8 = scmp.lt.u32.totalorder %s4256_s16, %s5768_s12 }
 0x32c   :  { %p4262_p9 = pnand %p4260_p8, %p4257_p7 }
 0x32e   :  { %4265 = shalt.err (!%p4262_p9)
}
 0x32f   :  { %2802 = dma.vmem_to_hbm [thread:$0]  %s2800_s1, 128, %s5768_s12, [#allocation16]  }
 0x330   :  { %4274 = dma.done.wait [#allocation4], 128  }
 0x331   :  { %4275 = vsyncadd [#allocation4], 4294967168 }
 0x332   :  { %4276 = dma.done.wait [#allocation16], 256  }
 0x333   :  { %4277 = vsyncadd [#allocation16], 4294967040 }
 0x334   :  { %2812 = vsyncpa [#allocation3], 1 }
 0x335   :  { %2813 = vsyncpa [#allocation6], 1 }
 0x336   :  { %2814 = vsyncpa [#allocation9], 1 }
 0x337   :  { %2815 = vsyncpa [#allocation12], 1 }
 0x338   :  { %2816 = vsyncpa [#allocation4], 1 }
 0x339   :  { %2817 = vsyncpa [#allocation16], 1 }

</bundles_post_ra>
